<compile_context>
chip_gen: v6e
topology: v6e:2x2x1
jax: 0.10.0
libtpu: 0.0.40
codegen_flags: <defaults>
</compile_context>

<pallas_src>
import math

import jax
import jax.numpy as jnp
from jax import lax
from jax.experimental import pallas as pl
from jax.experimental.pallas import tpu as pltpu

BN_EPS = 1e-5
BN_SCALE = 1.0 / math.sqrt(1.0 + BN_EPS)  # eval-mode BN, running_mean=0, running_var=1

PRIMITIVES = [
    'none', 'max_pool_3x3', 'avg_pool_3x3', 'skip_connect',
    'sep_conv_3x3', 'sep_conv_5x5', 'dil_conv_3x3', 'dil_conv_5x5',
]

# The fused kernel below implements exactly this architecture.
_SUPPORTED_ARCH = ((0, 3),   # skip_connect       of state 0
                   (0, 1),   # max_pool_3x3 (+BN) of state 0
                   (2, 6))   # dil_conv_3x3       of state 2


# ----------------------------------------------------------------------------
# Fused SameCell kernel: one grid step == one batch element, fully VMEM-resident.
#   x_ref   : (1, H, W, C_in)    input block (NHWC)
#   wpre_ref: (C_in, C)          preprocess 1x1 conv weight
#   wdw_ref : (9, C)             depthwise 3x3 (dilation 2) weight, k = 3*ky + kx
#   wpw_ref : (C, C)             pointwise 1x1 conv weight
#   o_ref   : (1, 3, H, W, C)    the three concatenated states (slab per state)
#   mp_ref  : (H+2, W+16, C)     -inf padded buffer for max_pool_3x3
#   dc_ref  : (H+4, W+16, C)     zero padded buffer for dil_conv_3x3
# ----------------------------------------------------------------------------
def _same_cell_kernel(x_ref, wpre_ref, wdw_ref, wpw_ref, o_ref, mp_ref, dc_ref):
    _, H, W, C_in = x_ref.shape
    C = wpre_ref.shape[1]

    # ---- preprocess: ReLU -> 1x1 conv -> BN(affine=False) -------------------
    # 1x1 conv over HWC is a (H*W, C_in) @ (C_in, C) matmul on the MXU.
    x = jnp.maximum(x_ref[0], 0.0)                                   # (H, W, C_in)
    pre = (jnp.dot(x.reshape(H * W, C_in), wpre_ref[...],
                   preferred_element_type=jnp.float32) * BN_SCALE
           ).reshape(H, W, C)
    # step 0: skip_connect(state 0)  -> first output slab
    o_ref[0, 0] = pre

    # ---- step 1: max_pool_3x3 (stride 1, pad 1) + BN ------------------------
    # Build the -inf halo in VMEM scratch.  The interior sits at sublane offset 8
    # (tile-aligned store); window reads are unaligned *value* slices, the same
    # pattern the previous kernel already lowered successfully.
    mp_ref[...] = jnp.full(mp_ref.shape, -jnp.inf, dtype=jnp.float32)
    mp_ref[1:H + 1, 8:W + 8, :] = pre
    pm = mp_ref[...]                                                 # (H+2, W+16, C)
    m = pm[0:H, 7:7 + W, :]
    for dy in range(3):
        for dx in range(3):
            if dy == 0 and dx == 0:
                continue
            m = jnp.maximum(m, pm[dy:dy + H, 7 + dx:7 + dx + W, :])
    s2 = m * BN_SCALE
    o_ref[0, 1] = s2

    # ---- step 2: dil_conv_3x3 on state 2 ------------------------------------
    # ReLU -> depthwise 3x3 (dilation 2, pad 2) -> pointwise 1x1 -> BN.
    dc_ref[...] = jnp.zeros(dc_ref.shape, dtype=jnp.float32)
    dc_ref[2:H + 2, 8:W + 8, :] = jnp.maximum(s2, 0.0)               # zero pad = 2
    pz = dc_ref[...]                                                 # (H+4, W+16, C)
    acc = jnp.zeros((H, W, C), jnp.float32)
    for k in range(9):
        dy, dx = divmod(k, 3)
        wk = wdw_ref[k:k + 1, :].reshape(1, 1, C)
        acc = acc + pz[2 * dy:2 * dy + H, 6 + 2 * dx:6 + 2 * dx + W, :] * wk
    s3 = (jnp.dot(acc.reshape(H * W, C), wpw_ref[...],
                  preferred_element_type=jnp.float32) * BN_SCALE
          ).reshape(H, W, C)
    o_ref[0, 2] = s3


# ----------------------------------------------------------------------------
# SameCell forward (single fused pallas_call) and pure-JAX reference
# ----------------------------------------------------------------------------
def same_cell_forward(x_nchw, params, steps, cell_arch):
    arch = tuple(tuple(int(v) for v in a) for a in cell_arch)
    if steps != 3 or arch != _SUPPORTED_ARCH:
        # TODO(synk): only the fixed [skip_connect, max_pool_3x3, dil_conv_3x3]
        # cell_arch is fused here; the remaining PRIMITIVES are not implemented.
        raise NotImplementedError(arch)

    N, C_in, H, W = x_nchw.shape
    C = params['w_pre'].shape[1]

    x_nhwc = jnp.transpose(x_nchw, (0, 2, 3, 1))          # NCHW -> NHWC

    out = pl.pallas_call(
        _same_cell_kernel,
        out_shape=jax.ShapeDtypeStruct((N, steps, H, W, C), jnp.float32),
        grid=(N,),
        in_specs=[
            pl.BlockSpec((1, H, W, C_in), lambda n: (n, 0, 0, 0)),
            pl.BlockSpec((C_in, C), lambda n: (0, 0)),
            pl.BlockSpec((9, C), lambda n: (0, 0)),
            pl.BlockSpec((C, C), lambda n: (0, 0)),
        ],
        out_specs=pl.BlockSpec((1, steps, H, W, C), lambda n: (n, 0, 0, 0, 0)),
        scratch_shapes=[
            pltpu.VMEM((H + 2, W + 16, C), jnp.float32),  # -inf padded maxpool buffer
            pltpu.VMEM((H + 4, W + 16, C), jnp.float32),  # zero padded dil-conv buffer
        ],
        compiler_params=pltpu.CompilerParams(
            dimension_semantics=("parallel",)),           # v7x: shard batch over 2 TCs
    )(x_nhwc, params['w_pre'], params['w_dw_2'], params['w_pw_2'])

    # (N, 3, H, W, C) -> (N, 3, C, H, W) -> (N, 3C, H, W)  (torch.cat channel order)
    return jnp.transpose(out, (0, 1, 4, 2, 3)).reshape(N, steps * C, H, W)


def same_cell_reference(x_nchw, params, steps, cell_arch):
    x = jnp.transpose(x_nchw, (0, 2, 3, 1))
    pre = jnp.einsum('nhwc,cd->nhwd', jnp.maximum(x, 0.0), params['w_pre'],
                     precision=lax.Precision.HIGHEST) * BN_SCALE
    states = [pre]
    C = pre.shape[-1]
    for i in range(steps):
        src = states[cell_arch[i][0]]
        name = PRIMITIVES[cell_arch[i][1]]
        if name == 'skip_connect':
            new = src
        elif name == 'max_pool_3x3':
            new = lax.reduce_window(src, -jnp.inf, lax.max,
                                    (1, 3, 3, 1), (1, 1, 1, 1),
                                    [(0, 0), (1, 1), (1, 1), (0, 0)]) * BN_SCALE
        elif name == 'dil_conv_3x3':
            r = jnp.maximum(src, 0.0)
            wd = params[f'w_dw_{i}'].reshape(3, 3, 1, C)
            dw = lax.conv_general_dilated(
                r, wd, window_strides=(1, 1), padding=[(2, 2), (2, 2)],
                rhs_dilation=(2, 2),
                dimension_numbers=('NHWC', 'HWIO', 'NHWC'),
                feature_group_count=C,
                precision=lax.Precision.HIGHEST)
            new = jnp.einsum('nhwc,cd->nhwd', dw, params[f'w_pw_{i}'],
                             precision=lax.Precision.HIGHEST) * BN_SCALE
        else:
            raise NotImplementedError(name)
        states.append(new)
    result = jnp.concatenate(states[-steps:], axis=-1)
    return jnp.transpose(result, (0, 3, 1, 2))


def init_params(key, steps, filter_multiplier, cell_arch):
    """Deterministic kaiming-normal-style init matching the torch module shapes."""
    C_in = int(filter_multiplier * steps)
    C_out = filter_multiplier
    keys = jax.random.split(key, 1 + 2 * steps)
    params = {}
    # preprocess 1x1 conv: torch weight (C_out, C_in, 1, 1) -> stored as (C_in, C_out)
    w_pre = jax.random.normal(keys[0], (C_out, C_in), jnp.float32) * math.sqrt(2.0 / C_in)
    params['w_pre'] = jnp.transpose(w_pre)
    for i in range(steps):
        if PRIMITIVES[cell_arch[i][1]] == 'dil_conv_3x3':
            # depthwise torch weight (C, 1, 3, 3) -> stored as (9, C)
            wd = jax.random.normal(keys[1 + 2 * i], (C_out, 3, 3), jnp.float32) * math.sqrt(2.0 / 9.0)
            params[f'w_dw_{i}'] = jnp.transpose(wd, (1, 2, 0)).reshape(9, C_out)
            # pointwise torch weight (C, C, 1, 1) -> stored as (C_in, C_out)
            wp = jax.random.normal(keys[2 + 2 * i], (C_out, C_out), jnp.float32) * math.sqrt(2.0 / C_out)
            params[f'w_pw_{i}'] = jnp.transpose(wp)
    return params


if __name__ == "__main__":
    steps = 3
    filter_multiplier = 8
    # [input_state_index, primitive_index]
    cell_arch = [[0, 3],   # skip_connect
                 [0, 1],   # max_pool_3x3 (+ BN affine=False)
                 [2, 6]]   # dil_conv_3x3

    C_in = filter_multiplier * steps   # 24
    N, H, W = 2, 16, 16

    key = jax.random.PRNGKey(0)
    kx, kp = jax.random.split(key)
    x = jax.random.normal(kx, (N, C_in, H, W), jnp.float32)   # NCHW like PyTorch
    params = init_params(kp, steps, filter_multiplier, cell_arch)

    fwd = jax.jit(lambda xx, pp: same_cell_forward(xx, pp, steps, cell_arch))
    out = jax.block_until_ready(fwd(x, params))

    ref = jax.block_until_ready(same_cell_reference(x, params, steps, cell_arch))

    assert out.shape == (N, filter_multiplier * steps, H, W), out.shape
    err = float(jnp.max(jnp.abs(out - ref)))
    assert err < 5e-2, f"max abs error too large: {err}"

    print("KERNEL_OK")
</pallas_src>

<mosaic_0001>
module attributes {stable_mosaic.version = 11 : i64} {
  func.func @_same_cell_kernel(%arg0: i32, %arg1: memref<1x16x16x24xf32, #tpu.memory_space<vmem>>, %arg2: memref<24x8xf32, #tpu.memory_space<vmem>>, %arg3: memref<9x8xf32, #tpu.memory_space<vmem>>, %arg4: memref<8x8xf32, #tpu.memory_space<vmem>>, %arg5: memref<1x3x16x16x8xf32, #tpu.memory_space<vmem>>, %arg6: memref<18x32x8xf32, #tpu.memory_space<vmem>>, %arg7: memref<20x32x8xf32, #tpu.memory_space<vmem>>) attributes {dimension_semantics = [#tpu.dimension_semantics<parallel>], iteration_bounds = array<i64: 2>, scalar_prefetch = 0 : i64, scratch_operands = 2 : i64, tpu.core_type = #tpu.core_type<tc>, window_params = [{transform_indices = @transform_0, window_bounds = array<i64: 1, 16, 16, 24>}, {pipeline_mode = #tpu.pipeline_mode<synchronous>, transform_indices = @transform_1, window_bounds = array<i64: 24, 8>}, {pipeline_mode = #tpu.pipeline_mode<synchronous>, transform_indices = @transform_2, window_bounds = array<i64: 9, 8>}, {pipeline_mode = #tpu.pipeline_mode<synchronous>, transform_indices = @transform_3, window_bounds = array<i64: 8, 8>}, {transform_indices = @transform_4, window_bounds = array<i64: 1, 3, 16, 16, 8>}]} {
    %c0 = arith.constant 0 : index
    %c0_0 = arith.constant 0 : index
    %c0_1 = arith.constant 0 : index
    %c0_2 = arith.constant 0 : index
    %0 = vector.load %arg1[%c0, %c0_0, %c0_1, %c0_2] : memref<1x16x16x24xf32, #tpu.memory_space<vmem>>, vector<1x16x16x24xf32>
    %1 = vector.shape_cast %0 : vector<1x16x16x24xf32> to vector<16x16x24xf32>
    %cst = arith.constant 0.000000e+00 : f32
    %2 = vector.broadcast %cst : f32 to vector<16x16x24xf32>
    %3 = arith.maximumf %1, %2 : vector<16x16x24xf32>
    %4 = vector.shape_cast %3 : vector<16x16x24xf32> to vector<256x24xf32>
    %c0_3 = arith.constant 0 : index
    %c0_4 = arith.constant 0 : index
    %5 = vector.load %arg2[%c0_3, %c0_4] : memref<24x8xf32, #tpu.memory_space<vmem>>, vector<24x8xf32>
    %cst_5 = arith.constant dense<0.000000e+00> : vector<256x8xf32>
    %6 = tpu.matmul %4, %5, %cst_5 {dimension_numbers = #tpu.dot_dimension_numbers<[1], [0], [0], [1], [0, 0, 1, 1], [], []>} : vector<256x24xf32>, vector<24x8xf32>, vector<256x8xf32> -> vector<256x8xf32>
    %cst_6 = arith.constant 0.999994993 : f32
    %7 = vector.broadcast %cst_6 : f32 to vector<256x8xf32>
    %8 = arith.mulf %6, %7 : vector<256x8xf32>
    %9 = vector.shape_cast %8 : vector<256x8xf32> to vector<16x16x8xf32>
    %c0_7 = arith.constant 0 : index
    %c0_8 = arith.constant 0 : index
    %c0_9 = arith.constant 0 : index
    %c0_10 = arith.constant 0 : index
    %c0_11 = arith.constant 0 : index
    %10 = vector.load %arg5[%c0_7, %c0_8, %c0_9, %c0_10, %c0_11] : memref<1x3x16x16x8xf32, #tpu.memory_space<vmem>>, vector<1x1x16x16x8xf32>
    %11 = vector.shape_cast %10 : vector<1x1x16x16x8xf32> to vector<16x16x8xf32>
    %12 = vector.shape_cast %9 : vector<16x16x8xf32> to vector<1x1x16x16x8xf32>
    tpu.vector_store %arg5[%c0_7, %c0_8, %c0_9, %c0_10, %c0_11], %12 {strides = array<i32>} : memref<1x3x16x16x8xf32, #tpu.memory_space<vmem>>, vector<1x1x16x16x8xf32>,
    %cst_12 = arith.constant 0xFF800000 : f32
    %13 = vector.broadcast %cst_12 : f32 to vector<18x32x8xf32>
    %c0_13 = arith.constant 0 : index
    %c0_14 = arith.constant 0 : index
    %c0_15 = arith.constant 0 : index
    %14 = vector.load %arg6[%c0_13, %c0_14, %c0_15] : memref<18x32x8xf32, #tpu.memory_space<vmem>>, vector<18x32x8xf32>
    tpu.vector_store %arg6[%c0_13, %c0_14, %c0_15], %13 {strides = array<i32>} : memref<18x32x8xf32, #tpu.memory_space<vmem>>, vector<18x32x8xf32>,
    %c1 = arith.constant 1 : index
    %c8 = arith.constant 8 : index
    %c0_16 = arith.constant 0 : index
    %15 = vector.load %arg6[%c1, %c8, %c0_16] : memref<18x32x8xf32, #tpu.memory_space<vmem>>, vector<16x16x8xf32>
    tpu.vector_store %arg6[%c1, %c8, %c0_16], %9 {strides = array<i32>} : memref<18x32x8xf32, #tpu.memory_space<vmem>>, vector<16x16x8xf32>,
    %c0_17 = arith.constant 0 : index
    %c0_18 = arith.constant 0 : index
    %c0_19 = arith.constant 0 : index
    %16 = vector.load %arg6[%c0_17, %c0_18, %c0_19] : memref<18x32x8xf32, #tpu.memory_space<vmem>>, vector<18x32x8xf32>
    %17 = vector.extract_strided_slice %16 {offsets = [0, 7, 0], sizes = [16, 16, 8], strides = [1, 1, 1]} : vector<18x32x8xf32> to vector<16x16x8xf32>
    %18 = vector.extract_strided_slice %16 {offsets = [0, 8, 0], sizes = [16, 16, 8], strides = [1, 1, 1]} : vector<18x32x8xf32> to vector<16x16x8xf32>
    %19 = arith.maximumf %17, %18 : vector<16x16x8xf32>
    %20 = vector.extract_strided_slice %16 {offsets = [0, 9, 0], sizes = [16, 16, 8], strides = [1, 1, 1]} : vector<18x32x8xf32> to vector<16x16x8xf32>
    %21 = arith.maximumf %19, %20 : vector<16x16x8xf32>
    %22 = vector.extract_strided_slice %16 {offsets = [1, 7, 0], sizes = [16, 16, 8], strides = [1, 1, 1]} : vector<18x32x8xf32> to vector<16x16x8xf32>
    %23 = arith.maximumf %21, %22 : vector<16x16x8xf32>
    %24 = vector.extract_strided_slice %16 {offsets = [1, 8, 0], sizes = [16, 16, 8], strides = [1, 1, 1]} : vector<18x32x8xf32> to vector<16x16x8xf32>
    %25 = arith.maximumf %23, %24 : vector<16x16x8xf32>
    %26 = vector.extract_strided_slice %16 {offsets = [1, 9, 0], sizes = [16, 16, 8], strides = [1, 1, 1]} : vector<18x32x8xf32> to vector<16x16x8xf32>
    %27 = arith.maximumf %25, %26 : vector<16x16x8xf32>
    %28 = vector.extract_strided_slice %16 {offsets = [2, 7, 0], sizes = [16, 16, 8], strides = [1, 1, 1]} : vector<18x32x8xf32> to vector<16x16x8xf32>
    %29 = arith.maximumf %27, %28 : vector<16x16x8xf32>
    %30 = vector.extract_strided_slice %16 {offsets = [2, 8, 0], sizes = [16, 16, 8], strides = [1, 1, 1]} : vector<18x32x8xf32> to vector<16x16x8xf32>
    %31 = arith.maximumf %29, %30 : vector<16x16x8xf32>
    %32 = vector.extract_strided_slice %16 {offsets = [2, 9, 0], sizes = [16, 16, 8], strides = [1, 1, 1]} : vector<18x32x8xf32> to vector<16x16x8xf32>
    %33 = arith.maximumf %31, %32 : vector<16x16x8xf32>
    %cst_20 = arith.constant 0.999994993 : f32
    %34 = vector.broadcast %cst_20 : f32 to vector<16x16x8xf32>
    %35 = arith.mulf %33, %34 : vector<16x16x8xf32>
    %c0_21 = arith.constant 0 : index
    %c1_22 = arith.constant 1 : index
    %c0_23 = arith.constant 0 : index
    %c0_24 = arith.constant 0 : index
    %c0_25 = arith.constant 0 : index
    %36 = vector.load %arg5[%c0_21, %c1_22, %c0_23, %c0_24, %c0_25] : memref<1x3x16x16x8xf32, #tpu.memory_space<vmem>>, vector<1x1x16x16x8xf32>
    %37 = vector.shape_cast %36 : vector<1x1x16x16x8xf32> to vector<16x16x8xf32>
    %38 = vector.shape_cast %35 : vector<16x16x8xf32> to vector<1x1x16x16x8xf32>
    tpu.vector_store %arg5[%c0_21, %c1_22, %c0_23, %c0_24, %c0_25], %38 {strides = array<i32>} : memref<1x3x16x16x8xf32, #tpu.memory_space<vmem>>, vector<1x1x16x16x8xf32>,
    %cst_26 = arith.constant 0.000000e+00 : f32
    %39 = vector.broadcast %cst_26 : f32 to vector<20x32x8xf32>
    %c0_27 = arith.constant 0 : index
    %c0_28 = arith.constant 0 : index
    %c0_29 = arith.constant 0 : index
    %40 = vector.load %arg7[%c0_27, %c0_28, %c0_29] : memref<20x32x8xf32, #tpu.memory_space<vmem>>, vector<20x32x8xf32>
    tpu.vector_store %arg7[%c0_27, %c0_28, %c0_29], %39 {strides = array<i32>} : memref<20x32x8xf32, #tpu.memory_space<vmem>>, vector<20x32x8xf32>,
    %cst_30 = arith.constant 0.000000e+00 : f32
    %41 = vector.broadcast %cst_30 : f32 to vector<16x16x8xf32>
    %42 = arith.maximumf %35, %41 : vector<16x16x8xf32>
    %c2 = arith.constant 2 : index
    %c8_31 = arith.constant 8 : index
    %c0_32 = arith.constant 0 : index
    %43 = vector.load %arg7[%c2, %c8_31, %c0_32] : memref<20x32x8xf32, #tpu.memory_space<vmem>>, vector<16x16x8xf32>
    tpu.vector_store %arg7[%c2, %c8_31, %c0_32], %42 {strides = array<i32>} : memref<20x32x8xf32, #tpu.memory_space<vmem>>, vector<16x16x8xf32>,
    %c0_33 = arith.constant 0 : index
    %c0_34 = arith.constant 0 : index
    %c0_35 = arith.constant 0 : index
    %44 = vector.load %arg7[%c0_33, %c0_34, %c0_35] : memref<20x32x8xf32, #tpu.memory_space<vmem>>, vector<20x32x8xf32>
    %cst_36 = arith.constant 0.000000e+00 : f32
    %45 = vector.broadcast %cst_36 : f32 to vector<16x16x8xf32>
    %c0_37 = arith.constant 0 : index
    %c0_38 = arith.constant 0 : index
    %46 = vector.load %arg3[%c0_37, %c0_38] : memref<9x8xf32, #tpu.memory_space<vmem>>, vector<1x8xf32>
    %47 = vector.shape_cast %46 : vector<1x8xf32> to vector<1x1x8xf32>
    %48 = vector.extract_strided_slice %44 {offsets = [0, 6, 0], sizes = [16, 16, 8], strides = [1, 1, 1]} : vector<20x32x8xf32> to vector<16x16x8xf32>
    %49 = vector.broadcast %47 : vector<1x1x8xf32> to vector<16x16x8xf32>
    %50 = arith.mulf %48, %49 : vector<16x16x8xf32>
    %51 = arith.addf %45, %50 : vector<16x16x8xf32>
    %c1_39 = arith.constant 1 : index
    %c0_40 = arith.constant 0 : index
    %52 = vector.load %arg3[%c1_39, %c0_40] : memref<9x8xf32, #tpu.memory_space<vmem>>, vector<1x8xf32>
    %53 = vector.shape_cast %52 : vector<1x8xf32> to vector<1x1x8xf32>
    %54 = vector.extract_strided_slice %44 {offsets = [0, 8, 0], sizes = [16, 16, 8], strides = [1, 1, 1]} : vector<20x32x8xf32> to vector<16x16x8xf32>
    %55 = vector.broadcast %53 : vector<1x1x8xf32> to vector<16x16x8xf32>
    %56 = arith.mulf %54, %55 : vector<16x16x8xf32>
    %57 = arith.addf %51, %56 : vector<16x16x8xf32>
    %c2_41 = arith.constant 2 : index
    %c0_42 = arith.constant 0 : index
    %58 = vector.load %arg3[%c2_41, %c0_42] : memref<9x8xf32, #tpu.memory_space<vmem>>, vector<1x8xf32>
    %59 = vector.shape_cast %58 : vector<1x8xf32> to vector<1x1x8xf32>
    %60 = vector.extract_strided_slice %44 {offsets = [0, 10, 0], sizes = [16, 16, 8], strides = [1, 1, 1]} : vector<20x32x8xf32> to vector<16x16x8xf32>
    %61 = vector.broadcast %59 : vector<1x1x8xf32> to vector<16x16x8xf32>
    %62 = arith.mulf %60, %61 : vector<16x16x8xf32>
    %63 = arith.addf %57, %62 : vector<16x16x8xf32>
    %c3 = arith.constant 3 : index
    %c0_43 = arith.constant 0 : index
    %64 = vector.load %arg3[%c3, %c0_43] : memref<9x8xf32, #tpu.memory_space<vmem>>, vector<1x8xf32>
    %65 = vector.shape_cast %64 : vector<1x8xf32> to vector<1x1x8xf32>
    %66 = vector.extract_strided_slice %44 {offsets = [2, 6, 0], sizes = [16, 16, 8], strides = [1, 1, 1]} : vector<20x32x8xf32> to vector<16x16x8xf32>
    %67 = vector.broadcast %65 : vector<1x1x8xf32> to vector<16x16x8xf32>
    %68 = arith.mulf %66, %67 : vector<16x16x8xf32>
    %69 = arith.addf %63, %68 : vector<16x16x8xf32>
    %c4 = arith.constant 4 : index
    %c0_44 = arith.constant 0 : index
    %70 = vector.load %arg3[%c4, %c0_44] : memref<9x8xf32, #tpu.memory_space<vmem>>, vector<1x8xf32>
    %71 = vector.shape_cast %70 : vector<1x8xf32> to vector<1x1x8xf32>
    %72 = vector.extract_strided_slice %44 {offsets = [2, 8, 0], sizes = [16, 16, 8], strides = [1, 1, 1]} : vector<20x32x8xf32> to vector<16x16x8xf32>
    %73 = vector.broadcast %71 : vector<1x1x8xf32> to vector<16x16x8xf32>
    %74 = arith.mulf %72, %73 : vector<16x16x8xf32>
    %75 = arith.addf %69, %74 : vector<16x16x8xf32>
    %c5 = arith.constant 5 : index
    %c0_45 = arith.constant 0 : index
    %76 = vector.load %arg3[%c5, %c0_45] : memref<9x8xf32, #tpu.memory_space<vmem>>, vector<1x8xf32>
    %77 = vector.shape_cast %76 : vector<1x8xf32> to vector<1x1x8xf32>
    %78 = vector.extract_strided_slice %44 {offsets = [2, 10, 0], sizes = [16, 16, 8], strides = [1, 1, 1]} : vector<20x32x8xf32> to vector<16x16x8xf32>
    %79 = vector.broadcast %77 : vector<1x1x8xf32> to vector<16x16x8xf32>
    %80 = arith.mulf %78, %79 : vector<16x16x8xf32>
    %81 = arith.addf %75, %80 : vector<16x16x8xf32>
    %c6 = arith.constant 6 : index
    %c0_46 = arith.constant 0 : index
    %82 = vector.load %arg3[%c6, %c0_46] : memref<9x8xf32, #tpu.memory_space<vmem>>, vector<1x8xf32>
    %83 = vector.shape_cast %82 : vector<1x8xf32> to vector<1x1x8xf32>
    %84 = vector.extract_strided_slice %44 {offsets = [4, 6, 0], sizes = [16, 16, 8], strides = [1, 1, 1]} : vector<20x32x8xf32> to vector<16x16x8xf32>
    %85 = vector.broadcast %83 : vector<1x1x8xf32> to vector<16x16x8xf32>
    %86 = arith.mulf %84, %85 : vector<16x16x8xf32>
    %87 = arith.addf %81, %86 : vector<16x16x8xf32>
    %c7 = arith.constant 7 : index
    %c0_47 = arith.constant 0 : index
    %88 = vector.load %arg3[%c7, %c0_47] : memref<9x8xf32, #tpu.memory_space<vmem>>, vector<1x8xf32>
    %89 = vector.shape_cast %88 : vector<1x8xf32> to vector<1x1x8xf32>
    %90 = vector.extract_strided_slice %44 {offsets = [4, 8, 0], sizes = [16, 16, 8], strides = [1, 1, 1]} : vector<20x32x8xf32> to vector<16x16x8xf32>
    %91 = vector.broadcast %89 : vector<1x1x8xf32> to vector<16x16x8xf32>
    %92 = arith.mulf %90, %91 : vector<16x16x8xf32>
    %93 = arith.addf %87, %92 : vector<16x16x8xf32>
    %c8_48 = arith.constant 8 : index
    %c0_49 = arith.constant 0 : index
    %94 = vector.load %arg3[%c8_48, %c0_49] : memref<9x8xf32, #tpu.memory_space<vmem>>, vector<1x8xf32>
    %95 = vector.shape_cast %94 : vector<1x8xf32> to vector<1x1x8xf32>
    %96 = vector.extract_strided_slice %44 {offsets = [4, 10, 0], sizes = [16, 16, 8], strides = [1, 1, 1]} : vector<20x32x8xf32> to vector<16x16x8xf32>
    %97 = vector.broadcast %95 : vector<1x1x8xf32> to vector<16x16x8xf32>
    %98 = arith.mulf %96, %97 : vector<16x16x8xf32>
    %99 = arith.addf %93, %98 : vector<16x16x8xf32>
    %100 = vector.shape_cast %99 : vector<16x16x8xf32> to vector<256x8xf32>
    %c0_50 = arith.constant 0 : index
    %c0_51 = arith.constant 0 : index
    %101 = vector.load %arg4[%c0_50, %c0_51] : memref<8x8xf32, #tpu.memory_space<vmem>>, vector<8x8xf32>
    %cst_52 = arith.constant dense<0.000000e+00> : vector<256x8xf32>
    %102 = tpu.matmul %100, %101, %cst_52 {dimension_numbers = #tpu.dot_dimension_numbers<[1], [0], [0], [1], [0, 0, 1, 1], [], []>} : vector<256x8xf32>, vector<8x8xf32>, vector<256x8xf32> -> vector<256x8xf32>
    %cst_53 = arith.constant 0.999994993 : f32
    %103 = vector.broadcast %cst_53 : f32 to vector<256x8xf32>
    %104 = arith.mulf %102, %103 : vector<256x8xf32>
    %105 = vector.shape_cast %104 : vector<256x8xf32> to vector<16x16x8xf32>
    %c0_54 = arith.constant 0 : index
    %c2_55 = arith.constant 2 : index
    %c0_56 = arith.constant 0 : index
    %c0_57 = arith.constant 0 : index
    %c0_58 = arith.constant 0 : index
    %106 = vector.load %arg5[%c0_54, %c2_55, %c0_56, %c0_57, %c0_58] : memref<1x3x16x16x8xf32, #tpu.memory_space<vmem>>, vector<1x1x16x16x8xf32>
    %107 = vector.shape_cast %106 : vector<1x1x16x16x8xf32> to vector<16x16x8xf32>
    %108 = vector.shape_cast %105 : vector<16x16x8xf32> to vector<1x1x16x16x8xf32>
    tpu.vector_store %arg5[%c0_54, %c2_55, %c0_56, %c0_57, %c0_58], %108 {strides = array<i32>} : memref<1x3x16x16x8xf32, #tpu.memory_space<vmem>>, vector<1x1x16x16x8xf32>,
    return
  }
  func.func @transform_0(%arg0: i32) -> (i32, i32, i32, i32) {
    %c0_i32 = arith.constant 0 : i32
    %c0_i32_0 = arith.constant 0 : i32
    %c0_i32_1 = arith.constant 0 : i32
    %c0_i32_2 = arith.constant 0 : i32
    return %arg0, %c0_i32, %c0_i32_0, %c0_i32_1 : i32, i32, i32, i32
  }
  func.func @transform_1(%arg0: i32) -> (i32, i32) {
    %c0_i32 = arith.constant 0 : i32
    %c0_i32_0 = arith.constant 0 : i32
    %c0_i32_1 = arith.constant 0 : i32
    return %c0_i32, %c0_i32_0 : i32, i32
  }
  func.func @transform_2(%arg0: i32) -> (i32, i32) {
    %c0_i32 = arith.constant 0 : i32
    %c0_i32_0 = arith.constant 0 : i32
    %c0_i32_1 = arith.constant 0 : i32
    return %c0_i32, %c0_i32_0 : i32, i32
  }
  func.func @transform_3(%arg0: i32) -> (i32, i32) {
    %c0_i32 = arith.constant 0 : i32
    %c0_i32_0 = arith.constant 0 : i32
    %c0_i32_1 = arith.constant 0 : i32
    return %c0_i32, %c0_i32_0 : i32, i32
  }
  func.func @transform_4(%arg0: i32) -> (i32, i32, i32, i32, i32) {
    %c0_i32 = arith.constant 0 : i32
    %c0_i32_0 = arith.constant 0 : i32
    %c0_i32_1 = arith.constant 0 : i32
    %c0_i32_2 = arith.constant 0 : i32
    %c0_i32_3 = arith.constant 0 : i32
    return %arg0, %c0_i32, %c0_i32_0, %c0_i32_1, %c0_i32_2 : i32, i32, i32, i32, i32
  }
}

</mosaic_0001>

<bundles_post_ra>
// kernel: _lambda_.1
= control target key start
LH: loop header
LB: loop body
LE: loop exit
PB: predicated region body
PF: predicated region fallthrough
CT: control target
= control target key end

     0   :  { %9 = vsyncpa [#allocation5], 0  ;;  %s7855_s0 = inlined_call_operand.hbm [shape: f32[2,16,16,24], index: 0, kind: input, shape index: {}]   ;;  %s7856_s1 = inlined_call_operand.vmem [shape: f32[24,8], index: 1, kind: input, shape index: {}]   ;;  %s7857_s2 = inlined_call_operand.vmem [shape: f32[9,8], index: 2, kind: input, shape index: {}]   ;;  %s7858_s3 = inlined_call_operand.vmem [shape: f32[8,8], index: 3, kind: input, shape index: {}]   ;;  %s7859_s4 = inlined_call_operand.vmem [shape: f32[2,3,16,16,8], index: 4, kind: output, shape index: {}]  }
   0x1   :  { %11 = vsyncpa [#allocation5 + $0x1], 0  ;;  %s4724_s15 = smov 0   ;;  %s4726_s16 = smov 0  }
   0x2   :  { %s4728_s17 = smov 0   ;;  %s4730_s18 = smov 0  }
   0x3 LB: > { %s4743_s19 = sadd.s32 4294967295, %s4692_s18   ;;  %s4746_s20 = sadd.s32 1, %s4692_s18   ;;  %s4692_s18 = sphi %s4730_s18, %s7934_s18   ;;  %s4688_s17 = sphi %s4728_s17, %s7933_s17   ;;  %s4684_s16 = sphi %s4726_s16, %s7932_s16   ;;  %s4680_s15 = sphi %s4724_s15, %s7931_s15  }
   0x4   : > { %s21_s21 = ssub.s32 %s4692_s18, %s4746_s20  ;;  %s24_s22 = sadd.s32 1, %s4688_s17 }
   0x5   : > { %p22_p0 = scmp.eq.s32.totalorder %s21_s21, 0  ;;  %p31_p1 = scmp.ne.s32.totalorder %s4688_s17, %s4684_s16 }
   0x6   : > { %p32_p2 = scmp.eq.s32.totalorder %s4692_s18, 0  ;;  %p37_p3 = scmp.ne.s32.totalorder %s4684_s16, %s4680_s15 }
   0x7   : > { %s4756_s23 = scalar_select %p22_p0, %s4688_s17, %s24_s22  }
   0x8   : > { %p33_p4 = por %p32_p2, %p31_p1  ;;  %p38_p5 = scmp.eq.s32.totalorder %s4743_s19, 0 }
   0x9   : > { %p4566_p6 = scmp.lt.s32.totalorder %s4692_s18, 2  ;;  %s159_s25 = sand.u32 1, %s4688_s17  }
   0xa   : > { %p4760_p7 = por %p38_p5, %p37_p3  ;;  %s4225_s26 = sshll.u32 %s159_s25, 8 }
   0xb   : > { %s4386_s27 = sshll.u32 %s4692_s18, 12  ;;  %s163_s5 = scalar_lea.vmem [#allocation4], %s4225_s26 }
   0xc   : > { %s7881_s24 = scalar_select %p4760_p7, 1, 0 }
   0xd   : > { %s4769_s30 = scalar_lea.hbm %s7855_s0, %s4386_s27  ;;  %s170_s6 = sshll.u32 %s163_s5, 4  ;;  %s4771_s6 = int_to_ptr.vmem [resolvable:$true] %s170_s6 }
   0xe   : > { %p4773_p8 = pnand %p4566_p6, %p33_p4  ;;  %s4778_s8 = scalar_lea.sflag [#allocation5], %s159_s25 }
   0xf   : > { %s4630_s9 = scalar_lea.hbm %s4769_s30, 4096  ;;  %s4635_s12 = scalar_lea.hbm %s7855_s0, 8192 }
  0x10   : > { %p4631_p10 = scmp.ne.s32.totalorder %s4769_s30, %s4630_s9  ;;  %p4632_p11 = pneg %p4773_p8 }
  0x11   : > { %p4636_p0 = scmp.lt.s32.totalorder %s4769_s30, %s7855_s0  ;;  %p4637_p1 = scmp.lt.s32.totalorder %s4635_s12, %s4630_s9 }
  0x12   : > { %p4633_p12 = pnand %p4632_p11, %p4631_p10 }
  0x13   : > { %p4638_p2 = por %p4637_p1, %p4636_p0 }
  0x14   : > { %p4634_p13 = pneg %p4633_p12 }
  0x16   : > { %p4639_p3 = pnand %p4638_p2, %p4634_p13 }
  0x18   : > { %4642 = shalt.err (!%p4639_p3)
}
  0x19   : > { %s4643_s15 = scalar_lea.vmem %s4771_s6, 4096  ;;  %s4694_s21 = smov [#allocation4]  }
  0x1a   : > { %p4644_p4 = scmp.ne.s32.totalorder %s4771_s6, %s4643_s15  ;;  %s4648_s22 = sshll.u32 %s4694_s21, 4  ;;  %s4649_s22 = int_to_ptr.vmem [resolvable:$false] %s4648_s22 }
  0x1b   : > { %s4650_s25 = scalar_lea.vmem %s4649_s22, 8192  ;;  %p4651_p10 = scmp.lt.s32.totalorder %s4771_s6, %s4649_s22 }
  0x1c   : > { %p4646_p5 = pnand %p4644_p4, %p4632_p11  ;;  %p4652_p12 = scmp.lt.s32.totalorder %s4650_s25, %s4643_s15 }
  0x1e   : > { %p4647_p6 = pneg %p4646_p5  ;;  %p4653_p9 = por %p4652_p12, %p4651_p10 }
  0x20   : > { %p4654_p7 = pnand %p4653_p9, %p4647_p6 }
  0x22   : > { %4657 = shalt.err (!%p4654_p7)
}
  0x23   : > { %s4695_s26 = smov 128   ;;  %s4696_s27 = smov 8  }
  0x24   : > { %4565 = dma.hbm_to_vmem [thread:$0]  (!%p4773_p8), %s4769_s30, 4096, %s4771_s6, %s4778_s8, %s4695_s26, %s4695_s26, %s4696_s27  }
  0x25   : > { %p178_p11 = scmp.lt.s32.totalorder %s4692_s18, 3  ;;  %p7883_p13 = scmp.ge.s32.totalorder %s4692_s18, 1 }
  0x27   : > { %p179_p0 = pnand %p7883_p13, %p178_p11 }
  0x28   : > { %s184_s28 = sand.u32 (!%p179_p0), 1, %s4684_s16   ;;  %p7884_p7 = scmp.ne.s32.totalorder (!%p179_p0), %s7881_s24, 0 }
  0x29   : > { %182 = sbr.rel (%p179_p0) target bundleno = 939 (0x3ab), region = 36  ;;  %s4229_s29 = sshll.u32 (!%p179_p0), %s184_s28, 8 }
  0x2a   : > { %s185_s5 = scalar_lea.sflag (!%p179_p0), [#allocation5], %s184_s28  ;;  %s4803_s9 = scalar_lea.vmem (!%p179_p0), [#allocation4], %s4229_s29 }
  0x2e   : > { %4675 = dma.done.wait (%p7884_p7), %s185_s5, 4096  }
  0x2f   : > { %4677 = vsyncadd (%p7884_p7), %s185_s5, 4294963200  ;;  %v284_v0 = vld [vmem:[%s7856_s1 + $0x10] sm:$0xff]  ;;  %v283_v1 = vld [vmem:[%s7856_s1 + $0x8] sm:$0xff]  ;;  %vm285_vm0 = vcmask 195584   ;;  %vm639_vm1 = vcmask 64512   ;;  %p213_p8 = scmp.lt.s32.totalorder %s4743_s19, 1 }
  0x30   : > { %4455 = vmatprep.subr.mxu0 %v284_v0  ;;  %v218_v2 = vld [vmem:[%s4803_s9] sm:$0xff]  ;;  %v219_v3 = vld [vmem:[%s4803_s9 + $0x8] sm:$0xff]  ;;  %v220_v4 = vld [vmem:[%s4803_s9 + $0x10] sm:$0xff]  ;;  %vm1042_vm2 = vcmask 1045504   ;;  %vm881_vm3 = vcmask 1046528   ;;  %vm2312_vm4 = vcmask 1043456  }
  0x31   : > { %4456 = vmatpush3.msra.mxu0 %v284_v0  ;;  %v282_v5 = vld [vmem:[%s7856_s1] sm:$0xff]  ;;  %v250_v6 = vmax.f32 %v218_v2, 0.0  ;;  %v251_v7 = vmax.f32 %v219_v3, 0.0  ;;  %v252_v8 = vmax.f32 %v220_v4, 0.0  ;;  %v221_v9 = vld [vmem:[%s4803_s9 + $0x18] sm:$0xff]  ;;  %v223_v13 = vld [vmem:[%s4803_s9 + $0x28] sm:$0xff] }
  0x32   : > { %4457 = vmatprep.subr.mxu0 %v283_v1  ;;  %v222_v10 = vld [vmem:[%s4803_s9 + $0x20] sm:$0xff]  ;;  %v253_v11 = vmax.f32 %v221_v9, 0.0  ;;  %v224_v14 = vld [vmem:[%s4803_s9 + $0x30] sm:$0xff]  ;;  %v255_v15 = vmax.f32 %v223_v13, 0.0  ;;  %v225_v17 = vld [vmem:[%s4803_s9 + $0x38] sm:$0xff]  ;;  %v4697_v3 = vmov -inf  }
  0x33   : > { %4458 = vmatpush3.msra.mxu0 %v283_v1  ;;  %4461 = vmatprep.mubr.msk.f32.mxu0 %vm285_vm0, %v250_v6  ;;  %v254_v12 = vmax.f32 %v222_v10, 0.0  ;;  %v256_v16 = vmax.f32 %v224_v14, 0.0  ;;  %v226_v18 = vld [vmem:[%s4803_s9 + $0x40] sm:$0xff]  ;;  %v257_v19 = vmax.f32 %v225_v17, 0.0  ;;  %v227_v21 = vld [vmem:[%s4803_s9 + $0x48] sm:$0xff]  ;;  %v228_v22 = vld [vmem:[%s4803_s9 + $0x50] sm:$0xff] }
  0x34   : > { %4459 = vmatprep.subr.mxu0 %v282_v5  ;;  %v258_v20 = vmax.f32 %v226_v18, 0.0  ;;  %v259_v23 = vmax.f32 %v227_v21, 0.0  ;;  %v260_v24 = vmax.f32 %v228_v22, 0.0  ;;  %v229_v25 = vld [vmem:[%s4803_s9 + $0x58] sm:$0xff]  ;;  %v230_v26 = vld [vmem:[%s4803_s9 + $0x60] sm:$0xff]  ;;  %v231_v29 = vld [vmem:[%s4803_s9 + $0x68] sm:$0xff] }
  0x35   : > { %4460 = vmatpush3.msra.mxu0 %v282_v5  ;;  %v261_v27 = vmax.f32 %v229_v25, 0.0  ;;  %v262_v28 = vmax.f32 %v230_v26, 0.0  ;;  %v232_v30 = vld [vmem:[%s4803_s9 + $0x70] sm:$0xff]  ;;  %v263_v31 = vmax.f32 %v231_v29, 0.0  ;;  %v233_v33 = vld [vmem:[%s4803_s9 + $0x78] sm:$0xff]  ;;  %v234_v34 = vld [vmem:[%s4803_s9 + $0x80] sm:$0xff] }
  0x36   : > { %4462 = vmatmul.mubr.msk.f32.vlgmr.msra.gmra.mxu0 %vm285_vm0, %v251_v7  ;;  %v264_v32 = vmax.f32 %v232_v30, 0.0  ;;  %v265_v35 = vmax.f32 %v233_v33, 0.0  ;;  %v266_v36 = vmax.f32 %v234_v34, 0.0  ;;  %v235_v37 = vld [vmem:[%s4803_s9 + $0x88] sm:$0xff]  ;;  %v236_v38 = vld [vmem:[%s4803_s9 + $0x90] sm:$0xff]  ;;  %v237_v41 = vld [vmem:[%s4803_s9 + $0x98] sm:$0xff] }
  0x37   : > { %4464 = vmatprep.mubr.msk.f32.mxu0 %vm285_vm0, %v252_v8  ;;  %v267_v39 = vmax.f32 %v235_v37, 0.0  ;;  %v268_v40 = vmax.f32 %v236_v38, 0.0  ;;  %v238_v42 = vld [vmem:[%s4803_s9 + $0xa0] sm:$0xff]  ;;  %v269_v43 = vmax.f32 %v237_v41, 0.0  ;;  %v239_v45 = vld [vmem:[%s4803_s9 + $0xa8] sm:$0xff]  ;;  %v240_v46 = vld [vmem:[%s4803_s9 + $0xb0] sm:$0xff] }
  0x38   : > { %v270_v44 = vmax.f32 %v238_v42, 0.0  ;;  %v271_v47 = vmax.f32 %v239_v45, 0.0  ;;  %v272_v48 = vmax.f32 %v240_v46, 0.0  ;;  %v241_v49 = vld [vmem:[%s4803_s9 + $0xb8] sm:$0xff]  ;;  %v242_v50 = vld [vmem:[%s4803_s9 + $0xc0] sm:$0xff]  ;;  %v243_v53 = vld [vmem:[%s4803_s9 + $0xc8] sm:$0xff] }
  0x39   : > { %v273_v51 = vmax.f32 %v241_v49, 0.0  ;;  %v274_v52 = vmax.f32 %v242_v50, 0.0  ;;  %v244_v54 = vld [vmem:[%s4803_s9 + $0xd0] sm:$0xff]  ;;  %v275_v55 = vmax.f32 %v243_v53, 0.0  ;;  %v245_v57 = vld [vmem:[%s4803_s9 + $0xd8] sm:$0xff]  ;;  %v246_v58 = vld [vmem:[%s4803_s9 + $0xe0] sm:$0xff] }
  0x3a   : > { %4465 = vmatmul.mubr.msk.f32.gmra.mxu0 %vm285_vm0, %v253_v11  ;;  %v276_v56 = vmax.f32 %v244_v54, 0.0  ;;  %v277_v59 = vmax.f32 %v245_v57, 0.0  ;;  %v278_v60 = vmax.f32 %v246_v58, 0.0  ;;  %v247_v61 = vld [vmem:[%s4803_s9 + $0xe8] sm:$0xff]  ;;  %v248_v62 = vld [vmem:[%s4803_s9 + $0xf0] sm:$0xff]  ;;  %v249_v1 = vld [vmem:[%s4803_s9 + $0xf8] sm:$0xff] }
  0x3b   : > { %4467 = vmatprep.mubr.msk.f32.mxu0 %vm285_vm0, %v254_v12  ;;  %v279_v63 = vmax.f32 %v247_v61, 0.0  ;;  %v280_v0 = vmax.f32 %v248_v62, 0.0  ;;  %v281_v2 = vmax.f32 %v249_v1, 0.0  ;;  %674 = vst.msk [vmem:[#allocation2 + $0x10] sm:$0xff] %vm639_vm1, %v4697_v3  ;;  %675 = vst.msk [vmem:[#allocation2 + $0x18] sm:$0xff] %vm639_vm1, %v4697_v3  ;;  %v4698_v4 = vmov 0.0  }
  0x3c   : > { %678 = vst.msk [vmem:[#allocation2 + $0x30] sm:$0xff] %vm639_vm1, %v4697_v3  ;;  %679 = vst.msk [vmem:[#allocation2 + $0x38] sm:$0xff] %vm639_vm1, %v4697_v3  ;;  %s7936_s19 = smov (!%p213_p8, %s4743_s19), 1  ;;  %v5191_v7 = vld [vmem:[%s7857_s2 + $0x1] ss:$0 sm:$0xff]  ;;  %vm1593_vm5 = vcmask 63488  }
  0x3d   : > { %672 = vst.msk [vmem:[#allocation2] sm:$0xff] %vm639_vm1, %v4697_v3  ;;  %673 = vst.msk [vmem:[#allocation2 + $0x8] sm:$0xff] %vm639_vm1, %v4697_v3  ;;  %s4559_s12 = smul.u32 768, %s7936_s19  ;;  %vm1590_vm6 = vcmask 64519   ;;  %vm3719_vm7 = vcmask 1041408  }
  0x3e   : > { %4468 = vmatmul.mubr.msk.f32.gmra.mxu0 %vm285_vm0, %v255_v15  ;;  %676 = vst.msk [vmem:[#allocation2 + $0x20] sm:$0xff] %vm639_vm1, %v4697_v3  ;;  %677 = vst.msk [vmem:[#allocation2 + $0x28] sm:$0xff] %vm639_vm1, %v4697_v3 }
  0x3f   : > { %4470 = vmatprep.mubr.msk.f32.mxu0 %vm285_vm0, %v256_v16  ;;  %680 = vst.msk [vmem:[#allocation2 + $0x40] sm:$0xff] %vm639_vm1, %v4697_v3  ;;  %681 = vst.msk [vmem:[#allocation2 + $0x48] sm:$0xff] %vm639_vm1, %v4697_v3  ;;  %v5202_v16 = vld [vmem:[%s7857_s2 + $0x2] ss:$0 sm:$0xff]  ;;  %s5220_s25 = scalar_lea.vmem %s7859_s4, %s4559_s12 }
  0x40   : > { %682 = vst.msk [vmem:[#allocation2 + $0x50] sm:$0xff] %vm639_vm1, %v4697_v3  ;;  %683 = vst.msk [vmem:[#allocation2 + $0x58] sm:$0xff] %vm639_vm1, %v4697_v3 }
  0x41   : > { %684 = vst.msk [vmem:[#allocation2 + $0x60] sm:$0xff] %vm639_vm1, %v4697_v3  ;;  %685 = vst.msk [vmem:[#allocation2 + $0x68] sm:$0xff] %vm639_vm1, %v4697_v3 }
  0x42   : > { %4471 = vmatmul.mubr.msk.f32.gmra.mxu0 %vm285_vm0, %v257_v19  ;;  %686 = vst.msk [vmem:[#allocation2 + $0x70] sm:$0xff] %vm639_vm1, %v4697_v3  ;;  %687 = vst.msk [vmem:[#allocation2 + $0x78] sm:$0xff] %vm639_vm1, %v4697_v3  ;;  %v779_v8 = vld [vmem:[#allocation2 + $0x10] sm:$0xff]  ;;  %v780_v9 = vld [vmem:[#allocation2 + $0x18] sm:$0xff] }
  0x43   : > { %4473 = vmatprep.mubr.msk.f32.mxu0 %vm285_vm0, %v258_v20  ;;  %688 = vst.msk [vmem:[#allocation2 + $0x80] sm:$0xff] %vm639_vm1, %v4697_v3  ;;  %689 = vst.msk [vmem:[#allocation2 + $0x88] sm:$0xff] %vm639_vm1, %v4697_v3  ;;  %v883_v13 = vrot.slane %v779_v8, 1  ;;  %v1044_v14 = vrot.slane %v779_v8, 2  ;;  %v1046_v15 = vrot.slane %v780_v9, 2 }
  0x44   : > { %690 = vst.msk [vmem:[#allocation2 + $0x90] sm:$0xff] %vm639_vm1, %v4697_v3  ;;  %691 = vst.msk [vmem:[#allocation2 + $0x98] sm:$0xff] %vm639_vm1, %v4697_v3  ;;  %v5193_v10 = vld [vmem:[#allocation2 + $0x8] sm:$0xff]  ;;  %v777_v18 = vld [vmem:[#allocation2] sm:$0xff] }
  0x45   : > { %692 = vst.msk [vmem:[#allocation2 + $0xa0] sm:$0xff] %vm639_vm1, %v4697_v3  ;;  %693 = vst.msk [vmem:[#allocation2 + $0xa8] sm:$0xff] %vm639_vm1, %v4697_v3  ;;  %v882_v17 = vrot.slane %v5193_v10, 1  ;;  %v5208_v20 = vld [vmem:[%s7857_s2] ss:$0 sm:$0xff]  ;;  %v5222_v26 = vmax.f32 %v779_v8, %v883_v13 }
  0x46   : > { %4474 = vmatmul.mubr.msk.f32.gmra.mxu0 %vm285_vm0, %v259_v23  ;;  %694 = vst.msk [vmem:[#allocation2 + $0xb0] sm:$0xff] %vm639_vm1, %v4697_v3  ;;  %695 = vst.msk [vmem:[#allocation2 + $0xb8] sm:$0xff] %vm639_vm1, %v4697_v3 }
  0x47   : > { %4476 = vmatprep.mubr.msk.f32.mxu0 %vm285_vm0, %v260_v24  ;;  %696 = vst.msk [vmem:[#allocation2 + $0xc0] sm:$0xff] %vm639_vm1, %v4697_v3  ;;  %697 = vst.msk [vmem:[#allocation2 + $0xc8] sm:$0xff] %vm639_vm1, %v4697_v3  ;;  %v884_v29 = vsel %vm881_vm3, %v882_v17, %v883_v13  ;;  %v978_v30 = vmax.f32 %v777_v18, %v882_v17  ;;  %v5236_v37 = vld [vmem:[#allocation2 + $0x58] sm:$0xff] }
  0x48   : > { %698 = vst.msk [vmem:[#allocation2 + $0xd0] sm:$0xff] %vm639_vm1, %v4697_v3  ;;  %699 = vst.msk [vmem:[#allocation2 + $0xd8] sm:$0xff] %vm639_vm1, %v4697_v3 }
  0x49   : > { %700 = vst.msk [vmem:[#allocation2 + $0xe0] sm:$0xff] %vm639_vm1, %v4697_v3  ;;  %701 = vst.msk [vmem:[#allocation2 + $0xe8] sm:$0xff] %vm639_vm1, %v4697_v3  ;;  %v5238_v38 = vld [vmem:[#allocation2 + $0x78] sm:$0xff] }
  0x4a   : > { %4477 = vmatmul.mubr.msk.f32.gmra.mxu0 %vm285_vm0, %v261_v27  ;;  %702 = vst.msk [vmem:[#allocation2 + $0xf0] sm:$0xff] %vm639_vm1, %v4697_v3  ;;  %703 = vst.msk [vmem:[#allocation2 + $0xf8] sm:$0xff] %vm639_vm1, %v4697_v3  ;;  %v5225_v27 = vsel %vm1042_vm2, %v1044_v14, %v1046_v15  ;;  %v1061_v58 = vrot.slane %v5238_v38, 2 }
  0x4b   : > { %4479 = vmatprep.mubr.msk.f32.mxu0 %vm285_vm0, %v262_v28  ;;  %704 = vst.msk [vmem:[#allocation2 + $0x100] sm:$0xff] %vm639_vm1, %v4697_v3  ;;  %705 = vst.msk [vmem:[#allocation2 + $0x108] sm:$0xff] %vm639_vm1, %v4697_v3  ;;  %v1173_v42 = vmax.f32 %v5222_v26, %v5225_v27  ;;  %v5248_v45 = vld [vmem:[#allocation2 + $0x98] sm:$0xff]  ;;  %v3800_v26 = vld [vmem:[%s7858_s3] sm:$0xff] }
  0x4c   : > { %706 = vst.msk [vmem:[#allocation2 + $0x110] sm:$0xff] %vm639_vm1, %v4697_v3  ;;  %707 = vst.msk [vmem:[#allocation2 + $0x118] sm:$0xff] %vm639_vm1, %v4697_v3  ;;  %4509 = vmatprep.subr.mxu1 %v3800_v26 }
  0x4d   : > { %708 = vst.msk [vmem:[#allocation2 + $0x120] sm:$0xff] %vm639_vm1, %v4697_v3  ;;  %709 = vst.msk [vmem:[#allocation2 + $0x128] sm:$0xff] %vm639_vm1, %v4697_v3  ;;  %v5250_v46 = vld [vmem:[#allocation2 + $0xb8] sm:$0xff]  ;;  %4510 = vmatpush3.msra.mxu1 %v3800_v26 }
  0x4e   : > { %4480 = vmatmul.mubr.msk.f32.gmra.mxu0 %vm285_vm0, %v263_v31  ;;  %710 = vst.msk [vmem:[#allocation2 + $0x130] sm:$0xff] %vm639_vm1, %v4697_v3  ;;  %711 = vst.msk [vmem:[#allocation2 + $0x138] sm:$0xff] %vm639_vm1, %v4697_v3  ;;  %v1043_v31 = vrot.slane %v5193_v10, 2 }
  0x4f   : > { %4482 = vmatprep.mubr.msk.f32.mxu0 %vm285_vm0, %v264_v32  ;;  %712 = vst.msk [vmem:[#allocation2 + $0x140] sm:$0xff] %vm639_vm1, %v4697_v3  ;;  %713 = vst.msk [vmem:[#allocation2 + $0x148] sm:$0xff] %vm639_vm1, %v4697_v3  ;;  %v5229_v32 = vld [vmem:[#allocation2 + $0x38] sm:$0xff] }
  0x50   : > { %714 = vst.msk [vmem:[#allocation2 + $0x150] sm:$0xff] %vm639_vm1, %v4697_v3  ;;  %715 = vst.msk [vmem:[#allocation2 + $0x158] sm:$0xff] %vm639_vm1, %v4697_v3  ;;  %v1045_v49 = vsel %vm1042_vm2, %v1043_v31, %v1044_v14  ;;  %v5259_v50 = vmax.f32 %v978_v30, %v1043_v31 }
  0x51   : > { %716 = vst.msk [vmem:[#allocation2 + $0x160] sm:$0xff] %vm639_vm1, %v4697_v3  ;;  %717 = vst.msk [vmem:[#allocation2 + $0x168] sm:$0xff] %vm639_vm1, %v4697_v3 }
  0x52   : > { %4483 = vmatmul.mubr.msk.f32.gmra.mxu0 %vm285_vm0, %v265_v35  ;;  %718 = vst.msk [vmem:[#allocation2 + $0x170] sm:$0xff] %vm639_vm1, %v4697_v3  ;;  %719 = vst.msk [vmem:[#allocation2 + $0x178] sm:$0xff] %vm639_vm1, %v4697_v3 }
  0x53   : > { %4485 = vmatprep.mubr.msk.f32.mxu0 %vm285_vm0, %v266_v36  ;;  %720 = vst.msk [vmem:[#allocation2 + $0x180] sm:$0xff] %vm639_vm1, %v4697_v3  ;;  %721 = vst.msk [vmem:[#allocation2 + $0x188] sm:$0xff] %vm639_vm1, %v4697_v3  ;;  %v5263_v53 = vld [vmem:[#allocation2 + $0x118] sm:$0xff] }
  0x54   : > { %722 = vst.msk [vmem:[#allocation2 + $0x190] sm:$0xff] %vm639_vm1, %v4697_v3  ;;  %723 = vst.msk [vmem:[#allocation2 + $0x198] sm:$0xff] %vm639_vm1, %v4697_v3 }
  0x55   : > { %724 = vst.msk [vmem:[#allocation2 + $0x1a0] sm:$0xff] %vm639_vm1, %v4697_v3  ;;  %725 = vst.msk [vmem:[#allocation2 + $0x1a8] sm:$0xff] %vm639_vm1, %v4697_v3  ;;  %v5265_v54 = vld [vmem:[#allocation2 + $0x138] sm:$0xff] }
  0x56   : > { %4486 = vmatmul.mubr.msk.f32.gmra.mxu0 %vm285_vm0, %v267_v39  ;;  %726 = vst.msk [vmem:[#allocation2 + $0x1b0] sm:$0xff] %vm639_vm1, %v4697_v3  ;;  %727 = vst.msk [vmem:[#allocation2 + $0x1b8] sm:$0xff] %vm639_vm1, %v4697_v3 }
  0x57   : > { %4488 = vmatprep.mubr.msk.f32.mxu0 %vm285_vm0, %v268_v40  ;;  %728 = vst.msk [vmem:[#allocation2 + $0x1c0] sm:$0xff] %vm639_vm1, %v4697_v3  ;;  %729 = vst.msk [vmem:[#allocation2 + $0x1c8] sm:$0xff] %vm639_vm1, %v4697_v3 }
  0x58   : > { %730 = vst.msk [vmem:[#allocation2 + $0x1d0] sm:$0xff] %vm639_vm1, %v4697_v3  ;;  %731 = vst.msk [vmem:[#allocation2 + $0x1d8] sm:$0xff] %vm639_vm1, %v4697_v3 }
  0x59   : > { %732 = vst.msk [vmem:[#allocation2 + $0x1e0] sm:$0xff] %vm639_vm1, %v4697_v3  ;;  %733 = vst.msk [vmem:[#allocation2 + $0x1e8] sm:$0xff] %vm639_vm1, %v4697_v3  ;;  %v5278_v1 = vld [vmem:[#allocation2 + $0x178] sm:$0xff] }
  0x5a   : > { %4489 = vmatmul.mubr.msk.f32.gmra.mxu0 %vm285_vm0, %v269_v43  ;;  %734 = vst.msk [vmem:[#allocation2 + $0x1f0] sm:$0xff] %vm639_vm1, %v4697_v3  ;;  %735 = vst.msk [vmem:[#allocation2 + $0x1f8] sm:$0xff] %vm639_vm1, %v4697_v3  ;;  %v979_v43 = vmax.f32 %v5193_v10, %v884_v29 }
  0x5b   : > { %4491 = vmatprep.mubr.msk.f32.mxu0 %vm285_vm0, %v270_v44  ;;  %736 = vst.msk [vmem:[#allocation2 + $0x200] sm:$0xff] %vm639_vm1, %v4697_v3  ;;  %737 = vst.msk [vmem:[#allocation2 + $0x208] sm:$0xff] %vm639_vm1, %v4697_v3 }
  0x5c   : > { %738 = vst.msk [vmem:[#allocation2 + $0x210] sm:$0xff] %vm639_vm1, %v4697_v3  ;;  %739 = vst.msk [vmem:[#allocation2 + $0x218] sm:$0xff] %vm639_vm1, %v4697_v3  ;;  %v1172_v10 = vmax.f32 %v979_v43, %v1045_v49 }
  0x5d   : > { %740 = vst.msk [vmem:[#allocation2 + $0x220] sm:$0xff] %vm639_vm1, %v4697_v3  ;;  %741 = vst.msk [vmem:[#allocation2 + $0x228] sm:$0xff] %vm639_vm1, %v4697_v3  ;;  %v5295_v15 = vld [vmem:[#allocation2 + $0x1b8] sm:$0xff] }
  0x5e   : > { %4492 = vmatmul.mubr.msk.f32.gmra.mxu0 %vm285_vm0, %v271_v47  ;;  %742 = vst.msk [vmem:[#allocation2 + $0x230] sm:$0xff] %vm639_vm1, %v4697_v3  ;;  %743 = vst.msk [vmem:[#allocation2 + $0x238] sm:$0xff] %vm639_vm1, %v4697_v3  ;;  %v5252_v47 = vld [vmem:[#allocation2 + $0xd8] sm:$0xff] }
  0x5f   : > { %4494 = vmatprep.mubr.msk.f32.mxu0 %vm285_vm0, %v272_v48  ;;  %1654 = vst.msk [vmem:[#allocation3 + $0x70] sm:$0xff] %vm639_vm1, %v4698_v4  ;;  %1640 = vst.msk [vmem:[#allocation3] sm:$0xff] %vm639_vm1, %v4698_v4  ;;  %v1051_v48 = vrot.slane %v5229_v32, 2  ;;  %v5297_v17 = vld [vmem:[#allocation2 + $0x1d8] sm:$0xff] }
  0x60   : > { %1641 = vst.msk [vmem:[#allocation3 + $0x8] sm:$0xff] %vm639_vm1, %v4698_v4  ;;  %1642 = vst.msk [vmem:[#allocation3 + $0x10] sm:$0xff] %vm639_vm1, %v4698_v4 }
  0x61   : > { %1643 = vst.msk [vmem:[#allocation3 + $0x18] sm:$0xff] %vm639_vm1, %v4698_v4  ;;  %1644 = vst.msk [vmem:[#allocation3 + $0x20] sm:$0xff] %vm639_vm1, %v4698_v4 }
  0x62   : > { %4495 = vmatmul.mubr.msk.f32.gmra.mxu0 %vm285_vm0, %v273_v51  ;;  %1645 = vst.msk [vmem:[#allocation3 + $0x28] sm:$0xff] %vm639_vm1, %v4698_v4  ;;  %1646 = vst.msk [vmem:[#allocation3 + $0x30] sm:$0xff] %vm639_vm1, %v4698_v4 }
  0x63   : > { %4497 = vmatprep.mubr.msk.f32.mxu0 %vm285_vm0, %v274_v52  ;;  %1647 = vst.msk [vmem:[#allocation3 + $0x38] sm:$0xff] %vm639_vm1, %v4698_v4  ;;  %1648 = vst.msk [vmem:[#allocation3 + $0x40] sm:$0xff] %vm639_vm1, %v4698_v4  ;;  %v5261_v52 = vld [vmem:[#allocation2 + $0xf8] sm:$0xff] }
  0x64   : > { %1649 = vst.msk [vmem:[#allocation3 + $0x48] sm:$0xff] %vm639_vm1, %v4698_v4  ;;  %1650 = vst.msk [vmem:[#allocation3 + $0x50] sm:$0xff] %vm639_vm1, %v4698_v4 }
  0x65   : > { %1651 = vst.msk [vmem:[#allocation3 + $0x58] sm:$0xff] %vm639_vm1, %v4698_v4  ;;  %1652 = vst.msk [vmem:[#allocation3 + $0x60] sm:$0xff] %vm639_vm1, %v4698_v4 }
  0x66   : > { %4498 = vmatmul.mubr.msk.f32.gmra.mxu0 %vm285_vm0, %v275_v55  ;;  %1653 = vst.msk [vmem:[#allocation3 + $0x68] sm:$0xff] %vm639_vm1, %v4698_v4  ;;  %1655 = vst.msk [vmem:[#allocation3 + $0x78] sm:$0xff] %vm639_vm1, %v4698_v4  ;;  %v1817_v19 = vld [vmem:[#allocation3] sm:$0xff] }
  0x67   : > { %4500 = vmatprep.mubr.msk.f32.mxu0 %vm285_vm0, %v276_v56  ;;  %1656 = vst.msk [vmem:[#allocation3 + $0x80] sm:$0xff] %vm639_vm1, %v4698_v4  ;;  %1657 = vst.msk [vmem:[#allocation3 + $0x88] sm:$0xff] %vm639_vm1, %v4698_v4  ;;  %v1818_v5 = vld [vmem:[#allocation3 + $0x8] sm:$0xff]  ;;  %v1819_v6 = vld [vmem:[#allocation3 + $0x10] sm:$0xff]  ;;  %v1902_v34 = vmul.f32 %v5208_v20, %v1817_v19  ;;  %v1056_v56 = vrot.slane %v5236_v37, 2 }
  0x68   : > { %1658 = vst.msk [vmem:[#allocation3 + $0x90] sm:$0xff] %vm639_vm1, %v4698_v4  ;;  %1659 = vst.msk [vmem:[#allocation3 + $0x98] sm:$0xff] %vm639_vm1, %v4698_v4  ;;  %v2003_v11 = vmul.f32 %v5191_v7, %v1818_v5  ;;  %v5197_v12 = vmul.f32 %v5191_v7, %v1819_v6  ;;  %v5212_v23 = vmul.f32 %v5202_v16, %v1818_v5  ;;  %v5267_v55 = vld [vmem:[#allocation2 + $0x20] sm:$0xff] }
  0x69   : > { %1660 = vst.msk [vmem:[#allocation3 + $0xa0] sm:$0xff] %vm639_vm1, %v4698_v4  ;;  %1661 = vst.msk [vmem:[#allocation3 + $0xa8] sm:$0xff] %vm639_vm1, %v4698_v4  ;;  %v5215_v24 = vmul.f32 %v5202_v16, %v1819_v6  ;;  %v1903_v35 = vmul.f32 %v5208_v20, %v1818_v5 }
  0x6a   : > { %4501 = vmatmul.mubr.msk.f32.gmra.mxu0 %vm285_vm0, %v277_v59  ;;  %1662 = vst.msk [vmem:[#allocation3 + $0xb0] sm:$0xff] %vm639_vm1, %v4698_v4  ;;  %1663 = vst.msk [vmem:[#allocation3 + $0xb8] sm:$0xff] %vm639_vm1, %v4698_v4  ;;  %v2067_v21 = vrot.slane %v2003_v11, 2  ;;  %v7862_v22 = vrot.slane %v5197_v12, 2  ;;  %v2313_v40 = vrot.slane %v5212_v23, 4  ;;  %v5271_v59 = vld [vmem:[#allocation2 + $0x158] sm:$0xff]  ;;  %v1219_v11 = vmax.f32 %v5259_v50, %v5267_v55 }
  0x6b   : > { %4503 = vmatprep.mubr.msk.f32.mxu0 %vm285_vm0, %v278_v60  ;;  %1664 = vst.msk [vmem:[#allocation3 + $0xc0] sm:$0xff] %vm639_vm1, %v4698_v4  ;;  %1665 = vst.msk [vmem:[#allocation3 + $0xc8] sm:$0xff] %vm639_vm1, %v4698_v4  ;;  %v7861_v41 = vrot.slane %v5215_v24, 4  ;;  %v1825_v18 = vld [vmem:[#allocation3 + $0x40] sm:$0xff] }
  0x6c   : > { %1666 = vst.msk [vmem:[#allocation3 + $0xd0] sm:$0xff] %vm639_vm1, %v4698_v4  ;;  %1667 = vst.msk [vmem:[#allocation3 + $0xd8] sm:$0xff] %vm639_vm1, %v4698_v4  ;;  %v2069_v39 = vsel %vm1042_vm2, %v2067_v21, %v7862_v22  ;;  %v2163_v60 = vadd.f32 %v2067_v21, %v1902_v34 }
  0x6d   : > { %1668 = vst.msk [vmem:[#allocation3 + $0xe0] sm:$0xff] %vm639_vm1, %v4698_v4  ;;  %1669 = vst.msk [vmem:[#allocation3 + $0xe8] sm:$0xff] %vm639_vm1, %v4698_v4  ;;  %v2164_v61 = vadd.f32 %v2069_v39, %v1903_v35  ;;  %v2315_v3 = vsel %vm2312_vm4, %v2313_v40, %v7861_v41  ;;  %v5316_v35 = vld [vmem:[%s7857_s2 + $0x3] ss:$0 sm:$0xff] }
  0x6e   : > { %4504 = vmatmul.mubr.msk.f32.gmra.mxu0 %vm285_vm0, %v279_v63  ;;  %1670 = vst.msk [vmem:[#allocation3 + $0xf0] sm:$0xff] %vm639_vm1, %v4698_v4  ;;  %1671 = vst.msk [vmem:[#allocation3 + $0xf8] sm:$0xff] %vm639_vm1, %v4698_v4  ;;  %v1066_v63 = vrot.slane %v5248_v45, 2  ;;  %v5304_v27 = vld [vmem:[#allocation3 + $0x80] sm:$0xff] }
  0x6f   : > { %4506 = vmatprep.mubr.msk.f32.mxu0 %vm285_vm0, %v280_v0  ;;  %1672 = vst.msk [vmem:[#allocation3 + $0x100] sm:$0xff] %vm639_vm1, %v4698_v4  ;;  %1673 = vst.msk [vmem:[#allocation3 + $0x108] sm:$0xff] %vm639_vm1, %v4698_v4  ;;  %v1071_v0 = vrot.slane %v5250_v46, 2  ;;  %v5308_v29 = vadd.f32 %v2315_v3, %v2164_v61 }
  0x70   : > { %1674 = vst.msk [vmem:[#allocation3 + $0x110] sm:$0xff] %vm639_vm1, %v4698_v4  ;;  %1675 = vst.msk [vmem:[#allocation3 + $0x118] sm:$0xff] %vm639_vm1, %v4698_v4 }
  0x71   : > { %1676 = vst.msk [vmem:[#allocation3 + $0x120] sm:$0xff] %vm639_vm1, %v4698_v4  ;;  %1677 = vst.msk [vmem:[#allocation3 + $0x128] sm:$0xff] %vm639_vm1, %v4698_v4 }
  0x72   : > { %4507 = vmatmul.mubr.msk.f32.gmra.mxu0 %vm285_vm0, %v281_v2  ;;  %1678 = vst.msk [vmem:[#allocation3 + $0x130] sm:$0xff] %vm639_vm1, %v4698_v4  ;;  %1679 = vst.msk [vmem:[#allocation3 + $0x138] sm:$0xff] %vm639_vm1, %v4698_v4  ;;  %v5280_v2 = vld [vmem:[#allocation2 + $0x198] sm:$0xff] }
  0x73   : > { %1680 = vst.msk [vmem:[#allocation3 + $0x140] sm:$0xff] %vm639_vm1, %v4698_v4  ;;  %1681 = vst.msk [vmem:[#allocation3 + $0x148] sm:$0xff] %vm639_vm1, %v4698_v4 }
  0x74   : > { %1682 = vst.msk [vmem:[#allocation3 + $0x150] sm:$0xff] %vm639_vm1, %v4698_v4  ;;  %1683 = vst.msk [vmem:[#allocation3 + $0x158] sm:$0xff] %vm639_vm1, %v4698_v4 }
  0x75   : > { %1684 = vst.msk [vmem:[#allocation3 + $0x160] sm:$0xff] %vm639_vm1, %v4698_v4  ;;  %1685 = vst.msk [vmem:[#allocation3 + $0x168] sm:$0xff] %vm639_vm1, %v4698_v4 }
  0x76   : > { %1686 = vst.msk [vmem:[#allocation3 + $0x170] sm:$0xff] %vm639_vm1, %v4698_v4  ;;  %1687 = vst.msk [vmem:[#allocation3 + $0x178] sm:$0xff] %vm639_vm1, %v4698_v4 }
  0x77   : > { %1688 = vst.msk [vmem:[#allocation3 + $0x180] sm:$0xff] %vm639_vm1, %v4698_v4  ;;  %1689 = vst.msk [vmem:[#allocation3 + $0x188] sm:$0xff] %vm639_vm1, %v4698_v4 }
  0x78   : > { %1690 = vst.msk [vmem:[#allocation3 + $0x190] sm:$0xff] %vm639_vm1, %v4698_v4  ;;  %1691 = vst.msk [vmem:[#allocation3 + $0x198] sm:$0xff] %vm639_vm1, %v4698_v4 }
  0x79   : > { %1692 = vst.msk [vmem:[#allocation3 + $0x1a0] sm:$0xff] %vm639_vm1, %v4698_v4  ;;  %1693 = vst.msk [vmem:[#allocation3 + $0x1a8] sm:$0xff] %vm639_vm1, %v4698_v4 }
  0x7a   : > { %1694 = vst.msk [vmem:[#allocation3 + $0x1b0] sm:$0xff] %vm639_vm1, %v4698_v4  ;;  %1695 = vst.msk [vmem:[#allocation3 + $0x1b8] sm:$0xff] %vm639_vm1, %v4698_v4 }
  0x7b   : > { %1696 = vst.msk [vmem:[#allocation3 + $0x1c0] sm:$0xff] %vm639_vm1, %v4698_v4  ;;  %1697 = vst.msk [vmem:[#allocation3 + $0x1c8] sm:$0xff] %vm639_vm1, %v4698_v4 }
  0x7c   : > { %1698 = vst.msk [vmem:[#allocation3 + $0x1d0] sm:$0xff] %vm639_vm1, %v4698_v4  ;;  %1699 = vst.msk [vmem:[#allocation3 + $0x1d8] sm:$0xff] %vm639_vm1, %v4698_v4 }
  0x7d   : > { %1700 = vst.msk [vmem:[#allocation3 + $0x1e0] sm:$0xff] %vm639_vm1, %v4698_v4  ;;  %1701 = vst.msk [vmem:[#allocation3 + $0x1e8] sm:$0xff] %vm639_vm1, %v4698_v4 }
  0x7e   : > { %1702 = vst.msk [vmem:[#allocation3 + $0x1f0] sm:$0xff] %vm639_vm1, %v4698_v4  ;;  %1703 = vst.msk [vmem:[#allocation3 + $0x1f8] sm:$0xff] %vm639_vm1, %v4698_v4 }
  0x7f   : > { %1704 = vst.msk [vmem:[#allocation3 + $0x200] sm:$0xff] %vm639_vm1, %v4698_v4  ;;  %1705 = vst.msk [vmem:[#allocation3 + $0x208] sm:$0xff] %vm639_vm1, %v4698_v4 }
  0x80   : > { %1706 = vst.msk [vmem:[#allocation3 + $0x210] sm:$0xff] %vm639_vm1, %v4698_v4  ;;  %1707 = vst.msk [vmem:[#allocation3 + $0x218] sm:$0xff] %vm639_vm1, %v4698_v4 }
  0x81   : > { %1708 = vst.msk [vmem:[#allocation3 + $0x220] sm:$0xff] %vm639_vm1, %v4698_v4  ;;  %1709 = vst.msk [vmem:[#allocation3 + $0x228] sm:$0xff] %vm639_vm1, %v4698_v4 }
  0x82   : > { %1710 = vst.msk [vmem:[#allocation3 + $0x230] sm:$0xff] %vm639_vm1, %v4698_v4  ;;  %1711 = vst.msk [vmem:[#allocation3 + $0x238] sm:$0xff] %vm639_vm1, %v4698_v4 }
  0x83   : > { %1712 = vst.msk [vmem:[#allocation3 + $0x240] sm:$0xff] %vm639_vm1, %v4698_v4  ;;  %1713 = vst.msk [vmem:[#allocation3 + $0x248] sm:$0xff] %vm639_vm1, %v4698_v4 }
  0x84   : > { %1714 = vst.msk [vmem:[#allocation3 + $0x250] sm:$0xff] %vm639_vm1, %v4698_v4  ;;  %1715 = vst.msk [vmem:[#allocation3 + $0x258] sm:$0xff] %vm639_vm1, %v4698_v4 }
  0x85   : > { %1716 = vst.msk [vmem:[#allocation3 + $0x260] sm:$0xff] %vm639_vm1, %v4698_v4  ;;  %1717 = vst.msk [vmem:[#allocation3 + $0x268] sm:$0xff] %vm639_vm1, %v4698_v4 }
  0x86   : > { %1718 = vst.msk [vmem:[#allocation3 + $0x270] sm:$0xff] %vm639_vm1, %v4698_v4  ;;  %1719 = vst.msk [vmem:[#allocation3 + $0x278] sm:$0xff] %vm639_vm1, %v4698_v4 }
  0xf6   : > { %v4463_v25 = vpop.f32.mrf.mxu0 }
  0xf7   : > { %v608_v28 = vmul.f32 0.999995, %v4463_v25 }
  0xf8   : > { %v448_v33 = vpop.f32.mrf.mxu0 }
  0xf9   : > { %641 = vst.msk [vmem:[%s5220_s25 + $0x8] sm:$0xff] %vm639_vm1, %v608_v28  ;;  %746 = vst.msk [vmem:[#allocation2 + $0x30] sm:$0xff] %vm639_vm1, %v608_v28  ;;  %v607_v36 = vmul.f32 0.999995, %v448_v33  ;;  %v5306_v28 = vadd.f32 %v2313_v40, %v2163_v60 }
  0xfa   : > { %v4466_v44 = vpop.f32.mrf.mxu0 }
  0xfb   : > { %640 = vst.msk [vmem:[%s5220_s25] sm:$0xff] %vm639_vm1, %v607_v36  ;;  %745 = vst.msk [vmem:[#allocation2 + $0x28] sm:$0xff] %vm639_vm1, %v607_v36  ;;  %v610_v51 = vmul.f32 0.999995, %v4466_v44  ;;  %v5325_v44 = vmul.f32 %v5208_v20, %v5304_v27 }
  0xfc   : > { %v458_v57 = vpop.f32.mrf.mxu0 }
  0xfd   : > { %643 = vst.msk [vmem:[%s5220_s25 + $0x18] sm:$0xff] %vm639_vm1, %v610_v51  ;;  %748 = vst.msk [vmem:[#allocation2 + $0x50] sm:$0xff] %vm639_vm1, %v610_v51  ;;  %v609_v62 = vmul.f32 0.999995, %v458_v57 }
  0xfe   : > { %v4469_v4 = vpop.f32.mrf.mxu0 }
  0xff   : > { %642 = vst.msk [vmem:[%s5220_s25 + $0x10] sm:$0xff] %vm639_vm1, %v609_v62  ;;  %747 = vst.msk [vmem:[#allocation2 + $0x48] sm:$0xff] %vm639_vm1, %v609_v62  ;;  %v612_v13 = vmul.f32 0.999995, %v4469_v4 }
 0x100   : > { %v783_v19 = vld [vmem:[#allocation2 + $0x30] sm:$0xff]  ;;  %v468_v21 = vpop.f32.mrf.mxu0 }
 0x101   : > { %v886_v30 = vrot.slane %v783_v19, 1  ;;  %v1049_v31 = vrot.slane %v783_v19, 2  ;;  %v1221_v33 = vmax.f32 %v1173_v42, %v783_v19  ;;  %645 = vst.msk [vmem:[%s5220_s25 + $0x28] sm:$0xff] %vm639_vm1, %v612_v13  ;;  %750 = vst.msk [vmem:[#allocation2 + $0x70] sm:$0xff] %vm639_vm1, %v612_v13  ;;  %v611_v34 = vmul.f32 0.999995, %v468_v21 }
 0x102   : > { %v782_v36 = vld [vmem:[#allocation2 + $0x28] sm:$0xff]  ;;  %v4472_v39 = vpop.f32.mrf.mxu0  ;;  %v5321_v42 = vmul.f32 %v5208_v20, %v1825_v18  ;;  %v5336_v20 = vmul.f32 %v5316_v35, %v1825_v18  ;;  %v785_v21 = vld [vmem:[#allocation2 + $0x40] sm:$0xff] }
 0x103   : > { %v983_v49 = vmax.f32 %v783_v19, %v886_v30  ;;  %v1052_v50 = vsel %vm1042_vm2, %v1049_v31, %v1051_v48  ;;  %v1277_v51 = vmax.f32 %v1221_v33, %v886_v30  ;;  %v885_v57 = vrot.slane %v782_v36, 1  ;;  %644 = vst.msk [vmem:[%s5220_s25 + $0x20] sm:$0xff] %vm639_vm1, %v611_v34  ;;  %749 = vst.msk [vmem:[#allocation2 + $0x68] sm:$0xff] %vm639_vm1, %v611_v34 }
 0x104   : > { %v1048_v60 = vrot.slane %v782_v36, 2  ;;  %v1220_v61 = vmax.f32 %v1172_v10, %v782_v36  ;;  %v787_v62 = vld [vmem:[#allocation2 + $0x50] sm:$0xff]  ;;  %v614_v3 = vmul.f32 0.999995, %v4472_v39  ;;  %v5333_v4 = vpop.f32.mrf.mxu0 }
 0x105   : > { %v1176_v13 = vmax.f32 %v983_v49, %v1052_v50  ;;  %v1334_v32 = vmax.f32 %v1277_v51, %v1052_v50  ;;  %v887_v48 = vsel %vm881_vm3, %v885_v57, %v886_v30  ;;  %v981_v19 = vmax.f32 %v5267_v55, %v885_v57 }
 0x106   : > { %v982_v26 = vmax.f32 %v782_v36, %v887_v48  ;;  %v1050_v33 = vsel %vm1042_vm2, %v1048_v60, %v1049_v31  ;;  %v1275_v34 = vmax.f32 %v1219_v11, %v885_v57  ;;  %v1276_v10 = vmax.f32 %v1220_v61, %v887_v48  ;;  %647 = vst.msk [vmem:[%s5220_s25 + $0x38] sm:$0xff] %vm639_vm1, %v614_v3  ;;  %v5344_v39 = vpop.f32.mrf.mxu0  ;;  %v786_v30 = vld [vmem:[#allocation2 + $0x48] sm:$0xff] }
 0x107   : > { %752 = vst.msk [vmem:[#allocation2 + $0x90] sm:$0xff] %vm639_vm1, %v614_v3  ;;  %v1174_v18 = vmax.f32 %v981_v19, %v1048_v60  ;;  %v889_v49 = vrot.slane %v787_v62, 1  ;;  %v1054_v50 = vrot.slane %v787_v62, 2  ;;  %v1224_v51 = vmax.f32 %v1176_v13, %v787_v62 }
 0x108   : > { %v1175_v41 = vmax.f32 %v982_v26, %v1050_v33  ;;  %v1332_v55 = vmax.f32 %v1275_v34, %v1048_v60  ;;  %v1333_v22 = vmax.f32 %v1276_v10, %v1050_v33  ;;  %v1382_v43 = vmax.f32 %v1334_v32, %v787_v62  ;;  %v5346_v36 = vld [vmem:[#allocation2 + $0x70] sm:$0xff]  ;;  %v5348_v11 = vpop.f32.mrf.mxu0 }
 0x109   : > { %v1222_v31 = vmax.f32 %v1174_v18, %v785_v21  ;;  %v986_v57 = vmax.f32 %v787_v62, %v889_v49  ;;  %v1057_v61 = vsel %vm1042_vm2, %v1054_v50, %v1056_v56  ;;  %v1280_v3 = vmax.f32 %v1224_v51, %v889_v49 }
 0x10a   : > { %v1380_v48 = vmax.f32 %v1332_v55, %v785_v21  ;;  %v1438_v19 = vmax.f32 %v1382_v43, %v889_v49  ;;  %v888_v13 = vrot.slane %v786_v30, 1  ;;  %v1053_v40 = vrot.slane %v786_v30, 2  ;;  %v5353_v26 = vpop.f32.mrf.mxu0  ;;  %v5361_v23 = vld [vmem:[#allocation2 + $0x68] sm:$0xff] }
 0x10b   : > { %v1223_v60 = vmax.f32 %v1175_v41, %v786_v30  ;;  %v1381_v32 = vmax.f32 %v1333_v22, %v786_v30  ;;  %v892_v33 = vrot.slane %v5346_v36, 1  ;;  %v1059_v34 = vrot.slane %v5346_v36, 2 }
 0x10c   : > { %v1495_v10 = vmax.f32 %v1438_v19, %v1057_v61  ;;  %v890_v62 = vsel %vm881_vm3, %v888_v13, %v889_v49  ;;  %v984_v18 = vmax.f32 %v785_v21, %v888_v13  ;;  %v1055_v37 = vsel %vm1042_vm2, %v1053_v40, %v1054_v50  ;;  %v5359_v56 = vpop.f32.mrf.mxu0 }
 0x10d   : > { %v985_v43 = vmax.f32 %v786_v30, %v890_v62  ;;  %v1278_v51 = vmax.f32 %v1222_v31, %v888_v13  ;;  %v1279_v55 = vmax.f32 %v1223_v60, %v890_v62  ;;  %v1436_v25 = vmax.f32 %v1380_v48, %v888_v13  ;;  %v789_v31 = vld [vmem:[#allocation2 + $0x60] sm:$0xff] }
 0x10e   : > { %v1543_v22 = vmul.f32 0.999995, %v1495_v10  ;;  %v1177_v41 = vmax.f32 %v984_v18, %v1053_v40  ;;  %v1437_v14 = vmax.f32 %v1381_v32, %v890_v62  ;;  %v989_v9 = vmax.f32 %v5346_v36, %v892_v33  ;;  %v5364_v19 = vpop.f32.mrf.mxu0 }
 0x10f   : > { %v1335_v49 = vmax.f32 %v1278_v51, %v1053_v40  ;;  %v1493_v21 = vmax.f32 %v1436_v25, %v1053_v40  ;;  %v5369_v50 = vsel %vm1042_vm2, %v1059_v34, %v1061_v58  ;;  %v1179_v30 = vmax.f32 %v986_v57, %v1057_v61 }
 0x110   : > { %4265 = vst.msk [vmem:[%s5220_s25 + $0x109] sm:$0x7f] %vm1593_vm5, %v1543_v22  ;;  %v1722_v48 = vmax.f32 %v1543_v22, 0.0  ;;  %v1494_v13 = vmax.f32 %v1437_v14, %v1055_v37  ;;  %v1337_v60 = vmax.f32 %v1280_v3, %v1057_v61  ;;  %v891_v32 = vrot.slane %v5361_v23, 1  ;;  %v5374_v10 = vpop.f32.mrf.mxu0  ;;  %v5381_v14 = vld [vmem:[#allocation2 + $0x90] sm:$0xff] }
 0x111   : > { %v1541_v62 = vmul.f32 0.999995, %v1493_v21  ;;  %v1227_v25 = vmax.f32 %v1179_v30, %v5346_v36  ;;  %v1058_v38 = vrot.slane %v5361_v23, 2  ;;  %v1178_v58 = vmax.f32 %v985_v43, %v1055_v37 }
 0x112   : > { %v1542_v40 = vmul.f32 0.999995, %v1494_v13  ;;  %v1385_v57 = vmax.f32 %v1337_v60, %v5346_v36  ;;  %v893_v18 = vsel %vm881_vm3, %v891_v32, %v892_v33  ;;  %v987_v51 = vmax.f32 %v789_v31, %v891_v32  ;;  %1771 = vst.msk [vmem:[#allocation3 + $0x51] sm:$0x7f] %vm1593_vm5, %v1722_v48  ;;  %v5383_v61 = vpop.f32.mrf.mxu0 }
 0x113   : > { %4263 = vst.msk [vmem:[%s5220_s25 + $0xf9] sm:$0x80] %vm1590_vm6, %v1541_v62  ;;  %v1720_v3 = vmax.f32 %v1541_v62, 0.0  ;;  %v1283_v22 = vmax.f32 %v1227_v25, %v892_v33  ;;  %v988_v21 = vmax.f32 %v5361_v23, %v893_v18  ;;  %v5389_v43 = vsel %vm1042_vm2, %v1058_v38, %v1059_v34 }
 0x114   : > { %4264 = vst.msk [vmem:[%s5220_s25 + $0x101] sm:$0xff] %vm639_vm1, %v1542_v40  ;;  %v1721_v36 = vmax.f32 %v1542_v40, 0.0  ;;  %v1441_v30 = vmax.f32 %v1385_v57, %v892_v33  ;;  %v5393_v13 = vmax.f32 %v987_v51, %v1058_v38  ;;  %v1225_v48 = vmax.f32 %v1177_v41, %v789_v31  ;;  %v5395_v60 = vpop.f32.mrf.mxu0 }
 0x115   : > { %v1226_v8 = vmax.f32 %v1178_v58, %v5361_v23  ;;  %v1336_v6 = vmax.f32 %v1279_v55, %v1055_v37  ;;  %v1383_v5 = vmax.f32 %v1335_v49, %v789_v31  ;;  %1769 = vst.msk [vmem:[#allocation3 + $0x41] sm:$0x80] %vm1590_vm6, %v1720_v3  ;;  %v5400_v62 = vrot.slane %v5381_v14, 1 }
 0x116   : > { %v1498_v34 = vmax.f32 %v1441_v30, %v5369_v50  ;;  %v1281_v25 = vmax.f32 %v1225_v48, %v891_v32  ;;  %1770 = vst.msk [vmem:[#allocation3 + $0x49] sm:$0xff] %vm639_vm1, %v1721_v36  ;;  %v1064_v33 = vrot.slane %v5381_v14, 2  ;;  %v1182_v41 = vmax.f32 %v989_v9, %v5369_v50  ;;  %v4487_v40 = vpop.f32.mrf.mxu0 }
 0x117   : > { %v5406_v57 = vmax.f32 %v1226_v8, %v893_v18  ;;  %v1384_v37 = vmax.f32 %v1336_v6, %v5361_v23  ;;  %v1439_v55 = vmax.f32 %v1383_v5, %v891_v32  ;;  %v992_v49 = vmax.f32 %v5381_v14, %v5400_v62  ;;  %v5419_v8 = vld [vmem:[#allocation2 + $0x80] sm:$0xff] }
 0x118   : > { %v1546_v31 = vmul.f32 0.999995, %v1498_v34  ;;  %v1338_v58 = vmax.f32 %v1281_v25, %v1058_v38  ;;  %v5416_v51 = vsel %vm1042_vm2, %v1064_v33, %v1066_v63  ;;  %v1230_v9 = vmax.f32 %v1182_v41, %v5381_v14  ;;  %v528_v3 = vpop.f32.mrf.mxu0 }
 0x119   : > { %v1440_v6 = vmax.f32 %v1384_v37, %v893_v18  ;;  %v1496_v5 = vmax.f32 %v1439_v55, %v1058_v38  ;;  %v1340_v23 = vmax.f32 %v1283_v22, %v5369_v50  ;;  %v613_v32 = vmul.f32 0.999995, %v5333_v4 }
 0x11a   : > { %4268 = vst.msk [vmem:[%s5220_s25 + $0x119] sm:$0x7f] %vm1593_vm5, %v1546_v31  ;;  %v1725_v45 = vmax.f32 %v1546_v31, 0.0  ;;  %v5426_v36 = vmax.f32 %v1230_v9, %v5400_v62  ;;  %v5429_v63 = vmax.f32 %v988_v21, %v5389_v43  ;;  %v4490_v30 = vpop.f32.mrf.mxu0  ;;  %v5433_v48 = vadd.f32 %v5336_v20, %v5306_v28  ;;  %v5456_v31 = vld [vmem:[#allocation2 + $0x1f8] sm:$0xff] }
 0x11b   : > { %v1497_v38 = vmax.f32 %v1440_v6, %v5389_v43  ;;  %v1544_v50 = vmul.f32 0.999995, %v1496_v5  ;;  %v1388_v4 = vmax.f32 %v1340_v23, %v5381_v14  ;;  %646 = vst.msk [vmem:[%s5220_s25 + $0x30] sm:$0xff] %vm639_vm1, %v613_v32  ;;  %751 = vst.msk [vmem:[#allocation2 + $0x88] sm:$0xff] %vm639_vm1, %v613_v32  ;;  %v1228_v18 = vmax.f32 %v5393_v13, %v5419_v8 }
 0x11c   : > { %1774 = vst.msk [vmem:[#allocation3 + $0x71] sm:$0x7f] %vm1593_vm5, %v1725_v45  ;;  %v1339_v22 = vmax.f32 %v5406_v57, %v5389_v43  ;;  %v5446_v28 = vmax.f32 %v1338_v58, %v5419_v8  ;;  %v616_v20 = vmul.f32 0.999995, %v5344_v39  ;;  %v5450_v21 = vmax.f32 %v992_v49, %v5416_v51  ;;  %v538_v34 = vpop.f32.mrf.mxu0 }
 0x11d   : > { %v1545_v25 = vmul.f32 0.999995, %v1497_v38  ;;  %4266 = vst.msk [vmem:[%s5220_s25 + $0x109] sm:$0x80] %vm1590_vm6, %v1544_v50  ;;  %v1723_v41 = vmax.f32 %v1544_v50, 0.0  ;;  %v1444_v37 = vmax.f32 %v1388_v4, %v5400_v62  ;;  %v5458_v58 = vld [vmem:[#allocation3 + $0x48] sm:$0xff]  ;;  %v1343_v39 = vmax.f32 %v5426_v36, %v5416_v51 }
 0x11e   : > { %v615_v55 = vmul.f32 0.999995, %v5348_v11  ;;  %649 = vst.msk [vmem:[%s5220_s25 + $0x48] sm:$0xff] %vm639_vm1, %v616_v20  ;;  %754 = vst.msk [vmem:[#allocation2 + $0xb0] sm:$0xff] %vm639_vm1, %v616_v20  ;;  %v618_v49 = vmul.f32 0.999995, %v5353_v26  ;;  %v4493_v6 = vpop.f32.mrf.mxu0  ;;  %v5493_v50 = vmul.f32 %v5191_v7, %v5458_v58 }
 0x11f   : > { %v617_v9 = vmul.f32 0.999995, %v5359_v56  ;;  %v620_v11 = vmul.f32 0.999995, %v5364_v19  ;;  %4267 = vst.msk [vmem:[%s5220_s25 + $0x111] sm:$0xff] %vm639_vm1, %v1545_v25  ;;  %v1724_v5 = vmax.f32 %v1545_v25, 0.0  ;;  %v1501_v23 = vmax.f32 %v1444_v37, %v5416_v51 }
 0x120   : > { %1772 = vst.msk [vmem:[#allocation3 + $0x61] sm:$0x80] %vm1590_vm6, %v1723_v41  ;;  %v619_v32 = vmul.f32 0.999995, %v5374_v10  ;;  %v622_v26 = vmul.f32 0.999995, %v5383_v61  ;;  %v548_v45 = vpop.f32.mrf.mxu0  ;;  %v5520_v25 = vmul.f32 %v5316_v35, %v5458_v58 }
 0x121   : > { %648 = vst.msk [vmem:[%s5220_s25 + $0x40] sm:$0xff] %vm639_vm1, %v615_v55  ;;  %753 = vst.msk [vmem:[#allocation2 + $0xa8] sm:$0xff] %vm639_vm1, %v615_v55  ;;  %v5477_v56 = vld [vmem:[#allocation2 + $0x218] sm:$0xff]  ;;  %v621_v19 = vmul.f32 0.999995, %v5395_v60  ;;  %v5489_v38 = vld [vmem:[#allocation2 + $0x230] sm:$0xff] }
 0x122   : > { %651 = vst.msk [vmem:[%s5220_s25 + $0x58] sm:$0xff] %vm639_vm1, %v618_v49  ;;  %756 = vst.msk [vmem:[#allocation2 + $0xd0] sm:$0xff] %vm639_vm1, %v618_v49  ;;  %v624_v10 = vmul.f32 0.999995, %v4487_v40  ;;  %v623_v61 = vmul.f32 0.999995, %v528_v3  ;;  %v5504_v3 = vmul.f32 %v5202_v16, %v5458_v58  ;;  %v4496_v20 = vpop.f32.mrf.mxu0 }
 0x123   : > { %650 = vst.msk [vmem:[%s5220_s25 + $0x50] sm:$0xff] %vm639_vm1, %v617_v9  ;;  %755 = vst.msk [vmem:[#allocation2 + $0xc8] sm:$0xff] %vm639_vm1, %v617_v9  ;;  %v1549_v4 = vmul.f32 0.999995, %v1501_v23  ;;  %v626_v60 = vmul.f32 0.999995, %v4490_v30 }
 0x124   : > { %653 = vst.msk [vmem:[%s5220_s25 + $0x68] sm:$0xff] %vm639_vm1, %v620_v11  ;;  %758 = vst.msk [vmem:[#allocation2 + $0xf0] sm:$0xff] %vm639_vm1, %v620_v11  ;;  %v625_v40 = vmul.f32 0.999995, %v538_v34  ;;  %v5506_v7 = vld [vmem:[#allocation2 + $0x88] sm:$0xff]  ;;  %v1121_v34 = vrot.slane %v5456_v31, 2 }
 0x125   : > { %1773 = vst.msk [vmem:[#allocation3 + $0x69] sm:$0xff] %vm639_vm1, %v1724_v5  ;;  %652 = vst.msk [vmem:[%s5220_s25 + $0x60] sm:$0xff] %vm639_vm1, %v619_v32  ;;  %v628_v30 = vmul.f32 0.999995, %v4493_v6  ;;  %v627_v16 = vmul.f32 0.999995, %v548_v45  ;;  %v1229_v49 = vmax.f32 %v5429_v63, %v5506_v7  ;;  %v1387_v9 = vmax.f32 %v1339_v22, %v5506_v7 }
 0x126   : > { %757 = vst.msk [vmem:[#allocation2 + $0xe8] sm:$0xff] %vm639_vm1, %v619_v32  ;;  %655 = vst.msk [vmem:[%s5220_s25 + $0x78] sm:$0xff] %vm639_vm1, %v622_v26  ;;  %v1728_v41 = vmax.f32 %v1549_v4, 0.0  ;;  %v894_v37 = vrot.slane %v5506_v7, 1  ;;  %v5526_v55 = vrot.slane %v5506_v7, 2  ;;  %v1327_v11 = vrot.slane %v5477_v56, 2 }
 0x127   : > { %760 = vst.msk [vmem:[#allocation2 + $0x110] sm:$0xff] %vm639_vm1, %v622_v26  ;;  %654 = vst.msk [vmem:[%s5220_s25 + $0x70] sm:$0xff] %vm639_vm1, %v621_v19  ;;  %v630_v63 = vmul.f32 0.999995, %v4496_v20  ;;  %v5549_v6 = vmul.f32 %v5316_v35, %v5304_v27  ;;  %v799_v5 = vld [vmem:[#allocation2 + $0xb0] sm:$0xff]  ;;  %v1431_v23 = vrot.slane %v5489_v38, 1 }
 0x128   : > { %759 = vst.msk [vmem:[#allocation2 + $0x108] sm:$0xff] %vm639_vm1, %v621_v19  ;;  %657 = vst.msk [vmem:[%s5220_s25 + $0x88] sm:$0xff] %vm639_vm1, %v624_v10  ;;  %v896_v43 = vsel %vm881_vm3, %v894_v37, %v5400_v62  ;;  %v990_v57 = vmax.f32 %v5419_v8, %v894_v37  ;;  %v1284_v22 = vmax.f32 %v1228_v18, %v894_v37  ;;  %v798_v62 = vld [vmem:[#allocation2 + $0xa8] sm:$0xff]  ;;  %v898_v18 = vrot.slane %v799_v5, 1 }
 0x129   : > { %762 = vst.msk [vmem:[#allocation2 + $0x130] sm:$0xff] %vm639_vm1, %v624_v10  ;;  %656 = vst.msk [vmem:[%s5220_s25 + $0x80] sm:$0xff] %vm639_vm1, %v623_v61  ;;  %v991_v32 = vmax.f32 %v5506_v7, %v896_v43  ;;  %v1065_v27 = vsel %vm1042_vm2, %v5526_v55, %v1064_v33  ;;  %v1442_v35 = vmax.f32 %v5446_v28, %v894_v37  ;;  %v1069_v19 = vrot.slane %v799_v5, 2  ;;  %v797_v28 = vld [vmem:[#allocation2 + $0xa0] sm:$0xff] }
 0x12a   : > { %761 = vst.msk [vmem:[#allocation2 + $0x128] sm:$0xff] %vm639_vm1, %v623_v61  ;;  %659 = vst.msk [vmem:[%s5220_s25 + $0x98] sm:$0xff] %vm639_vm1, %v626_v60  ;;  %v1443_v26 = vmax.f32 %v1387_v9, %v896_v43  ;;  %v1183_v13 = vmax.f32 %v990_v57, %v5526_v55  ;;  %v1285_v8 = vmax.f32 %v1229_v49, %v896_v43 }
 0x12b   : > { %4271 = vst.msk [vmem:[%s5220_s25 + $0x129] sm:$0x7f] %vm1593_vm5, %v1549_v4  ;;  %1777 = vst.msk [vmem:[#allocation3 + $0x91] sm:$0x7f] %vm1593_vm5, %v1728_v41  ;;  %v1499_v10 = vmax.f32 %v1442_v35, %v5526_v55  ;;  %v1233_v14 = vmax.f32 %v5450_v21, %v799_v5  ;;  %v1391_v33 = vmax.f32 %v1343_v39, %v799_v5  ;;  %v5581_v41 = vld [vmem:[#allocation2 + $0xd0] sm:$0xff] }
 0x12c   : > { %764 = vst.msk [vmem:[#allocation2 + $0x150] sm:$0xff] %vm639_vm1, %v626_v60  ;;  %658 = vst.msk [vmem:[%s5220_s25 + $0x90] sm:$0xff] %vm639_vm1, %v625_v40  ;;  %v1500_v61 = vmax.f32 %v1443_v26, %v1065_v27  ;;  %v1341_v45 = vmax.f32 %v1284_v22, %v5526_v55  ;;  %v995_v4 = vmax.f32 %v799_v5, %v898_v18  ;;  %v897_v60 = vrot.slane %v798_v62, 1 }
 0x12d   : > { %763 = vst.msk [vmem:[#allocation2 + $0x148] sm:$0xff] %vm639_vm1, %v625_v40  ;;  %661 = vst.msk [vmem:[%s5220_s25 + $0xa8] sm:$0xff] %vm639_vm1, %v628_v30  ;;  %v5575_v40 = vrot.slane %v798_v62, 2  ;;  %v1547_v7 = vmul.f32 0.999995, %v1499_v10  ;;  %v1447_v21 = vmax.f32 %v1391_v33, %v898_v18  ;;  %v1289_v20 = vmax.f32 %v1233_v14, %v898_v18  ;;  %v5594_v10 = vld [vmem:[#allocation2 + $0xc8] sm:$0xff] }
 0x12e   : > { %766 = vst.msk [vmem:[#allocation2 + $0x170] sm:$0xff] %vm639_vm1, %v628_v30  ;;  %660 = vst.msk [vmem:[%s5220_s25 + $0xa0] sm:$0xff] %vm639_vm1, %v627_v16  ;;  %v1548_v30 = vmul.f32 0.999995, %v1500_v61  ;;  %v899_v51 = vsel %vm881_vm3, %v897_v60, %v898_v18  ;;  %v993_v36 = vmax.f32 %v797_v28, %v897_v60  ;;  %v1184_v39 = vmax.f32 %v991_v32, %v1065_v27  ;;  %v801_v14 = vld [vmem:[#allocation2 + $0xc0] sm:$0xff] }
 0x12f   : > { %765 = vst.msk [vmem:[#allocation2 + $0x168] sm:$0xff] %vm639_vm1, %v627_v16  ;;  %663 = vst.msk [vmem:[%s5220_s25 + $0xb8] sm:$0xff] %vm639_vm1, %v630_v63  ;;  %v1072_v16 = vsel %vm1042_vm2, %v1069_v19, %v1071_v0  ;;  %v1726_v37 = vmax.f32 %v1547_v7, 0.0  ;;  %v1070_v46 = vsel %vm1042_vm2, %v5575_v40, %v1069_v19  ;;  %v994_v0 = vmax.f32 %v798_v62, %v899_v51 }
 0x130   : > { %768 = vst.msk [vmem:[#allocation2 + $0x190] sm:$0xff] %vm639_vm1, %v630_v63  ;;  %4270 = vst.msk [vmem:[%s5220_s25 + $0x121] sm:$0xff] %vm639_vm1, %v1548_v30  ;;  %v1727_v55 = vmax.f32 %v1548_v30, 0.0  ;;  %v1504_v49 = vmax.f32 %v1447_v21, %v1072_v16  ;;  %v1231_v9 = vmax.f32 %v1183_v13, %v797_v28  ;;  %v1232_v63 = vmax.f32 %v1184_v39, %v798_v62 }
 0x131   : > { %4269 = vst.msk [vmem:[%s5220_s25 + $0x119] sm:$0x80] %vm1590_vm6, %v1547_v7  ;;  %v1342_v43 = vmax.f32 %v1285_v8, %v1065_v27  ;;  %1775 = vst.msk [vmem:[#allocation3 + $0x81] sm:$0x80] %vm1590_vm6, %v1726_v37  ;;  %v1389_v22 = vmax.f32 %v1341_v45, %v797_v28  ;;  %v901_v5 = vrot.slane %v5581_v41, 1  ;;  %v1074_v32 = vrot.slane %v5581_v41, 2 }
 0x132   : > { %1776 = vst.msk [vmem:[#allocation3 + $0x89] sm:$0xff] %vm639_vm1, %v1727_v55  ;;  %v1552_v57 = vmul.f32 0.999995, %v1504_v49  ;;  %v1186_v35 = vmax.f32 %v993_v36, %v5575_v40  ;;  %v1287_v26 = vmax.f32 %v1231_v9, %v897_v60  ;;  %v1188_v19 = vmax.f32 %v995_v4, %v1072_v16 }
 0x133   : > { %v1390_v18 = vmax.f32 %v1342_v43, %v798_v62  ;;  %v1288_v13 = vmax.f32 %v1232_v63, %v899_v51  ;;  %v1445_v8 = vmax.f32 %v1389_v22, %v897_v60  ;;  %v998_v61 = vmax.f32 %v5581_v41, %v901_v5  ;;  %v5617_v43 = vld [vmem:[#allocation2 + $0xf0] sm:$0xff] }
 0x134   : > { %4274 = vst.msk [vmem:[%s5220_s25 + $0x139] sm:$0x7f] %vm1593_vm5, %v1552_v57  ;;  %v1731_v27 = vmax.f32 %v1552_v57, 0.0  ;;  %v7885_v28 = vrot.slane %v5252_v47, 2  ;;  %v1236_v7 = vmax.f32 %v1188_v19, %v5581_v41  ;;  %v1346_v30 = vmax.f32 %v1289_v20, %v1072_v16 }
 0x135   : > { %v1446_v33 = vmax.f32 %v1390_v18, %v899_v51  ;;  %v1502_v62 = vmax.f32 %v1445_v8, %v5575_v40  ;;  %v900_v4 = vrot.slane %v5594_v10, 1  ;;  %v5607_v60 = vrot.slane %v5594_v10, 2 }
 0x136   : > { %v1077_v45 = vsel %vm1042_vm2, %v1074_v32, %v7885_v28  ;;  %1780 = vst.msk [vmem:[#allocation3 + $0xb1] sm:$0x7f] %vm1593_vm5, %v1731_v27  ;;  %v1187_v21 = vmax.f32 %v994_v0, %v1070_v46  ;;  %v1344_v51 = vmax.f32 %v1287_v26, %v5575_v40  ;;  %v1394_v47 = vmax.f32 %v1346_v30, %v5581_v41 }
 0x137   : > { %v1503_v36 = vmax.f32 %v1446_v33, %v1070_v46  ;;  %v1234_v39 = vmax.f32 %v1186_v35, %v801_v14  ;;  %v1550_v37 = vmul.f32 0.999995, %v1502_v62  ;;  %v1292_v16 = vmax.f32 %v1236_v7, %v901_v5 }
 0x138   : > { %v902_v20 = vsel %vm881_vm3, %v900_v4, %v901_v5  ;;  %v996_v55 = vmax.f32 %v801_v14, %v900_v4  ;;  %v1450_v9 = vmax.f32 %v1394_v47, %v901_v5  ;;  %v5614_v63 = vsel %vm1042_vm2, %v5607_v60, %v1074_v32  ;;  %v5625_v32 = vld [vmem:[#allocation2 + $0xe8] sm:$0xff] }
 0x139   : > { %v1551_v49 = vmul.f32 0.999995, %v1503_v36  ;;  %v1235_v0 = vmax.f32 %v1187_v21, %v5594_v10  ;;  %4272 = vst.msk [vmem:[%s5220_s25 + $0x129] sm:$0x80] %vm1590_vm6, %v1550_v37  ;;  %v1729_v40 = vmax.f32 %v1550_v37, 0.0  ;;  %v997_v41 = vmax.f32 %v5594_v10, %v902_v20  ;;  %v805_v21 = vld [vmem:[#allocation2 + $0xe0] sm:$0xff] }
 0x13a   : > { %v1290_v57 = vmax.f32 %v1234_v39, %v900_v4  ;;  %v1345_v22 = vmax.f32 %v1288_v13, %v1070_v46  ;;  %v1507_v26 = vmax.f32 %v1450_v9, %v1077_v45  ;;  %v1189_v5 = vmax.f32 %v996_v55, %v5607_v60  ;;  %v5649_v9 = vld [vmem:[#allocation2 + $0x110] sm:$0xff] }
 0x13b   : > { %4273 = vst.msk [vmem:[%s5220_s25 + $0x131] sm:$0xff] %vm639_vm1, %v1551_v49  ;;  %v1730_v35 = vmax.f32 %v1551_v49, 0.0  ;;  %v1392_v18 = vmax.f32 %v1344_v51, %v801_v14  ;;  %v1291_v19 = vmax.f32 %v1235_v0, %v902_v20  ;;  %v904_v8 = vrot.slane %v5617_v43, 1 }
 0x13c   : > { %1778 = vst.msk [vmem:[#allocation3 + $0xa1] sm:$0x80] %vm1590_vm6, %v1729_v40  ;;  %v1393_v27 = vmax.f32 %v1345_v22, %v5594_v10  ;;  %v1079_v33 = vrot.slane %v5617_v43, 2  ;;  %v1555_v46 = vmul.f32 0.999995, %v1507_v26  ;;  %v1191_v28 = vmax.f32 %v998_v61, %v1077_v45 }
 0x13d   : > { %1779 = vst.msk [vmem:[#allocation3 + $0xa9] sm:$0xff] %vm639_vm1, %v1730_v35  ;;  %v1448_v13 = vmax.f32 %v1392_v18, %v900_v4  ;;  %v1349_v7 = vmax.f32 %v1292_v16, %v1077_v45  ;;  %v1347_v14 = vmax.f32 %v1290_v57, %v5607_v60  ;;  %v1001_v62 = vmax.f32 %v5617_v43, %v904_v8 }
 0x13e   : > { %v1449_v30 = vmax.f32 %v1393_v27, %v902_v20  ;;  %v903_v51 = vrot.slane %v5625_v32, 1  ;;  %4277 = vst.msk [vmem:[%s5220_s25 + $0x149] sm:$0x7f] %vm1593_vm5, %v1555_v46  ;;  %v1734_v10 = vmax.f32 %v1555_v46, 0.0  ;;  %v1239_v47 = vmax.f32 %v1191_v28, %v5617_v43 }
 0x13f   : > { %v1505_v36 = vmax.f32 %v1448_v13, %v5607_v60  ;;  %v1397_v4 = vmax.f32 %v1349_v7, %v5617_v43  ;;  %v7886_v45 = vrot.slane %v5261_v52, 2  ;;  %v5646_v16 = vrot.slane %v5625_v32, 2 }
 0x140   : > { %v1506_v61 = vmax.f32 %v1449_v30, %v5614_v63  ;;  %v905_v37 = vsel %vm881_vm3, %v903_v51, %v904_v8  ;;  %1783 = vst.msk [vmem:[#allocation3 + $0xd1] sm:$0x7f] %vm1593_vm5, %v1734_v10  ;;  %v1295_v20 = vmax.f32 %v1239_v47, %v904_v8  ;;  %v999_v49 = vmax.f32 %v805_v21, %v903_v51 }
 0x141   : > { %v1082_v39 = vsel %vm1042_vm2, %v1079_v33, %v7886_v45  ;;  %v1553_v60 = vmul.f32 0.999995, %v1505_v36  ;;  %v1453_v55 = vmax.f32 %v1397_v4, %v904_v8  ;;  %v1000_v43 = vmax.f32 %v5625_v32, %v905_v37 }
 0x142   : > { %v1554_v0 = vmul.f32 0.999995, %v1506_v61  ;;  %v5654_v52 = vsel %vm1042_vm2, %v5646_v16, %v1079_v33  ;;  %v1190_v40 = vmax.f32 %v997_v41, %v5614_v63  ;;  %v1237_v35 = vmax.f32 %v1189_v5, %v805_v21  ;;  %v5667_v5 = vld [vmem:[#allocation2 + $0x108] sm:$0xff] }
 0x143   : > { %4275 = vst.msk [vmem:[%s5220_s25 + $0x139] sm:$0x80] %vm1590_vm6, %v1553_v60  ;;  %v1732_v57 = vmax.f32 %v1553_v60, 0.0  ;;  %v1510_v22 = vmax.f32 %v1453_v55, %v1082_v39  ;;  %v1348_v26 = vmax.f32 %v1291_v19, %v5614_v63  ;;  %v1395_v8 = vmax.f32 %v1347_v14, %v805_v21  ;;  %v809_v14 = vld [vmem:[#allocation2 + $0x100] sm:$0xff] }
 0x144   : > { %4276 = vst.msk [vmem:[%s5220_s25 + $0x141] sm:$0xff] %vm639_vm1, %v1554_v0  ;;  %v1733_v18 = vmax.f32 %v1554_v0, 0.0  ;;  %v1238_v27 = vmax.f32 %v1190_v40, %v5625_v32  ;;  %v907_v46 = vrot.slane %v5649_v9, 1  ;;  %v1192_v41 = vmax.f32 %v999_v49, %v5646_v16 }
 0x145   : > { %1781 = vst.msk [vmem:[#allocation3 + $0xc1] sm:$0x80] %vm1590_vm6, %v1732_v57  ;;  %v1558_v33 = vmul.f32 0.999995, %v1510_v22  ;;  %v1293_v13 = vmax.f32 %v1237_v35, %v903_v51  ;;  %v1396_v28 = vmax.f32 %v1348_v26, %v5625_v32  ;;  %v1451_v19 = vmax.f32 %v1395_v8, %v903_v51  ;;  %v5688_v35 = vld [vmem:[#allocation2 + $0x130] sm:$0xff] }
 0x146   : > { %1782 = vst.msk [vmem:[#allocation3 + $0xc9] sm:$0xff] %vm639_vm1, %v1733_v18  ;;  %v1294_v63 = vmax.f32 %v1238_v27, %v905_v37  ;;  %v1084_v7 = vrot.slane %v5649_v9, 2  ;;  %v1194_v30 = vmax.f32 %v1001_v62, %v1082_v39  ;;  %v1004_v47 = vmax.f32 %v5649_v9, %v907_v46 }
 0x147   : > { %4280 = vst.msk [vmem:[%s5220_s25 + $0x159] sm:$0x7f] %vm1593_vm5, %v1558_v33  ;;  %v1737_v21 = vmax.f32 %v1558_v33, 0.0  ;;  %v1350_v10 = vmax.f32 %v1293_v13, %v5646_v16  ;;  %v1452_v36 = vmax.f32 %v1396_v28, %v905_v37  ;;  %v1508_v32 = vmax.f32 %v1451_v19, %v5646_v16 }
 0x148   : > { %v1242_v4 = vmax.f32 %v1194_v30, %v5649_v9  ;;  %v1352_v61 = vmax.f32 %v1295_v20, %v1082_v39  ;;  %v906_v51 = vrot.slane %v5667_v5, 1  ;;  %v1083_v45 = vrot.slane %v5667_v5, 2 }
 0x149   : > { %1786 = vst.msk [vmem:[#allocation3 + $0xf1] sm:$0x7f] %vm1593_vm5, %v1737_v21  ;;  %v1509_v62 = vmax.f32 %v1452_v36, %v5654_v52  ;;  %v1193_v60 = vmax.f32 %v1000_v43, %v5654_v52  ;;  %v1240_v37 = vmax.f32 %v1192_v41, %v809_v14  ;;  %v1556_v55 = vmul.f32 0.999995, %v1508_v32  ;;  %v5697_v41 = vld [vmem:[#allocation2 + $0x128] sm:$0xff] }
 0x14a   : > { %v7887_v49 = vrot.slane %v5263_v53, 2  ;;  %v1400_v39 = vmax.f32 %v1352_v61, %v5649_v9  ;;  %v908_v20 = vsel %vm881_vm3, %v906_v51, %v907_v46  ;;  %v1298_v40 = vmax.f32 %v1242_v4, %v907_v46 }
 0x14b   : > { %v1557_v0 = vmul.f32 0.999995, %v1509_v62  ;;  %v1002_v57 = vmax.f32 %v809_v14, %v906_v51  ;;  %v1003_v22 = vmax.f32 %v5667_v5, %v908_v20  ;;  %4278 = vst.msk [vmem:[%s5220_s25 + $0x149] sm:$0x80] %vm1590_vm6, %v1556_v55  ;;  %v1735_v43 = vmax.f32 %v1556_v55, 0.0 }
 0x14c   : > { %v1087_v16 = vsel %vm1042_vm2, %v1084_v7, %v7887_v49  ;;  %v1456_v26 = vmax.f32 %v1400_v39, %v907_v46  ;;  %v1241_v18 = vmax.f32 %v1193_v60, %v5667_v5  ;;  %v1296_v53 = vmax.f32 %v1240_v37, %v906_v51 }
 0x14d   : > { %4279 = vst.msk [vmem:[%s5220_s25 + $0x151] sm:$0xff] %vm639_vm1, %v1557_v0  ;;  %v1736_v27 = vmax.f32 %v1557_v0, 0.0  ;;  %v1085_v9 = vsel %vm1042_vm2, %v1083_v45, %v1084_v7  ;;  %v1351_v8 = vmax.f32 %v1294_v63, %v5654_v52  ;;  %v1398_v33 = vmax.f32 %v1350_v10, %v809_v14  ;;  %v813_v10 = vld [vmem:[#allocation2 + $0x120] sm:$0xff] }
 0x14e   : > { %1784 = vst.msk [vmem:[#allocation3 + $0xe1] sm:$0x80] %vm1590_vm6, %v1735_v43  ;;  %v1513_v13 = vmax.f32 %v1456_v26, %v1087_v16  ;;  %v1195_v28 = vmax.f32 %v1002_v57, %v1083_v45  ;;  %v1297_v19 = vmax.f32 %v1241_v18, %v908_v20  ;;  %v910_v46 = vrot.slane %v5688_v35, 1  ;;  %v5720_v18 = vld [vmem:[#allocation2 + $0x150] sm:$0xff] }
 0x14f   : > { %1785 = vst.msk [vmem:[#allocation3 + $0xe9] sm:$0xff] %vm639_vm1, %v1736_v27  ;;  %v1399_v30 = vmax.f32 %v1351_v8, %v5667_v5  ;;  %v1454_v21 = vmax.f32 %v1398_v33, %v906_v51  ;;  %v1089_v7 = vrot.slane %v5688_v35, 2  ;;  %v1197_v36 = vmax.f32 %v1004_v47, %v1087_v16 }
 0x150   : > { %v1561_v52 = vmul.f32 0.999995, %v1513_v13  ;;  %v1353_v63 = vmax.f32 %v1296_v53, %v1083_v45  ;;  %v1355_v14 = vmax.f32 %v1298_v40, %v1087_v16  ;;  %v909_v32 = vrot.slane %v5697_v41, 1  ;;  %v5726_v13 = vpop.f32.mrf.mxu0 }
 0x151   : > { %v1455_v4 = vmax.f32 %v1399_v30, %v908_v20  ;;  %v1511_v61 = vmax.f32 %v1454_v21, %v1083_v45  ;;  %v1007_v62 = vmax.f32 %v5688_v35, %v910_v46  ;;  %v1245_v60 = vmax.f32 %v1197_v36, %v5688_v35  ;;  %v5734_v36 = vld [vmem:[#allocation2 + $0x148] sm:$0xff] }
 0x152   : > { %4283 = vst.msk [vmem:[%s5220_s25 + $0x169] sm:$0x7f] %vm1593_vm5, %v1561_v52  ;;  %v1740_v5 = vmax.f32 %v1561_v52, 0.0  ;;  %v7888_v51 = vrot.slane %v5265_v54, 2  ;;  %v1403_v37 = vmax.f32 %v1355_v14, %v5688_v35  ;;  %v911_v55 = vsel %vm881_vm3, %v909_v32, %v910_v46 }
 0x153   : > { %v1512_v49 = vmax.f32 %v1455_v4, %v1085_v9  ;;  %v1559_v16 = vmul.f32 0.999995, %v1511_v61  ;;  %v1301_v39 = vmax.f32 %v1245_v60, %v910_v46  ;;  %v1005_v45 = vmax.f32 %v813_v10, %v909_v32  ;;  %v817_v4 = vld [vmem:[#allocation2 + $0x140] sm:$0xff] }
 0x154   : > { %v1092_v47 = vsel %vm1042_vm2, %v1089_v7, %v7888_v51  ;;  %1789 = vst.msk [vmem:[#allocation3 + $0x111] sm:$0x7f] %vm1593_vm5, %v1740_v5  ;;  %v1459_v20 = vmax.f32 %v1403_v37, %v910_v46  ;;  %v5716_v0 = vrot.slane %v5697_v41, 2  ;;  %v1196_v40 = vmax.f32 %v1003_v22, %v1085_v9  ;;  %v5743_v5 = vpop.f32.mrf.mxu0 }
 0x155   : > { %v1243_v57 = vmax.f32 %v1195_v28, %v813_v10  ;;  %v1560_v54 = vmul.f32 0.999995, %v1512_v49  ;;  %4281 = vst.msk [vmem:[%s5220_s25 + $0x159] sm:$0x80] %vm1590_vm6, %v1559_v16  ;;  %v1738_v43 = vmax.f32 %v1559_v16, 0.0  ;;  %v1354_v35 = vmax.f32 %v1297_v19, %v1085_v9 }
 0x156   : > { %v1401_v26 = vmax.f32 %v1353_v63, %v813_v10  ;;  %v1516_v53 = vmax.f32 %v1459_v20, %v1092_v47  ;;  %v1006_v27 = vmax.f32 %v5697_v41, %v911_v55  ;;  %v1090_v8 = vsel %vm1042_vm2, %v5716_v0, %v1089_v7 }
 0x157   : > { %v1244_v33 = vmax.f32 %v1196_v40, %v5697_v41  ;;  %4282 = vst.msk [vmem:[%s5220_s25 + $0x161] sm:$0xff] %vm639_vm1, %v1560_v54  ;;  %v1739_v22 = vmax.f32 %v1560_v54, 0.0  ;;  %v1299_v9 = vmax.f32 %v1243_v57, %v909_v32  ;;  %v1402_v28 = vmax.f32 %v1354_v35, %v5697_v41  ;;  %v5758_v54 = vld [vmem:[#allocation2 + $0x170] sm:$0xff] }
 0x158   : > { %1787 = vst.msk [vmem:[#allocation3 + $0x101] sm:$0x80] %vm1590_vm6, %v1738_v43  ;;  %v1457_v19 = vmax.f32 %v1401_v26, %v909_v32  ;;  %v1564_v46 = vmul.f32 0.999995, %v1516_v53  ;;  %v1198_v30 = vmax.f32 %v1005_v45, %v5716_v0  ;;  %v913_v7 = vrot.slane %v5720_v18, 1  ;;  %v5761_v53 = vpop.f32.mrf.mxu0 }
 0x159   : > { %v1300_v21 = vmax.f32 %v1244_v33, %v911_v55  ;;  %1788 = vst.msk [vmem:[#allocation3 + $0x109] sm:$0xff] %vm639_vm1, %v1739_v22  ;;  %v1458_v52 = vmax.f32 %v1402_v28, %v911_v55  ;;  %v1094_v14 = vrot.slane %v5720_v18, 2  ;;  %v1200_v10 = vmax.f32 %v1007_v62, %v1092_v47 }
 0x15a   : > { %v1514_v63 = vmax.f32 %v1457_v19, %v5716_v0  ;;  %4286 = vst.msk [vmem:[%s5220_s25 + $0x179] sm:$0x7f] %vm1593_vm5, %v1564_v46  ;;  %v1743_v41 = vmax.f32 %v1564_v46, 0.0  ;;  %v1356_v32 = vmax.f32 %v1299_v9, %v5716_v0  ;;  %v1010_v61 = vmax.f32 %v5720_v18, %v913_v7 }
 0x15b   : > { %v1358_v60 = vmax.f32 %v1301_v39, %v1092_v47  ;;  %v1515_v51 = vmax.f32 %v1458_v52, %v1090_v8  ;;  %v1248_v55 = vmax.f32 %v1200_v10, %v5720_v18  ;;  %v912_v49 = vrot.slane %v5734_v36, 1 }
 0x15c   : > { %v1562_v37 = vmul.f32 0.999995, %v1514_v63  ;;  %1792 = vst.msk [vmem:[#allocation3 + $0x131] sm:$0x7f] %vm1593_vm5, %v1743_v41  ;;  %v5750_v16 = vrot.slane %v5734_v36, 2  ;;  %v1199_v45 = vmax.f32 %v1006_v27, %v1090_v8  ;;  %v1246_v20 = vmax.f32 %v1198_v30, %v817_v4  ;;  %v5770_v30 = vld [vmem:[#allocation2 + $0x168] sm:$0xff] }
 0x15d   : > { %v1406_v62 = vmax.f32 %v1358_v60, %v5720_v18  ;;  %v1563_v0 = vmul.f32 0.999995, %v1515_v51  ;;  %v7889_v39 = vrot.slane %v5271_v59, 2  ;;  %v914_v57 = vsel %vm881_vm3, %v912_v49, %v913_v7 }
 0x15e   : > { %4284 = vst.msk [vmem:[%s5220_s25 + $0x169] sm:$0x80] %vm1590_vm6, %v1562_v37  ;;  %v1741_v47 = vmax.f32 %v1562_v37, 0.0  ;;  %v1304_v43 = vmax.f32 %v1248_v55, %v913_v7  ;;  %v1008_v26 = vmax.f32 %v817_v4, %v912_v49  ;;  %v1009_v18 = vmax.f32 %v5734_v36, %v914_v57  ;;  %v821_v37 = vld [vmem:[#allocation2 + $0x160] sm:$0xff] }
 0x15f   : > { %v1097_v40 = vsel %vm1042_vm2, %v1094_v14, %v7889_v39  ;;  %v1462_v35 = vmax.f32 %v1406_v62, %v913_v7  ;;  %4285 = vst.msk [vmem:[%s5220_s25 + $0x171] sm:$0xff] %vm639_vm1, %v1563_v0  ;;  %v1742_v27 = vmax.f32 %v1563_v0, 0.0  ;;  %v1247_v59 = vmax.f32 %v1199_v45, %v5734_v36 }
 0x160   : > { %1790 = vst.msk [vmem:[#allocation3 + $0x121] sm:$0x80] %vm1590_vm6, %v1741_v47  ;;  %v1302_v33 = vmax.f32 %v1246_v20, %v912_v49  ;;  %v1357_v22 = vmax.f32 %v1300_v21, %v1090_v8  ;;  %v1095_v28 = vsel %vm1042_vm2, %v5750_v16, %v1094_v14  ;;  %v1404_v19 = vmax.f32 %v1356_v32, %v817_v4  ;;  %v5777_v4 = vpop.f32.mrf.mxu0 }
 0x161   : > { %v1519_v9 = vmax.f32 %v1462_v35, %v1097_v40  ;;  %v916_v46 = vrot.slane %v5758_v54, 1  ;;  %1791 = vst.msk [vmem:[#allocation3 + $0x129] sm:$0xff] %vm639_vm1, %v1742_v27  ;;  %v1201_v7 = vmax.f32 %v1008_v26, %v5750_v16  ;;  %v1303_v52 = vmax.f32 %v1247_v59, %v914_v57  ;;  %v5795_v35 = vld [vmem:[#allocation2 + $0x190] sm:$0xff] }
 0x162   : > { %v1405_v63 = vmax.f32 %v1357_v22, %v5734_v36  ;;  %v1099_v10 = vrot.slane %v5758_v54, 2  ;;  %v1359_v21 = vmax.f32 %v1302_v33, %v5750_v16  ;;  %v1460_v41 = vmax.f32 %v1404_v19, %v912_v49  ;;  %v5797_v26 = vpop.f32.mrf.mxu0 }
 0x163   : > { %v1567_v8 = vmul.f32 0.999995, %v1519_v9  ;;  %v1203_v14 = vmax.f32 %v1010_v61, %v1097_v40  ;;  %v1013_v60 = vmax.f32 %v5758_v54, %v916_v46  ;;  %v1361_v51 = vmax.f32 %v1304_v43, %v1097_v40 }
 0x164   : > { %v1461_v32 = vmax.f32 %v1405_v63, %v914_v57  ;;  %v915_v55 = vrot.slane %v5770_v30, 1  ;;  %v1517_v36 = vmax.f32 %v1460_v41, %v5750_v16  ;;  %v5786_v20 = vrot.slane %v5770_v30, 2 }
 0x165   : > { %4289 = vst.msk [vmem:[%s5220_s25 + $0x189] sm:$0x7f] %vm1593_vm5, %v1567_v8  ;;  %v1746_v62 = vmax.f32 %v1567_v8, 0.0  ;;  %v1251_v45 = vmax.f32 %v1203_v14, %v5758_v54  ;;  %v7890_v49 = vrot.slane %v5278_v1, 2  ;;  %v1409_v47 = vmax.f32 %v1361_v51, %v5758_v54 }
 0x166   : > { %v1518_v61 = vmax.f32 %v1461_v32, %v1095_v28  ;;  %v917_v39 = vsel %vm881_vm3, %v915_v55, %v916_v46  ;;  %v1565_v40 = vmul.f32 0.999995, %v1517_v36  ;;  %v1011_v57 = vmax.f32 %v821_v37, %v915_v55 }
 0x167   : > { %v1102_v0 = vsel %vm1042_vm2, %v1099_v10, %v7890_v49  ;;  %1795 = vst.msk [vmem:[#allocation3 + $0x151] sm:$0x7f] %vm1593_vm5, %v1746_v62  ;;  %v1307_v16 = vmax.f32 %v1251_v45, %v916_v46  ;;  %v1012_v43 = vmax.f32 %v5770_v30, %v917_v39  ;;  %v1465_v1 = vmax.f32 %v1409_v47, %v916_v46 }
 0x168   : > { %v1566_v27 = vmul.f32 0.999995, %v1518_v61  ;;  %v5801_v59 = vsel %vm1042_vm2, %v5786_v20, %v1099_v10  ;;  %v1202_v54 = vmax.f32 %v1009_v18, %v1095_v28  ;;  %4287 = vst.msk [vmem:[%s5220_s25 + $0x179] sm:$0x80] %vm1590_vm6, %v1565_v40  ;;  %v1744_v33 = vmax.f32 %v1565_v40, 0.0 }
 0x169   : > { %v1249_v22 = vmax.f32 %v1201_v7, %v821_v37  ;;  %v1360_v9 = vmax.f32 %v1303_v52, %v1095_v28  ;;  %v1407_v19 = vmax.f32 %v1359_v21, %v821_v37  ;;  %v1522_v8 = vmax.f32 %v1465_v1, %v1102_v0  ;;  %v4505_v28 = vpop.f32.mrf.mxu0 }
 0x16a   : > { %4288 = vst.msk [vmem:[%s5220_s25 + $0x181] sm:$0xff] %vm639_vm1, %v1566_v27  ;;  %v1745_v63 = vmax.f32 %v1566_v27, 0.0  ;;  %v1250_v41 = vmax.f32 %v1202_v54, %v5770_v30  ;;  %v5809_v14 = vrot.slane %v5795_v35, 1  ;;  %v1104_v7 = vrot.slane %v5795_v35, 2 }
 0x16b   : > { %1793 = vst.msk [vmem:[#allocation3 + $0x141] sm:$0x80] %vm1590_vm6, %v1744_v33  ;;  %v1305_v46 = vmax.f32 %v1249_v22, %v915_v55  ;;  %v1408_v18 = vmax.f32 %v1360_v9, %v5770_v30  ;;  %v1463_v10 = vmax.f32 %v1407_v19, %v915_v55  ;;  %v1570_v52 = vmul.f32 0.999995, %v1522_v8  ;;  %v5824_v55 = vld [vmem:[#allocation2 + $0x180] sm:$0xff]  ;;  %v588_v27 = vpop.f32.mrf.mxu0  ;;  %v848_v22 = vld [vmem:[#allocation2 + $0x238] sm:$0xff] }
 0x16c   : > { %1794 = vst.msk [vmem:[#allocation3 + $0x149] sm:$0xff] %vm639_vm1, %v1745_v63  ;;  %v5816_v21 = vmax.f32 %v1011_v57, %v5786_v20  ;;  %v5818_v32 = vmax.f32 %v1250_v41, %v917_v39  ;;  %v1206_v51 = vmax.f32 %v1013_v60, %v1102_v0  ;;  %v1016_v30 = vmax.f32 %v5795_v35, %v5809_v14  ;;  %v5862_v9 = vld [vmem:[%s7857_s2 + $0x4] ss:$0 sm:$0xff]  ;;  %v5870_v41 = vld [vmem:[#allocation3 + $0x88] sm:$0xff] }
 0x16d   : > { %v1362_v37 = vmax.f32 %v1305_v46, %v5786_v20  ;;  %v1464_v62 = vmax.f32 %v1408_v18, %v917_v39  ;;  %v1520_v36 = vmax.f32 %v1463_v10, %v5786_v20  ;;  %4292 = vst.msk [vmem:[%s5220_s25 + $0x199] sm:$0x7f] %vm1593_vm5, %v1570_v52  ;;  %v1749_v45 = vmax.f32 %v1570_v52, 0.0  ;;  %v4508_v10 = vpop.f32.mrf.mxu0 }
 0x16e   : > { %v1254_v61 = vmax.f32 %v1206_v51, %v5795_v35  ;;  %v1364_v49 = vmax.f32 %v1307_v16, %v1102_v0  ;;  %v629_v60 = vmul.f32 0.999995, %v5726_v13  ;;  %v7891_v20 = vrot.slane %v5280_v2, 2  ;;  %v5899_v51 = vld [vmem:[%s7857_s2 + $0x1] ss:$0 sm:$0xff] }
 0x16f   : > { %v1521_v47 = vmax.f32 %v1464_v62, %v5801_v59  ;;  %v1568_v39 = vmul.f32 0.999995, %v1520_v36  ;;  %v5839_v57 = vmax.f32 %v1012_v43, %v5801_v59  ;;  %1798 = vst.msk [vmem:[#allocation3 + $0x171] sm:$0x7f] %vm1593_vm5, %v1749_v45  ;;  %v1252_v2 = vmax.f32 %v5816_v21, %v5824_v55  ;;  %v5909_v36 = vld [vmem:[%s7857_s2 + $0x2] ss:$0 sm:$0xff] }
 0x170   : > { %v5836_v40 = vsel %vm1042_vm2, %v1104_v7, %v7891_v20  ;;  %v5843_v0 = vmax.f32 %v1254_v61, %v5809_v14  ;;  %v1412_v13 = vmax.f32 %v1364_v49, %v5795_v35  ;;  %662 = vst.msk [vmem:[%s5220_s25 + $0xb0] sm:$0xff] %vm639_vm1, %v629_v60  ;;  %767 = vst.msk [vmem:[#allocation2 + $0x188] sm:$0xff] %vm639_vm1, %v629_v60  ;;  %v632_v33 = vmul.f32 0.999995, %v5743_v5  ;;  %v5926_v49 = vld [vmem:[#allocation3 + $0x50] sm:$0xff] }
 0x171   : > { %v1363_v16 = vmax.f32 %v5818_v32, %v5801_v59  ;;  %v1569_v43 = vmul.f32 0.999995, %v1521_v47  ;;  %4290 = vst.msk [vmem:[%s5220_s25 + $0x189] sm:$0x80] %vm1590_vm6, %v1568_v39  ;;  %v1747_v1 = vmax.f32 %v1568_v39, 0.0  ;;  %v5856_v54 = vmax.f32 %v1362_v37, %v5824_v55 }
 0x172   : > { %v1468_v19 = vmax.f32 %v1412_v13, %v5809_v14  ;;  %v5866_v59 = vmax.f32 %v1016_v30, %v5836_v40  ;;  %v631_v63 = vmul.f32 0.999995, %v5761_v53  ;;  %v634_v8 = vmul.f32 0.999995, %v5777_v4  ;;  %665 = vst.msk [vmem:[%s5220_s25 + $0xc8] sm:$0xff] %vm639_vm1, %v632_v33  ;;  %770 = vst.msk [vmem:[#allocation2 + $0x1b0] sm:$0xff] %vm639_vm1, %v632_v33 }
 0x173   : > { %4291 = vst.msk [vmem:[%s5220_s25 + $0x191] sm:$0xff] %vm639_vm1, %v1569_v43  ;;  %v1748_v5 = vmax.f32 %v1569_v43, 0.0  ;;  %v633_v46 = vmul.f32 0.999995, %v5797_v26  ;;  %v636_v18 = vmul.f32 0.999995, %v4505_v28  ;;  %v1367_v28 = vmax.f32 %v5843_v0, %v5836_v40 }
 0x174   : > { %1796 = vst.msk [vmem:[#allocation3 + $0x161] sm:$0x80] %vm1590_vm6, %v1747_v1  ;;  %v7868_v53 = vrot.slane %v5489_v38, 2  ;;  %v1525_v4 = vmax.f32 %v1468_v19, %v5836_v40  ;;  %v635_v52 = vmul.f32 0.999995, %v588_v27  ;;  %v1488_v26 = vrot.slane %v848_v22, 2 }
 0x175   : > { %664 = vst.msk [vmem:[%s5220_s25 + $0xc0] sm:$0xff] %vm639_vm1, %v631_v63  ;;  %769 = vst.msk [vmem:[#allocation2 + $0x1a8] sm:$0xff] %vm639_vm1, %v631_v63  ;;  %v638_v32 = vmul.f32 0.999995, %v4508_v10  ;;  %v5903_v37 = vmul.f32 %v5899_v51, %v5870_v41  ;;  %v7866_v62 = vrot.slane %v5493_v50, 2  ;;  %v5913_v30 = vmul.f32 %v5909_v36, %v5870_v41 }
 0x176   : > { %667 = vst.msk [vmem:[%s5220_s25 + $0xd8] sm:$0xff] %vm639_vm1, %v634_v8  ;;  %772 = vst.msk [vmem:[#allocation2 + $0x1d0] sm:$0xff] %vm639_vm1, %v634_v8  ;;  %v1573_v45 = vmul.f32 0.999995, %v1525_v4  ;;  %v5924_v61 = vsel %vm1042_vm2, %v7868_v53, %v1488_v26  ;;  %v7865_v60 = vrot.slane %v5504_v3, 4  ;;  %v5931_v47 = vmul.f32 %v5862_v9, %v5458_v58 }
 0x177   : > { %1797 = vst.msk [vmem:[#allocation3 + $0x169] sm:$0xff] %vm639_vm1, %v1748_v5  ;;  %666 = vst.msk [vmem:[%s5220_s25 + $0xd0] sm:$0xff] %vm639_vm1, %v633_v46  ;;  %v826_v39 = vld [vmem:[#allocation2 + $0x188] sm:$0xff]  ;;  %v7864_v20 = vrot.slane %v5903_v37, 2  ;;  %v2169_v40 = vadd.f32 %v7866_v62, %v5321_v42  ;;  %v7863_v27 = vrot.slane %v5913_v30, 4  ;;  %v5940_v0 = vadd.f32 %v5520_v25, %v5308_v29 }
 0x178   : > { %771 = vst.msk [vmem:[#allocation2 + $0x1c8] sm:$0xff] %vm639_vm1, %v633_v46  ;;  %669 = vst.msk [vmem:[%s5220_s25 + $0xe8] sm:$0xff] %vm639_vm1, %v636_v18  ;;  %v1752_v13 = vmax.f32 %v1573_v45, 0.0  ;;  %v918_v43 = vrot.slane %v826_v39, 1  ;;  %v1103_v1 = vrot.slane %v826_v39, 2  ;;  %v1253_v58 = vmax.f32 %v5839_v57, %v826_v39 }
 0x179   : > { %774 = vst.msk [vmem:[#allocation2 + $0x1f0] sm:$0xff] %vm639_vm1, %v636_v18  ;;  %668 = vst.msk [vmem:[%s5220_s25 + $0xe0] sm:$0xff] %vm639_vm1, %v635_v52  ;;  %v1411_v33 = vmax.f32 %v1363_v16, %v826_v39  ;;  %v5948_v22 = vadd.f32 %v7864_v20, %v5325_v44  ;;  %v5952_v42 = vadd.f32 %v7865_v60, %v2169_v40  ;;  %v831_v16 = vld [vmem:[#allocation2 + $0x1b0] sm:$0xff]  ;;  %v2659_v19 = vrot.slane %v5931_v47, 2 }
 0x17a   : > { %773 = vst.msk [vmem:[#allocation2 + $0x1e8] sm:$0xff] %vm639_vm1, %v635_v52  ;;  %671 = vst.msk [vmem:[%s5220_s25 + $0xf8] sm:$0xff] %vm639_vm1, %v638_v32  ;;  %v5956_v29 = vmul.f32 %v5862_v9, %v5926_v49  ;;  %v920_v25 = vsel %vm881_vm3, %v918_v43, %v5809_v14  ;;  %v1014_v57 = vmax.f32 %v5824_v55, %v918_v43  ;;  %v922_v4 = vrot.slane %v831_v16, 1 }
 0x17b   : > { %776 = vst.msk [vmem:[#allocation2 + $0x210] sm:$0xff] %vm639_vm1, %v638_v32  ;;  %v1308_v44 = vmax.f32 %v1252_v2, %v918_v43  ;;  %v1015_v63 = vmax.f32 %v826_v39, %v920_v25  ;;  %v1105_v8 = vsel %vm1042_vm2, %v1103_v1, %v1104_v7  ;;  %v1466_v5 = vmax.f32 %v5856_v54, %v918_v43  ;;  %v829_v2 = vld [vmem:[#allocation2 + $0x1a0] sm:$0xff] }
 0x17c   : > { %4295 = vst.msk [vmem:[%s5220_s25 + $0x1a9] sm:$0x7f] %vm1593_vm5, %v1573_v45  ;;  %1801 = vst.msk [vmem:[#allocation3 + $0x191] sm:$0x7f] %vm1593_vm5, %v1752_v13  ;;  %v1467_v46 = vmax.f32 %v1411_v33, %v920_v25  ;;  %v830_v18 = vld [vmem:[#allocation2 + $0x1a8] sm:$0xff]  ;;  %v1207_v10 = vmax.f32 %v1014_v57, %v1103_v1  ;;  %v1309_v14 = vmax.f32 %v1253_v58, %v920_v25  ;;  %v1109_v52 = vrot.slane %v831_v16, 2 }
 0x17d   : > { %v1523_v32 = vmax.f32 %v1466_v5, %v1103_v1  ;;  %v1257_v21 = vmax.f32 %v5866_v59, %v831_v16  ;;  %v1415_v55 = vmax.f32 %v1367_v28, %v831_v16  ;;  %v1365_v45 = vmax.f32 %v1308_v44, %v1103_v1  ;;  %v5977_v28 = vld [vmem:[#allocation2 + $0x1d0] sm:$0xff] }
 0x17e   : > { %v1524_v26 = vmax.f32 %v1467_v46, %v1105_v8  ;;  %v1019_v35 = vmax.f32 %v831_v16, %v922_v4  ;;  %v921_v39 = vrot.slane %v830_v18, 1  ;;  %v5971_v7 = vrot.slane %v830_v18, 2 }
 0x17f   : > { %v1571_v54 = vmul.f32 0.999995, %v1523_v32  ;;  %v7892_v13 = vrot.slane %v5295_v15, 2  ;;  %v1471_v58 = vmax.f32 %v1415_v55, %v922_v4  ;;  %v1313_v33 = vmax.f32 %v1257_v21, %v922_v4 }
 0x180   : > { %v1572_v40 = vmul.f32 0.999995, %v1524_v26  ;;  %v923_v25 = vsel %vm881_vm3, %v921_v39, %v922_v4  ;;  %v1017_v59 = vmax.f32 %v829_v2, %v921_v39  ;;  %v1208_v57 = vmax.f32 %v1015_v63, %v1105_v8 }
 0x181   : > { %v1112_v43 = vsel %vm1042_vm2, %v1109_v52, %v7892_v13  ;;  %4293 = vst.msk [vmem:[%s5220_s25 + $0x199] sm:$0x80] %vm1590_vm6, %v1571_v54  ;;  %v1750_v1 = vmax.f32 %v1571_v54, 0.0  ;;  %v1110_v15 = vsel %vm1042_vm2, %v5971_v7, %v1109_v52  ;;  %v1018_v5 = vmax.f32 %v830_v18, %v923_v25 }
 0x182   : > { %4294 = vst.msk [vmem:[%s5220_s25 + $0x1a1] sm:$0xff] %vm639_vm1, %v1572_v40  ;;  %v1751_v44 = vmax.f32 %v1572_v40, 0.0  ;;  %v1528_v16 = vmax.f32 %v1471_v58, %v1112_v43  ;;  %v1255_v46 = vmax.f32 %v1207_v10, %v829_v2  ;;  %v1256_v32 = vmax.f32 %v1208_v57, %v830_v18  ;;  %v5990_v58 = vld [vmem:[#allocation2 + $0x1c8] sm:$0xff] }
 0x183   : > { %v1366_v26 = vmax.f32 %v1309_v14, %v1105_v8  ;;  %1799 = vst.msk [vmem:[#allocation3 + $0x181] sm:$0x80] %vm1590_vm6, %v1750_v1  ;;  %v1413_v4 = vmax.f32 %v1365_v45, %v829_v2  ;;  %v925_v21 = vrot.slane %v5977_v28, 1  ;;  %v1114_v55 = vrot.slane %v5977_v28, 2  ;;  %v833_v1 = vld [vmem:[#allocation2 + $0x1c0] sm:$0xff] }
 0x184   : > { %1800 = vst.msk [vmem:[#allocation3 + $0x189] sm:$0xff] %vm639_vm1, %v1751_v44  ;;  %v1576_v63 = vmul.f32 0.999995, %v1528_v16  ;;  %v1210_v54 = vmax.f32 %v1017_v59, %v5971_v7  ;;  %v1311_v40 = vmax.f32 %v1255_v46, %v921_v39  ;;  %v1212_v52 = vmax.f32 %v1019_v35, %v1112_v43 }
 0x185   : > { %v1414_v13 = vmax.f32 %v1366_v26, %v830_v18  ;;  %v1312_v10 = vmax.f32 %v1256_v32, %v923_v25  ;;  %v1469_v14 = vmax.f32 %v1413_v4, %v921_v39  ;;  %v1022_v57 = vmax.f32 %v5977_v28, %v925_v21 }
 0x186   : > { %4298 = vst.msk [vmem:[%s5220_s25 + $0x1b9] sm:$0x7f] %vm1593_vm5, %v1576_v63  ;;  %v1755_v8 = vmax.f32 %v1576_v63, 0.0  ;;  %v7893_v45 = vrot.slane %v5297_v17, 2  ;;  %v1260_v59 = vmax.f32 %v1212_v52, %v5977_v28  ;;  %v1370_v16 = vmax.f32 %v1313_v33, %v1112_v43 }
 0x187   : > { %v1470_v2 = vmax.f32 %v1414_v13, %v923_v25  ;;  %v1526_v18 = vmax.f32 %v1469_v14, %v5971_v7  ;;  %v924_v35 = vrot.slane %v5990_v58, 1  ;;  %v1113_v39 = vrot.slane %v5990_v58, 2 }
 0x188   : > { %v1117_v44 = vsel %vm1042_vm2, %v1114_v55, %v7893_v45  ;;  %1804 = vst.msk [vmem:[#allocation3 + $0x1b1] sm:$0x7f] %vm1593_vm5, %v1755_v8  ;;  %v1211_v46 = vmax.f32 %v1018_v5, %v1110_v15  ;;  %v1368_v32 = vmax.f32 %v1311_v40, %v5971_v7  ;;  %v1418_v17 = vmax.f32 %v1370_v16, %v5977_v28  ;;  %v6008_v45 = vld [vmem:[#allocation2 + $0x1f0] sm:$0xff] }
 0x189   : > { %v1527_v25 = vmax.f32 %v1470_v2, %v1110_v15  ;;  %v1258_v26 = vmax.f32 %v1210_v54, %v833_v1  ;;  %v1574_v63 = vmul.f32 0.999995, %v1526_v18  ;;  %v1316_v4 = vmax.f32 %v1260_v59, %v925_v21 }
 0x18a   : > { %v926_v43 = vsel %vm881_vm3, %v924_v35, %v925_v21  ;;  %v1020_v33 = vmax.f32 %v833_v1, %v924_v35  ;;  %v1474_v52 = vmax.f32 %v1418_v17, %v925_v21  ;;  %v1115_v8 = vsel %vm1042_vm2, %v1113_v39, %v1114_v55  ;;  %v6017_v55 = vld [vmem:[#allocation2 + $0x1e8] sm:$0xff] }
 0x18b   : > { %v1575_v13 = vmul.f32 0.999995, %v1527_v25  ;;  %v1259_v14 = vmax.f32 %v1211_v46, %v5990_v58  ;;  %4296 = vst.msk [vmem:[%s5220_s25 + $0x1a9] sm:$0x80] %vm1590_vm6, %v1574_v63  ;;  %v1753_v7 = vmax.f32 %v1574_v63, 0.0  ;;  %v1021_v28 = vmax.f32 %v5990_v58, %v926_v43 }
 0x18c   : > { %v1314_v5 = vmax.f32 %v1258_v26, %v924_v35  ;;  %v1369_v54 = vmax.f32 %v1312_v10, %v1110_v15  ;;  %v1531_v2 = vmax.f32 %v1474_v52, %v1117_v44  ;;  %v6015_v59 = vmax.f32 %v1020_v33, %v1113_v39 }
 0x18d   : > { %4297 = vst.msk [vmem:[%s5220_s25 + $0x1b1] sm:$0xff] %vm639_vm1, %v1575_v13  ;;  %v1754_v40 = vmax.f32 %v1575_v13, 0.0  ;;  %v1416_v21 = vmax.f32 %v1368_v32, %v833_v1  ;;  %v1315_v16 = vmax.f32 %v1259_v14, %v926_v43  ;;  %v928_v25 = vrot.slane %v6008_v45, 1 }
 0x18e   : > { %1802 = vst.msk [vmem:[#allocation3 + $0x1a1] sm:$0x80] %vm1590_vm6, %v1753_v7  ;;  %v1371_v18 = vmax.f32 %v1314_v5, %v1113_v39  ;;  %v1417_v46 = vmax.f32 %v1369_v54, %v5990_v58  ;;  %v1579_v15 = vmul.f32 0.999995, %v1531_v2  ;;  %v1215_v17 = vmax.f32 %v1022_v57, %v1117_v44  ;;  %v6032_v57 = vld [vmem:[#allocation2 + $0x1e0] sm:$0xff]  ;;  %v6040_v7 = vld [vmem:[#allocation2 + $0x210] sm:$0xff] }
 0x18f   : > { %1803 = vst.msk [vmem:[#allocation3 + $0x1a9] sm:$0xff] %vm639_vm1, %v1754_v40  ;;  %v1472_v10 = vmax.f32 %v1416_v21, %v924_v35  ;;  %v1373_v26 = vmax.f32 %v1316_v4, %v1117_v44  ;;  %v1025_v1 = vmax.f32 %v6008_v45, %v928_v25  ;;  %v1119_v32 = vrot.slane %v6008_v45, 2 }
 0x190   : > { %v1473_v63 = vmax.f32 %v1417_v46, %v926_v43  ;;  %v6026_v33 = vrot.slane %v6017_v55, 1  ;;  %4301 = vst.msk [vmem:[%s5220_s25 + $0x1c9] sm:$0x7f] %vm1593_vm5, %v1579_v15  ;;  %v1758_v13 = vmax.f32 %v1579_v15, 0.0  ;;  %v1263_v52 = vmax.f32 %v1215_v17, %v6008_v45 }
 0x191   : > { %v1529_v58 = vmax.f32 %v1472_v10, %v1113_v39  ;;  %v1421_v14 = vmax.f32 %v1373_v26, %v6008_v45  ;;  %v6038_v4 = vmax.f32 %v1021_v28, %v1115_v8  ;;  %v1372_v43 = vmax.f32 %v1315_v16, %v1115_v8 }
 0x192   : > { %v1530_v35 = vmax.f32 %v1473_v63, %v1115_v8  ;;  %v6036_v44 = vsel %vm881_vm3, %v6026_v33, %v928_v25  ;;  %1807 = vst.msk [vmem:[#allocation3 + $0x1d1] sm:$0x7f] %vm1593_vm5, %v1758_v13  ;;  %v6044_v54 = vrot.slane %v6017_v55, 2  ;;  %v1419_v40 = vmax.f32 %v1371_v18, %v6032_v57 }
 0x193   : > { %v1577_v39 = vmul.f32 0.999995, %v1529_v58  ;;  %v1477_v5 = vmax.f32 %v1421_v14, %v928_v25  ;;  %v1024_v21 = vmax.f32 %v6017_v55, %v6036_v44  ;;  %v6050_v28 = vmax.f32 %v1372_v43, %v6017_v55  ;;  %v6076_v58 = vld [vmem:[%s7857_s2 + $0x5] ss:$0 sm:$0xff] }
 0x194   : > { %v1578_v2 = vmul.f32 0.999995, %v1530_v35  ;;  %v1122_v8 = vsel %vm1042_vm2, %v1119_v32, %v1121_v34  ;;  %v1475_v46 = vmax.f32 %v1419_v40, %v6026_v33  ;;  %v6061_v18 = vrot.slane %v6040_v7, 1 }
 0x195   : > { %4299 = vst.msk [vmem:[%s5220_s25 + $0x1b9] sm:$0x80] %vm1590_vm6, %v1577_v39  ;;  %v1756_v16 = vmax.f32 %v1577_v39, 0.0  ;;  %v1218_v15 = vmax.f32 %v1025_v1, %v1122_v8  ;;  %v1262_v17 = vmax.f32 %v6038_v4, %v6017_v55  ;;  %v1319_v31 = vmax.f32 %v1263_v52, %v928_v25 }
 0x196   : > { %4300 = vst.msk [vmem:[%s5220_s25 + $0x1c1] sm:$0xff] %vm639_vm1, %v1578_v2  ;;  %v1757_v10 = vmax.f32 %v1578_v2, 0.0  ;;  %v7867_v26 = vrot.slane %v6040_v7, 2  ;;  %v1476_v34 = vmax.f32 %v6050_v28, %v6036_v44  ;;  %v1532_v63 = vmax.f32 %v1475_v46, %v6044_v54  ;;  %v6118_v46 = vld [vmem:[%s7857_s2 + $0x7] ss:$0 sm:$0xff] }
 0x197   : > { %1805 = vst.msk [vmem:[#allocation3 + $0x1c1] sm:$0x80] %vm1590_vm6, %v1756_v16  ;;  %v1266_v1 = vmax.f32 %v1218_v15, %v6040_v7  ;;  %v1534_v13 = vmax.f32 %v1477_v5, %v1122_v8  ;;  %v1376_v52 = vmax.f32 %v1319_v31, %v1122_v8  ;;  %v6087_v14 = vadd.f32 %v7863_v27, %v5948_v22  ;;  %v6100_v22 = vld [vmem:[#allocation3 + $0x90] sm:$0xff]  ;;  %v6107_v8 = vld [vmem:[#allocation3 + $0x48] sm:$0xff]  ;;  %v1829_v28 = vld [vmem:[#allocation3 + $0x60] sm:$0xff] }
 0x198   : > { %1806 = vst.msk [vmem:[#allocation3 + $0x1c9] sm:$0xff] %vm639_vm1, %v1757_v10  ;;  %v1328_v25 = vsel %vm1042_vm2, %v7867_v26, %v1327_v11  ;;  %v2660_v35 = vrot.slane %v5956_v29, 2  ;;  %v1580_v43 = vmul.f32 0.999995, %v1532_v63  ;;  %v2755_v56 = vadd.f32 %v2659_v19, %v5433_v48  ;;  %v6097_v11 = vld [vmem:[%s7857_s2 + $0x6] ss:$0 sm:$0xff] }
 0x199   : > { %v1322_v39 = vmax.f32 %v1266_v1, %v6061_v18  ;;  %v1582_v5 = vmul.f32 0.999995, %v1534_v13  ;;  %v1424_v40 = vmax.f32 %v1376_v52, %v6040_v7  ;;  %v2808_v48 = vmul.f32 %v6107_v8, %v6076_v58  ;;  %v6128_v31 = vld [vmem:[%s7857_s2 + $0x8] ss:$0 sm:$0xff]  ;;  %v4606_v52 = vld [vmem:[#allocation3 + $0x80] sm:$0xff]  ;;  %v1820_v26 = vld [vmem:[#allocation3 + $0x18] sm:$0xff] }
 0x19a   : > { %v2661_v2 = vsel %vm1042_vm2, %v2659_v19, %v2660_v35  ;;  %v6113_v16 = vmul.f32 %v6076_v58, %v5926_v49  ;;  %4302 = vst.msk [vmem:[%s5220_s25 + $0x1c9] sm:$0x80] %vm1590_vm6, %v1580_v43  ;;  %v1759_v15 = vmax.f32 %v1580_v43, 0.0  ;;  %v3085_v27 = vmul.f32 %v4606_v52, %v6097_v11  ;;  %v4607_v43 = vld [vmem:[#allocation2 + $0x230] sm:$0xff]  ;;  %v1822_v29 = vld [vmem:[#allocation3 + $0x28] sm:$0xff] }
 0x19b   : > { %v1379_v47 = vmax.f32 %v1322_v39, %v1328_v25  ;;  %4304 = vst.msk [vmem:[%s5220_s25 + $0x1d9] sm:$0x7f] %vm1593_vm5, %v1582_v5  ;;  %v1761_v19 = vmax.f32 %v1582_v5, 0.0  ;;  %v2756_v10 = vadd.f32 %v2661_v2, %v5940_v0  ;;  %v1480_v63 = vmax.f32 %v1424_v40, %v6061_v18 }
 0x19c   : > { %v2904_v1 = vrot.slane %v2808_v48, 4  ;;  %v2905_v13 = vrot.slane %v6113_v16, 4  ;;  %1808 = vst.msk [vmem:[#allocation3 + $0x1e1] sm:$0x80] %vm1590_vm6, %v1759_v15  ;;  %v3086_v0 = vmul.f32 %v6097_v11, %v5870_v41  ;;  %v3186_v5 = vmul.f32 %v6118_v46, %v5870_v41 }
 0x19d   : > { %v1427_v39 = vmax.f32 %v1379_v47, %v4607_v43  ;;  %1810 = vst.msk [vmem:[#allocation3 + $0x1f1] sm:$0x7f] %vm1593_vm5, %v1761_v19  ;;  %v6141_v40 = vmul.f32 %v6118_v46, %v6100_v22  ;;  %v1537_v2 = vmax.f32 %v1480_v63, %v1328_v25  ;;  %v3399_v47 = vmul.f32 %v6128_v31, %v5870_v41 }
 0x19e   : > { %v2906_v48 = vsel %vm2312_vm4, %v2904_v1, %v2905_v13  ;;  %v3032_v15 = vadd.f32 %v2904_v1, %v2755_v56  ;;  %v3250_v43 = vrot.slane %v3186_v5, 2  ;;  %v6153_v25 = vmul.f32 %v6128_v31, %v6100_v22  ;;  %v1828_v56 = vld [vmem:[#allocation3 + $0x58] sm:$0xff] }
 0x19f   : > { %v1483_v19 = vmax.f32 %v1427_v39, %v1431_v23  ;;  %v3033_v52 = vadd.f32 %v2906_v48, %v2756_v10  ;;  %v7869_v20 = vrot.slane %v6141_v40, 2  ;;  %v1585_v60 = vmul.f32 0.999995, %v1537_v2  ;;  %v1836_v5 = vld [vmem:[#allocation3 + $0x98] sm:$0xff] }
 0x1a0   : > { %v3133_v62 = vadd.f32 %v3085_v27, %v3032_v15  ;;  %v3495_v63 = vrot.slane %v3399_v47, 4  ;;  %v6158_v53 = vadd.f32 %v5549_v6, %v5952_v42  ;;  %v3496_v48 = vrot.slane %v6153_v25, 4  ;;  %v4608_v15 = vld [vmem:[#allocation3 + $0x10] sm:$0xff] }
 0x1a1   : > { %v1540_v1 = vmax.f32 %v1483_v19, %v5924_v61  ;;  %v3134_v39 = vadd.f32 %v3086_v0, %v3033_v52  ;;  %v3252_v10 = vsel %vm1042_vm2, %v3250_v43, %v7869_v20  ;;  %4307 = vst.msk [vmem:[%s5220_s25 + $0x1e9] sm:$0x7f] %vm1593_vm5, %v1585_v60  ;;  %v1764_v27 = vmax.f32 %v1585_v60, 0.0  ;;  %v6169_v61 = vld [vmem:[%s7857_s2] ss:$0 sm:$0xff] }
 0x1a2   : > { %v3346_v2 = vadd.f32 %v3250_v43, %v3133_v62  ;;  %v1904_v6 = vmul.f32 %v6169_v61, %v4608_v15  ;;  %v2218_v47 = vmul.f32 %v5909_v36, %v1820_v26  ;;  %v6174_v19 = vmul.f32 %v5909_v36, %v1828_v56 }
 0x1a3   : > { %v1588_v42 = vmul.f32 0.999995, %v1540_v1  ;;  %v3347_v0 = vadd.f32 %v3252_v10, %v3134_v39  ;;  %1813 = vst.msk [vmem:[#allocation3 + $0x211] sm:$0x7f] %vm1593_vm5, %v1764_v27  ;;  %v3497_v62 = vsel %vm2312_vm4, %v3495_v63, %v3496_v48  ;;  %v7894_v52 = vrot.slane %v5197_v12, 2  ;;  %v598_v10 = vpop.f32.mrf.mxu0 }
 0x1a4   : > { %v3623_v60 = vadd.f32 %v3495_v63, %v3346_v2  ;;  %v6181_v25 = vmul.f32 %v5909_v36, %v1836_v5  ;;  %v2316_v26 = vrot.slane %v2218_v47, 4  ;;  %v6191_v63 = vld [vmem:[%s7857_s2 + $0x3] ss:$0 sm:$0xff]  ;;  %v2810_v2 = vmul.f32 %v6076_v58, %v1828_v56  ;;  %v6206_v56 = vld [vmem:[#allocation2 + $0x228] sm:$0xff] }
 0x1a5   : > { %v2165_v43 = vadd.f32 %v7894_v52, %v1904_v6  ;;  %4310 = vst.msk [vmem:[%s5220_s25 + $0x1f9] sm:$0x7f] %vm1593_vm5, %v1588_v42  ;;  %v1767_v1 = vmax.f32 %v1588_v42, 0.0  ;;  %v6185_v39 = vadd.f32 %v3497_v62, %v3347_v0  ;;  %v2496_v12 = vmul.f32 %v6191_v63, %v5926_v49 }
 0x1a6   : > { %v3720_v15 = vrot.slane %v3623_v60, 6  ;;  %v7895_v42 = vrot.slane %v5215_v24, 4  ;;  %v6203_v62 = vmul.f32 %v6076_v58, %v1836_v5  ;;  %v2907_v52 = vrot.slane %v2810_v2, 4 }
 0x1a7   : > { %1816 = vst.msk [vmem:[#allocation3 + $0x231] sm:$0x7f] %vm1593_vm5, %v1767_v1  ;;  %v7872_v6 = vrot.slane %v6185_v39, 6  ;;  %v3401_v27 = vmul.f32 %v6128_v31, %v1836_v5  ;;  %v637_v20 = vmul.f32 0.999995, %v598_v10  ;;  %v1120_v2 = vsel %vm1042_vm2, %v6044_v54, %v1119_v32 }
 0x1a8   : > { %v2317_v0 = vsel %vm2312_vm4, %v7895_v42, %v2316_v26  ;;  %v3087_v26 = vmul.f32 %v6097_v11, %v6100_v22  ;;  %v1023_v42 = vmax.f32 %v6032_v57, %v6026_v33  ;;  %v2908_v5 = vsel %vm2312_vm4, %v2905_v13, %v2907_v52 }
 0x1a9   : > { %v2443_v60 = vadd.f32 %v2317_v0, %v2165_v43  ;;  %v3722_v1 = vsel %vm3719_vm7, %v3720_v15, %v7872_v6  ;;  %v3498_v10 = vrot.slane %v3401_v27, 4  ;;  %670 = vst.msk [vmem:[%s5220_s25 + $0xf0] sm:$0xff] %vm639_vm1, %v637_v20  ;;  %775 = vst.msk [vmem:[#allocation2 + $0x208] sm:$0xff] %vm639_vm1, %v637_v20  ;;  %v841_v15 = vld [vmem:[#allocation2 + $0x200] sm:$0xff]  ;;  %v1318_v16 = vmax.f32 %v1262_v17, %v6036_v44  ;;  %v6303_v6 = vld [vmem:[#allocation3 + $0x68] sm:$0xff] }
 0x1aa   : > { %4511 = vmatprep.mubr.msk.f32.mxu1 %vm639_vm1, %v3722_v1  ;;  %v1216_v0 = vmax.f32 %v1023_v42, %v6044_v54  ;;  %v7871_v13 = vrot.slane %v6206_v56, 1  ;;  %v1217_v45 = vmax.f32 %v1024_v21, %v1120_v2  ;;  %v7870_v32 = vrot.slane %v6206_v56, 2 }
 0x1ab   : > { %v2544_v43 = vadd.f32 %v2496_v12, %v2443_v60  ;;  %v1261_v12 = vmax.f32 %v6015_v59, %v6032_v57  ;;  %v1533_v59 = vmax.f32 %v1476_v34, %v1120_v2  ;;  %v1821_v57 = vld [vmem:[#allocation3 + $0x20] sm:$0xff]  ;;  %v3499_v27 = vsel %vm2312_vm4, %v3496_v48, %v3498_v10  ;;  %v6262_v34 = vld [vmem:[#allocation3 + $0xa8] sm:$0xff] }
 0x1ac   : > { %v1264_v4 = vmax.f32 %v1216_v0, %v841_v15  ;;  %v1375_v60 = vmax.f32 %v1318_v16, %v1120_v2  ;;  %v6253_v55 = vsel %vm881_vm3, %v7871_v13, %v1431_v23  ;;  %v7896_v44 = vrot.slane %v5489_v38, 2 }
 0x1ad   : > { %v2757_v20 = vadd.f32 %v2660_v35, %v2544_v43  ;;  %v1317_v17 = vmax.f32 %v1261_v12, %v6026_v33  ;;  %v6246_v35 = vld [vmem:[#allocation3 + $0x30] sm:$0xff]  ;;  %v1581_v33 = vmul.f32 0.999995, %v1533_v59  ;;  %v1905_v1 = vmul.f32 %v6169_v61, %v1821_v57 }
 0x1ae   : > { %v6260_v21 = vsel %vm1042_vm2, %v7870_v32, %v7896_v44  ;;  %v1906_v42 = vmul.f32 %v6169_v61, %v1822_v29  ;;  %v6268_v23 = vmul.f32 %v6169_v61, %v1829_v28  ;;  %v2005_v10 = vmul.f32 %v5899_v51, %v1822_v29 }
 0x1af   : > { %v3034_v52 = vadd.f32 %v2908_v5, %v2757_v20  ;;  %v1374_v48 = vmax.f32 %v1317_v17, %v6044_v54  ;;  %4303 = vst.msk [vmem:[%s5220_s25 + $0x1d1] sm:$0xff] %vm639_vm1, %v1581_v33  ;;  %v1760_v38 = vmax.f32 %v1581_v33, 0.0  ;;  %v6272_v5 = vld [vmem:[#allocation3 + $0xa0] sm:$0xff]  ;;  %v6277_v2 = vmul.f32 %v5899_v51, %v6246_v35 }
 0x1b0   : > { %v842_v54 = vld [vmem:[#allocation2 + $0x208] sm:$0xff]  ;;  %v1917_v12 = vmul.f32 %v6169_v61, %v6272_v5  ;;  %v6283_v16 = vmul.f32 %v5899_v51, %v6262_v34  ;;  %v7897_v20 = vrot.slane %v6141_v40, 2  ;;  %v2070_v33 = vrot.slane %v2005_v10, 2 }
 0x1b1   : > { %v3135_v43 = vadd.f32 %v3087_v26, %v3034_v52  ;;  %v1422_v0 = vmax.f32 %v1374_v48, %v841_v15  ;;  %v2219_v26 = vmul.f32 %v5909_v36, %v1822_v29  ;;  %v1265_v57 = vmax.f32 %v1217_v45, %v842_v54  ;;  %1809 = vst.msk [vmem:[#allocation3 + $0x1e9] sm:$0xff] %vm639_vm1, %v1760_v38  ;;  %v845_v45 = vld [vmem:[#allocation2 + $0x220] sm:$0xff] }
 0x1b2   : > { %v1269_v17 = vrot.slane %v842_v54, 1  ;;  %v1324_v52 = vrot.slane %v842_v54, 2  ;;  %v1423_v44 = vmax.f32 %v1375_v60, %v842_v54  ;;  %v2071_v15 = vrot.slane %v6277_v2, 2 }
 0x1b3   : > { %v3348_v59 = vadd.f32 %v7897_v20, %v3135_v43  ;;  %v6292_v48 = vmul.f32 %v5909_v36, %v6246_v35  ;;  %v7898_v10 = vrot.slane %v6040_v7, 2 }
 0x1b4   : > { %v1271_v29 = vsel %vm881_vm3, %v1269_v17, %v6061_v18  ;;  %v1320_v24 = vmax.f32 %v1264_v4, %v1269_v17  ;;  %v1478_v20 = vmax.f32 %v1422_v0, %v1269_v17  ;;  %v2072_v60 = vsel %vm1042_vm2, %v2070_v33, %v2071_v15 }
 0x1b5   : > { %v3625_v47 = vadd.f32 %v3499_v27, %v3348_v59  ;;  %v1321_v43 = vmax.f32 %v1265_v57, %v1271_v29  ;;  %v1479_v32 = vmax.f32 %v1423_v44, %v1271_v29  ;;  %v1326_v54 = vsel %vm1042_vm2, %v1324_v52, %v7898_v10 }
 0x1b6   : > { %v1377_v27 = vmax.f32 %v1320_v24, %v1324_v52  ;;  %v2166_v59 = vadd.f32 %v2070_v33, %v1905_v1  ;;  %v1535_v18 = vmax.f32 %v1478_v20, %v1324_v52  ;;  %v2167_v40 = vadd.f32 %v2072_v60, %v1906_v42 }
 0x1b7   : > { %v3723_v38 = vrot.slane %v3625_v47, 6  ;;  %v1378_v13 = vmax.f32 %v1321_v43, %v1326_v54  ;;  %v1536_v4 = vmax.f32 %v1479_v32, %v1326_v54  ;;  %v7899_v0 = vrot.slane %v6185_v39, 6  ;;  %v6314_v39 = vld [vmem:[#allocation3 + $0x70] sm:$0xff] }
 0x1b8   : > { %v1425_v17 = vmax.f32 %v1377_v27, %v845_v45  ;;  %v2318_v47 = vrot.slane %v2219_v26, 4  ;;  %v2319_v7 = vrot.slane %v6292_v48, 4  ;;  %v1583_v1 = vmul.f32 0.999995, %v1535_v18  ;;  %v6343_v18 = vld [vmem:[#allocation3 + $0xb0] sm:$0xff] }
 0x1b9   : > { %v3724_v57 = vsel %vm3719_vm7, %v7899_v0, %v3723_v38  ;;  %v1426_v24 = vmax.f32 %v1378_v13, %v6206_v56  ;;  %v1584_v52 = vmul.f32 0.999995, %v1536_v4  ;;  %v2497_v32 = vmul.f32 %v6191_v63, %v1829_v28 }
 0x1ba   : > { %4512 = vmatmul.mubr.msk.f32.vlgmr.msra.gmra.mxu1 %vm639_vm1, %v3724_v57  ;;  %v7900_v42 = vrot.slane %v6206_v56, 1  ;;  %v2320_v33 = vsel %vm2312_vm4, %v2318_v47, %v2319_v7  ;;  %v2444_v26 = vadd.f32 %v2318_v47, %v2166_v59  ;;  %v2498_v29 = vmul.f32 %v6191_v63, %v6303_v6  ;;  %4305 = vst.msk [vmem:[%s5220_s25 + $0x1d9] sm:$0x80] %vm1590_vm6, %v1583_v1 }
 0x1bb   : > { %v1482_v45 = vmax.f32 %v1426_v24, %v6253_v55  ;;  %4306 = vst.msk [vmem:[%s5220_s25 + $0x1e1] sm:$0xff] %vm639_vm1, %v1584_v52  ;;  %v1762_v13 = vmax.f32 %v1583_v1, 0.0  ;;  %v1763_v28 = vmax.f32 %v1584_v52, 0.0  ;;  %v2445_v43 = vadd.f32 %v2320_v33, %v2167_v40 }
 0x1bc   : > { %v1481_v44 = vmax.f32 %v1425_v17, %v7900_v42  ;;  %v7901_v20 = vrot.slane %v6206_v56, 2  ;;  %v7902_v38 = vrot.slane %v6283_v16, 2  ;;  %v2545_v54 = vadd.f32 %v2497_v32, %v2444_v26 }
 0x1bd   : > { %v2597_v27 = vmul.f32 %v5862_v9, %v6303_v6  ;;  %v1539_v55 = vmax.f32 %v1482_v45, %v6260_v21  ;;  %1811 = vst.msk [vmem:[#allocation3 + $0x201] sm:$0x80] %vm1590_vm6, %v1762_v13  ;;  %v2546_v59 = vadd.f32 %v2498_v29, %v2445_v43  ;;  %v6339_v56 = vmul.f32 %v5862_v9, %v6314_v39  ;;  %v1824_v45 = vld [vmem:[#allocation3 + $0x38] sm:$0xff] }
 0x1be   : > { %v1538_v60 = vmax.f32 %v1481_v44, %v7901_v20  ;;  %v6330_v10 = vadd.f32 %v7902_v38, %v1917_v12  ;;  %1812 = vst.msk [vmem:[#allocation3 + $0x209] sm:$0xff] %vm639_vm1, %v1763_v28  ;;  %v2811_v12 = vmul.f32 %v6076_v58, %v6303_v6  ;;  %v2812_v21 = vmul.f32 %v6076_v58, %v6314_v39  ;;  %v1832_v13 = vld [vmem:[#allocation3 + $0x78] sm:$0xff] }
 0x1bf   : > { %v2662_v4 = vrot.slane %v2597_v27, 2  ;;  %v3088_v0 = vmul.f32 %v6097_v11, %v6272_v5  ;;  %v1587_v57 = vmul.f32 0.999995, %v1539_v55  ;;  %v2663_v17 = vrot.slane %v6339_v56, 2  ;;  %v1840_v38 = vld [vmem:[#allocation3 + $0xb8] sm:$0xff] }
 0x1c0   : > { %v1586_v40 = vmul.f32 0.999995, %v1538_v60  ;;  %v2909_v47 = vrot.slane %v2811_v12, 4  ;;  %v3089_v24 = vmul.f32 %v6097_v11, %v6262_v34  ;;  %v2910_v32 = vrot.slane %v2812_v21, 4 }
 0x1c1   : > { %v2758_v52 = vadd.f32 %v2662_v4, %v2545_v54  ;;  %v3188_v42 = vmul.f32 %v6118_v46, %v6262_v34  ;;  %4309 = vst.msk [vmem:[%s5220_s25 + $0x1f1] sm:$0xff] %vm639_vm1, %v1587_v57  ;;  %v1766_v44 = vmax.f32 %v1587_v57, 0.0  ;;  %v2664_v33 = vsel %vm1042_vm2, %v2662_v4, %v2663_v17 }
 0x1c2   : > { %4308 = vst.msk [vmem:[%s5220_s25 + $0x1e9] sm:$0x80] %vm1590_vm6, %v1586_v40  ;;  %v1765_v1 = vmax.f32 %v1586_v40, 0.0  ;;  %v6363_v26 = vmul.f32 %v6118_v46, %v6343_v18  ;;  %v3402_v29 = vmul.f32 %v6128_v31, %v6262_v34  ;;  %v2759_v28 = vadd.f32 %v2664_v33, %v2546_v59 }
 0x1c3   : > { %v2911_v43 = vsel %vm2312_vm4, %v2909_v47, %v2910_v32  ;;  %v3035_v20 = vadd.f32 %v2909_v47, %v2758_v52  ;;  %v3253_v60 = vrot.slane %v3188_v42, 2  ;;  %1815 = vst.msk [vmem:[#allocation3 + $0x229] sm:$0xff] %vm639_vm1, %v1766_v44  ;;  %v3403_v27 = vmul.f32 %v6128_v31, %v6343_v18 }
 0x1c4   : > { %1814 = vst.msk [vmem:[#allocation3 + $0x221] sm:$0x80] %vm1590_vm6, %v1765_v1  ;;  %v3254_v54 = vrot.slane %v6363_v26, 2  ;;  %v3500_v55 = vrot.slane %v3402_v29, 4  ;;  %v1907_v12 = vmul.f32 %v6169_v61, %v6246_v35  ;;  %v3036_v40 = vadd.f32 %v2911_v43, %v2759_v28 }
 0x1c5   : > { %v3136_v4 = vadd.f32 %v3088_v0, %v3035_v20  ;;  %v2221_v59 = vmul.f32 %v5909_v36, %v1824_v45  ;;  %v6377_v21 = vmul.f32 %v5909_v36, %v1832_v13  ;;  %v3501_v47 = vrot.slane %v3403_v27, 4 }
 0x1c6   : > { %v3255_v57 = vsel %vm1042_vm2, %v3253_v60, %v3254_v54  ;;  %v2168_v1 = vadd.f32 %v2071_v15, %v1907_v12  ;;  %v6385_v52 = vmul.f32 %v5909_v36, %v1840_v38  ;;  %v6389_v35 = vmul.f32 %v6191_v63, %v6272_v5  ;;  %v6404_v12 = vld [vmem:[#allocation3 + $0xc8] sm:$0xff] }
 0x1c7   : > { %v3137_v0 = vadd.f32 %v3089_v24, %v3036_v40  ;;  %v3349_v42 = vadd.f32 %v3253_v60, %v3136_v4  ;;  %v2321_v44 = vrot.slane %v2221_v59, 4  ;;  %v3502_v33 = vsel %vm2312_vm4, %v3500_v55, %v3501_v47 }
 0x1c8   : > { %v2331_v29 = vrot.slane %v6377_v21, 4  ;;  %v2499_v45 = vmul.f32 %v6191_v63, %v6314_v39  ;;  %v2813_v2 = vmul.f32 %v6076_v58, %v1832_v13  ;;  %v6400_v5 = vmul.f32 %v6076_v58, %v1840_v38 }
 0x1c9   : > { %v3350_v15 = vadd.f32 %v3255_v57, %v3137_v0  ;;  %v3626_v28 = vadd.f32 %v3500_v55, %v3349_v42  ;;  %v2322_v43 = vsel %vm2312_vm4, %v2319_v7, %v2321_v44  ;;  %v3404_v27 = vmul.f32 %v6128_v31, %v1840_v38  ;;  %v1841_v7 = vld [vmem:[#allocation3 + $0xc0] sm:$0xff] }
 0x1ca   : > { %v2446_v20 = vadd.f32 %v2322_v43, %v2168_v1  ;;  %v2912_v60 = vrot.slane %v2813_v2, 4  ;;  %v3090_v48 = vmul.f32 %v6097_v11, %v6343_v18  ;;  %v1920_v1 = vmul.f32 %v6169_v61, %v1841_v7 }
 0x1cb   : > { %v6406_v40 = vadd.f32 %v3502_v33, %v3350_v15  ;;  %v3725_v13 = vrot.slane %v3626_v28, 6  ;;  %v3503_v57 = vrot.slane %v3404_v27, 4  ;;  %v2008_v38 = vmul.f32 %v5899_v51, %v5926_v49 }
 0x1cc   : > { %v2547_v4 = vadd.f32 %v2499_v45, %v2446_v20  ;;  %v2913_v59 = vsel %vm2312_vm4, %v2910_v32, %v2912_v60  ;;  %v6418_v42 = vmul.f32 %v5899_v51, %v6404_v12  ;;  %v2223_v44 = vmul.f32 %v5909_v36, %v5926_v49 }
 0x1cd   : > { %v3726_v0 = vrot.slane %v6406_v40, 6  ;;  %v3504_v32 = vsel %vm2312_vm4, %v3501_v47, %v3503_v57  ;;  %v1909_v45 = vmul.f32 %v6169_v61, %v6107_v8  ;;  %v2501_v2 = vmul.f32 %v6191_v63, %v5870_v41 }
 0x1ce   : > { %v2760_v33 = vadd.f32 %v2663_v17, %v2547_v4  ;;  %v2074_v28 = vrot.slane %v2008_v38, 2  ;;  %v7873_v43 = vrot.slane %v6418_v42, 2  ;;  %v2324_v20 = vrot.slane %v2223_v44, 4 }
 0x1cf   : > { %v3727_v15 = vsel %vm3719_vm7, %v3725_v13, %v3726_v0  ;;  %v2599_v56 = vmul.f32 %v5862_v9, %v5870_v41  ;;  %v6436_v17 = vmul.f32 %v5862_v9, %v6100_v22  ;;  %v2814_v8 = vmul.f32 %v6076_v58, %v5870_v41  ;;  %v6452_v9 = vld [vmem:[#allocation3 + $0xd0] sm:$0xff] }
 0x1d0   : > { %4514 = vmatprep.mubr.msk.f32.mxu1 %vm639_vm1, %v3727_v15  ;;  %v3037_v60 = vadd.f32 %v2913_v59, %v2760_v33  ;;  %v7903_v47 = vrot.slane %v5493_v50, 2  ;;  %v6445_v40 = vadd.f32 %v7873_v43, %v1920_v1  ;;  %v6448_v13 = vmul.f32 %v6191_v63, %v1841_v7 }
 0x1d1   : > { %v2815_v4 = vmul.f32 %v6076_v58, %v6100_v22  ;;  %v2665_v38 = vrot.slane %v2599_v56, 2  ;;  %v2666_v41 = vrot.slane %v6436_v17, 2  ;;  %v7904_v50 = vrot.slane %v5504_v3, 4 }
 0x1d2   : > { %v2075_v27 = vsel %vm1042_vm2, %v7903_v47, %v2074_v28  ;;  %v3138_v59 = vadd.f32 %v3090_v48, %v3037_v60  ;;  %v2914_v33 = vrot.slane %v2814_v8, 4  ;;  %v3091_v15 = vmul.f32 %v6097_v11, %v1841_v7  ;;  %v1844_v8 = vld [vmem:[#allocation3 + $0xd8] sm:$0xff] }
 0x1d3   : > { %v2170_v57 = vadd.f32 %v2075_v27, %v1909_v45  ;;  %v2325_v44 = vsel %vm2312_vm4, %v7904_v50, %v2324_v20  ;;  %v2915_v1 = vrot.slane %v2815_v4, 4  ;;  %v2761_v48 = vadd.f32 %v2665_v38, %v6158_v53 }
 0x1d4   : > { %v3351_v47 = vadd.f32 %v3254_v54, %v3138_v59  ;;  %v3092_v45 = vmul.f32 %v6097_v11, %v6404_v12  ;;  %v2667_v60 = vsel %vm1042_vm2, %v2665_v38, %v2666_v41  ;;  %v3190_v3 = vmul.f32 %v6118_v46, %v6404_v12 }
 0x1d5   : > { %v2448_v43 = vadd.f32 %v2325_v44, %v2170_v57  ;;  %v6469_v56 = vmul.f32 %v6118_v46, %v6452_v9  ;;  %v3405_v7 = vmul.f32 %v6128_v31, %v6404_v12  ;;  %v3038_v17 = vadd.f32 %v2914_v33, %v2761_v48 }
 0x1d6   : > { %v3628_v26 = vadd.f32 %v3504_v32, %v3351_v47  ;;  %v3406_v53 = vmul.f32 %v6128_v31, %v6452_v9  ;;  %v3256_v27 = vrot.slane %v3190_v3, 2  ;;  %v1910_v57 = vmul.f32 %v6169_v61, %v5926_v49 }
 0x1d7   : > { %v2549_v54 = vadd.f32 %v2501_v2, %v2448_v43  ;;  %v3257_v4 = vrot.slane %v6469_v56, 2  ;;  %v3505_v59 = vrot.slane %v3405_v7, 4  ;;  %v3139_v44 = vadd.f32 %v3091_v15, %v3038_v17 }
 0x1d8   : > { %v3728_v38 = vrot.slane %v3628_v26, 6  ;;  %v3506_v24 = vrot.slane %v3406_v53, 4  ;;  %v2916_v55 = vsel %vm2312_vm4, %v2914_v33, %v2915_v1  ;;  %v2171_v32 = vadd.f32 %v2074_v28, %v1910_v57  ;;  %v6498_v26 = vld [vmem:[#allocation3 + $0xe8] sm:$0xff]  ;;  %v6504_v57 = vld [vmem:[#allocation3 + $0xe0] sm:$0xff] }
 0x1d9   : > { %v2762_v50 = vadd.f32 %v2667_v60, %v2549_v54  ;;  %v6480_v2 = vmul.f32 %v5909_v36, %v1844_v8  ;;  %v7905_v43 = vrot.slane %v6174_v19, 4  ;;  %v3258_v56 = vsel %vm1042_vm2, %v3256_v27, %v3257_v4 }
 0x1da   : > { %v3729_v48 = vsel %vm3719_vm7, %v3726_v0, %v3728_v38  ;;  %v3352_v49 = vadd.f32 %v3256_v27, %v3139_v44  ;;  %v3507_v15 = vsel %vm2312_vm4, %v3505_v59, %v3506_v24  ;;  %v2502_v28 = vmul.f32 %v6191_v63, %v6100_v22 }
 0x1db   : > { %v2327_v47 = vsel %vm2312_vm4, %v2324_v20, %v7905_v43  ;;  %v3039_v3 = vadd.f32 %v2916_v55, %v2762_v50  ;;  %4515 = vmatmul.mubr.msk.f32.gmra.mxu1 %vm639_vm1, %v3729_v48  ;;  %v6492_v33 = vmul.f32 %v6076_v58, %v1844_v8  ;;  %v7906_v55 = vrot.slane %v6203_v62, 4 }
 0x1dc   : > { %v2449_v60 = vadd.f32 %v2327_v47, %v2171_v32  ;;  %v3629_v7 = vadd.f32 %v3505_v59, %v3352_v49  ;;  %v3093_v53 = vmul.f32 %v6097_v11, %v6452_v9  ;;  %v3407_v27 = vmul.f32 %v6128_v31, %v1844_v8 }
 0x1dd   : > { %v3140_v19 = vadd.f32 %v3092_v45, %v3039_v3  ;;  %v2918_v0 = vsel %vm2312_vm4, %v2915_v1, %v7906_v55  ;;  %v2927_v17 = vrot.slane %v6492_v33, 4  ;;  %v1923_v38 = vmul.f32 %v6169_v61, %v6504_v57 }
 0x1de   : > { %v2550_v54 = vadd.f32 %v2502_v28, %v2449_v60  ;;  %v3730_v59 = vrot.slane %v3629_v7, 6  ;;  %v2009_v62 = vmul.f32 %v5899_v51, %v6303_v6  ;;  %v3508_v50 = vrot.slane %v3407_v27, 4 }
 0x1df   : > { %v3353_v45 = vadd.f32 %v3258_v56, %v3140_v19  ;;  %v6512_v44 = vmul.f32 %v5899_v51, %v6314_v39  ;;  %v6516_v32 = vmul.f32 %v5899_v51, %v6498_v26  ;;  %v2225_v47 = vmul.f32 %v5909_v36, %v6303_v6 }
 0x1e0   : > { %v2763_v1 = vadd.f32 %v2666_v41, %v2550_v54  ;;  %v2076_v43 = vrot.slane %v2009_v62, 2  ;;  %v2226_v48 = vmul.f32 %v5909_v36, %v6314_v39  ;;  %v1912_v41 = vmul.f32 %v6169_v61, %v6303_v6 }
 0x1e1   : > { %v3630_v8 = vadd.f32 %v3507_v15, %v3353_v45  ;;  %v2077_v56 = vrot.slane %v6512_v44, 2  ;;  %v7874_v49 = vrot.slane %v6516_v32, 2  ;;  %v2328_v28 = vrot.slane %v2225_v47, 4  ;;  %v6554_v44 = vld [vmem:[#allocation3 + $0xf0] sm:$0xff] }
 0x1e2   : > { %v3040_v3 = vadd.f32 %v2918_v0, %v2763_v1  ;;  %v2172_v51 = vadd.f32 %v2076_v43, %v6268_v23  ;;  %v2329_v15 = vrot.slane %v2226_v48, 4  ;;  %v3509_v7 = vsel %vm2312_vm4, %v3506_v24, %v3508_v50  ;;  %v6541_v24 = vld [vmem:[%s7857_s2 + $0x4] ss:$0 sm:$0xff] }
 0x1e3   : > { %v3731_v60 = vrot.slane %v3630_v8, 6  ;;  %v2078_v55 = vsel %vm1042_vm2, %v2076_v43, %v2077_v56  ;;  %v6531_v36 = vadd.f32 %v7874_v49, %v1923_v38  ;;  %v2504_v27 = vmul.f32 %v6191_v63, %v6262_v34 }
 0x1e4   : > { %v3141_v19 = vadd.f32 %v3093_v53, %v3040_v3  ;;  %v2173_v0 = vadd.f32 %v2078_v55, %v1912_v41  ;;  %v2450_v54 = vadd.f32 %v2328_v28, %v2172_v51  ;;  %v2330_v53 = vsel %vm2312_vm4, %v2328_v28, %v2329_v15 }
 0x1e5   : > { %v3732_v6 = vsel %vm3719_vm7, %v3730_v59, %v3731_v60  ;;  %v2601_v45 = vmul.f32 %v6541_v24, %v6262_v34  ;;  %v6547_v59 = vmul.f32 %v6541_v24, %v6343_v18  ;;  %v2818_v1 = vmul.f32 %v6076_v58, %v6343_v18 }
 0x1e6   : > { %4517 = vmatprep.mubr.msk.f32.mxu1 %vm639_vm1, %v3732_v6  ;;  %v3354_v23 = vadd.f32 %v3257_v4, %v3141_v19  ;;  %v2451_v38 = vadd.f32 %v2330_v53, %v2173_v0  ;;  %v2551_v62 = vadd.f32 %v6389_v35, %v2450_v54  ;;  %v2817_v4 = vmul.f32 %v6076_v58, %v6262_v34 }
 0x1e7   : > { %v2668_v8 = vrot.slane %v2601_v45, 2  ;;  %v2669_v43 = vrot.slane %v6547_v59, 2  ;;  %v3094_v47 = vmul.f32 %v6097_v11, %v6504_v57  ;;  %v2920_v41 = vrot.slane %v2818_v1, 4 }
 0x1e8   : > { %v3631_v50 = vadd.f32 %v3509_v7, %v3354_v23  ;;  %v2552_v48 = vadd.f32 %v2504_v27, %v2451_v38  ;;  %v2919_v3 = vrot.slane %v2817_v4, 4  ;;  %v3095_v35 = vmul.f32 %v6097_v11, %v6498_v26  ;;  %v1848_v27 = vld [vmem:[#allocation3 + $0xf8] sm:$0xff] }
 0x1e9   : > { %v2670_v28 = vsel %vm1042_vm2, %v2668_v8, %v2669_v43  ;;  %v2764_v19 = vadd.f32 %v2668_v8, %v2551_v62  ;;  %v3192_v7 = vmul.f32 %v6118_v46, %v6498_v26  ;;  %v6567_v0 = vmul.f32 %v6118_v46, %v6554_v44 }
 0x1ea   : > { %v3733_v51 = vrot.slane %v3631_v50, 6  ;;  %v2765_v55 = vadd.f32 %v2670_v28, %v2552_v48  ;;  %v2921_v6 = vsel %vm2312_vm4, %v2919_v3, %v2920_v41  ;;  %v3408_v54 = vmul.f32 %v6128_v31, %v6498_v26 }
 0x1eb   : > { %v3041_v53 = vadd.f32 %v2919_v3, %v2764_v19  ;;  %v3259_v45 = vrot.slane %v3192_v7, 2  ;;  %v3409_v59 = vmul.f32 %v6128_v31, %v6554_v44  ;;  %v3260_v62 = vrot.slane %v6567_v0, 2  ;;  %v6604_v0 = vld [vmem:[#allocation3 + $0x108] sm:$0xff] }
 0x1ec   : > { %v3734_v23 = vsel %vm3719_vm7, %v3731_v60, %v3733_v51  ;;  %v3042_v38 = vadd.f32 %v2921_v6, %v2765_v55  ;;  %v3510_v4 = vrot.slane %v3408_v54, 4  ;;  %v1913_v1 = vmul.f32 %v6169_v61, %v6314_v39  ;;  %v6581_v60 = vld [vmem:[%s7857_s2 + $0x2] ss:$0 sm:$0xff] }
 0x1ed   : > { %4518 = vmatmul.mubr.msk.f32.gmra.mxu1 %vm639_vm1, %v3734_v23  ;;  %v3142_v50 = vadd.f32 %v3094_v47, %v3041_v53  ;;  %v3511_v8 = vrot.slane %v3409_v59, 4  ;;  %v6584_v48 = vmul.f32 %v6581_v60, %v1848_v27  ;;  %v2332_v3 = vsel %vm2312_vm4, %v2329_v15, %v2331_v29 }
 0x1ee   : > { %v3143_v51 = vadd.f32 %v3095_v35, %v3042_v38  ;;  %v3261_v28 = vsel %vm1042_vm2, %v3259_v45, %v3260_v62  ;;  %v2174_v19 = vadd.f32 %v2077_v56, %v1913_v1  ;;  %v2505_v39 = vmul.f32 %v6191_v63, %v6343_v18  ;;  %v4613_v38 = vld [vmem:[#allocation3 + $0x88] sm:$0xff] }
 0x1ef   : > { %v6594_v47 = vmul.f32 %v6191_v63, %v6504_v57  ;;  %v3355_v7 = vadd.f32 %v3259_v45, %v3142_v50  ;;  %v3512_v55 = vsel %vm2312_vm4, %v3510_v4, %v3511_v8  ;;  %v6598_v6 = vmul.f32 %v6076_v58, %v1848_v27 }
 0x1f0   : > { %v3356_v21 = vadd.f32 %v3261_v28, %v3143_v51  ;;  %v2452_v15 = vadd.f32 %v2332_v3, %v2174_v19  ;;  %v7907_v35 = vrot.slane %v6400_v5, 4  ;;  %v3096_v23 = vmul.f32 %v6097_v11, %v6554_v44  ;;  %v6616_v5 = vld [vmem:[%s7857_s2 + $0x1] ss:$0 sm:$0xff] }
 0x1f1   : > { %v3632_v54 = vadd.f32 %v3510_v4, %v3355_v7  ;;  %v3410_v53 = vmul.f32 %v6128_v31, %v1848_v27  ;;  %v1915_v1 = vmul.f32 %v4613_v38, %v6169_v61  ;;  %v1849_v3 = vld [vmem:[#allocation3 + $0x100] sm:$0xff]  ;;  %v6622_v27 = vmul.f32 %v6616_v5, %v6604_v0 }
 0x1f2   : > { %v2923_v56 = vsel %vm2312_vm4, %v2920_v41, %v7907_v35  ;;  %v6610_v45 = vadd.f32 %v3512_v55, %v3356_v21  ;;  %v2553_v59 = vadd.f32 %v2505_v39, %v2452_v15  ;;  %v2012_v41 = vmul.f32 %v6616_v5, %v6100_v22 }
 0x1f3   : > { %v3735_v4 = vrot.slane %v3632_v54, 6  ;;  %v3513_v50 = vrot.slane %v3410_v53, 4  ;;  %v2229_v51 = vmul.f32 %v6581_v60, %v6100_v22  ;;  %v1926_v39 = vmul.f32 %v6169_v61, %v1849_v3 }
 0x1f4   : > { %v3736_v28 = vrot.slane %v6610_v45, 6  ;;  %v2766_v19 = vadd.f32 %v2669_v43, %v2553_v59  ;;  %v2080_v7 = vrot.slane %v2012_v41, 2  ;;  %v7875_v21 = vrot.slane %v6622_v27, 2 }
 0x1f5   : > { %v3514_v55 = vsel %vm2312_vm4, %v3511_v8, %v3513_v50  ;;  %v2334_v15 = vrot.slane %v2229_v51, 4  ;;  %v2507_v35 = vmul.f32 %v6191_v63, %v6404_v12  ;;  %v7908_v38 = vrot.slane %v5903_v37, 2  ;;  %v6647_v37 = vld [vmem:[#allocation3 + $0x110] sm:$0xff] }
 0x1f6   : > { %v3737_v54 = vsel %vm3719_vm7, %v3735_v4, %v3736_v28  ;;  %v3043_v53 = vadd.f32 %v2923_v56, %v2766_v19  ;;  %v6637_v43 = vmul.f32 %v6191_v63, %v1849_v3  ;;  %v7909_v8 = vrot.slane %v5913_v30, 4 }
 0x1f7   : > { %v2081_v29 = vsel %vm1042_vm2, %v7908_v38, %v2080_v7  ;;  %4520 = vmatprep.mubr.msk.f32.mxu1 %vm639_vm1, %v3737_v54  ;;  %v2554_v41 = vadd.f32 %v6448_v13, %v6087_v14  ;;  %v2603_v56 = vmul.f32 %v6541_v24, %v6404_v12  ;;  %v2604_v50 = vmul.f32 %v6541_v24, %v6452_v9 }
 0x1f8   : > { %v2176_v45 = vadd.f32 %v2081_v29, %v1915_v1  ;;  %v2335_v59 = vsel %vm2312_vm4, %v7909_v8, %v2334_v15  ;;  %v3144_v4 = vadd.f32 %v3096_v23, %v3043_v53  ;;  %v2820_v51 = vmul.f32 %v6076_v58, %v6404_v12 }
 0x1f9   : > { %v2821_v30 = vmul.f32 %v6076_v58, %v6452_v9  ;;  %v2671_v1 = vrot.slane %v2603_v56, 2  ;;  %v3097_v19 = vmul.f32 %v6097_v11, %v1849_v3  ;;  %v3098_v14 = vmul.f32 %v6097_v11, %v6604_v0  ;;  %v1852_v56 = vld [vmem:[#allocation3 + $0x118] sm:$0xff] }
 0x1fa   : > { %v2454_v29 = vadd.f32 %v2335_v59, %v2176_v45  ;;  %v3357_v13 = vadd.f32 %v3260_v62, %v3144_v4  ;;  %v2672_v23 = vrot.slane %v2604_v50, 2  ;;  %v2924_v54 = vrot.slane %v2820_v51, 4 }
 0x1fb   : > { %v2925_v53 = vrot.slane %v2821_v30, 4  ;;  %v2767_v8 = vadd.f32 %v2671_v1, %v2554_v41  ;;  %v3194_v49 = vmul.f32 %v6118_v46, %v6604_v0  ;;  %v6662_v20 = vmul.f32 %v6118_v46, %v6647_v37 }
 0x1fc   : > { %v2555_v38 = vadd.f32 %v2507_v35, %v2454_v29  ;;  %v3634_v45 = vadd.f32 %v3514_v55, %v3357_v13  ;;  %v2673_v59 = vsel %vm1042_vm2, %v2671_v1, %v2672_v23  ;;  %v3411_v62 = vmul.f32 %v6128_v31, %v6604_v0 }
 0x1fd   : > { %v2926_v3 = vsel %vm2312_vm4, %v2924_v54, %v2925_v53  ;;  %v3044_v50 = vadd.f32 %v2924_v54, %v2767_v8  ;;  %v3262_v35 = vrot.slane %v3194_v49, 2  ;;  %v3263_v41 = vrot.slane %v6662_v20, 2 }
 0x1fe   : > { %v2768_v4 = vadd.f32 %v2673_v59, %v2555_v38  ;;  %v3738_v51 = vrot.slane %v3634_v45, 6  ;;  %v3412_v30 = vmul.f32 %v6128_v31, %v6647_v37  ;;  %v3515_v46 = vrot.slane %v3411_v62, 4 }
 0x1ff   : > { %v1916_v55 = vmul.f32 %v6169_v61, %v6100_v22  ;;  %v3145_v1 = vadd.f32 %v3097_v19, %v3044_v50  ;;  %v3264_v13 = vsel %vm1042_vm2, %v3262_v35, %v3263_v41  ;;  %v6675_v57 = vmul.f32 %v6581_v60, %v1852_v56 }
 0x200   : > { %v3045_v29 = vadd.f32 %v2926_v3, %v2768_v4  ;;  %v3739_v54 = vsel %vm3719_vm7, %v3736_v28, %v3738_v51  ;;  %v3516_v49 = vrot.slane %v3412_v30, 4  ;;  %v7910_v20 = vrot.slane %v6181_v25, 4  ;;  %v6697_v4 = vld [vmem:[#allocation3 + $0x128] sm:$0xff] }
 0x201   : > { %v2177_v38 = vadd.f32 %v2080_v7, %v1916_v55  ;;  %4521 = vmatmul.mubr.msk.f32.gmra.mxu1 %vm639_vm1, %v3739_v54  ;;  %v6684_v22 = vadd.f32 %v7875_v21, %v1926_v39  ;;  %v3358_v45 = vadd.f32 %v3262_v35, %v3145_v1  ;;  %v2508_v59 = vmul.f32 %v6191_v63, %v6452_v9 }
 0x202   : > { %v2337_v8 = vsel %vm2312_vm4, %v2334_v15, %v7910_v20  ;;  %v3146_v19 = vadd.f32 %v3098_v14, %v3045_v29  ;;  %v3517_v3 = vsel %vm2312_vm4, %v3515_v46, %v3516_v49  ;;  %v6691_v25 = vmul.f32 %v6076_v58, %v1852_v56 }
 0x203   : > { %v2455_v7 = vadd.f32 %v2337_v8, %v2177_v38  ;;  %v3635_v62 = vadd.f32 %v3515_v46, %v3358_v45  ;;  %v2928_v39 = vsel %vm2312_vm4, %v2925_v53, %v2927_v17  ;;  %v3413_v14 = vmul.f32 %v6128_v31, %v1852_v56  ;;  %v1853_v31 = vld [vmem:[#allocation3 + $0x120] sm:$0xff] }
 0x204   : > { %v3359_v15 = vadd.f32 %v3264_v13, %v3146_v19  ;;  %v2937_v35 = vrot.slane %v6691_v25, 4  ;;  %v3099_v51 = vmul.f32 %v6097_v11, %v6647_v37  ;;  %v1918_v58 = vmul.f32 %v6169_v61, %v6262_v34 }
 0x205   : > { %v2556_v50 = vadd.f32 %v2508_v59, %v2455_v7  ;;  %v3740_v55 = vrot.slane %v3635_v62, 6  ;;  %v3518_v46 = vrot.slane %v3413_v14, 4  ;;  %v6706_v33 = vmul.f32 %v6616_v5, %v6343_v18 }
 0x206   : > { %v3636_v30 = vadd.f32 %v3517_v3, %v3359_v15  ;;  %v6710_v53 = vmul.f32 %v6616_v5, %v6697_v4  ;;  %v2231_v56 = vmul.f32 %v6581_v60, %v6262_v34  ;;  %v2232_v11 = vmul.f32 %v6581_v60, %v6343_v18 }
 0x207   : > { %v2769_v17 = vadd.f32 %v2672_v23, %v2556_v50  ;;  %v3519_v1 = vsel %vm2312_vm4, %v3516_v49, %v3518_v46  ;;  %v1929_v13 = vmul.f32 %v6169_v61, %v1853_v31  ;;  %v2083_v54 = vrot.slane %v6706_v33, 2  ;;  %v6741_v50 = vld [vmem:[%s7857_s2 + $0x5] ss:$0 sm:$0xff]  ;;  %v6752_v46 = vld [vmem:[%s7857_s2 + $0x6] ss:$0 sm:$0xff] }
 0x208   : > { %v3741_v29 = vrot.slane %v3636_v30, 6  ;;  %v2338_v23 = vrot.slane %v2231_v56, 4  ;;  %v2339_v20 = vrot.slane %v2232_v11, 4  ;;  %v2510_v8 = vmul.f32 %v6191_v63, %v6498_v26  ;;  %v6745_v30 = vld [vmem:[#allocation3 + $0x130] sm:$0xff] }
 0x209   : > { %v3046_v38 = vadd.f32 %v2928_v39, %v2769_v17  ;;  %v7911_v34 = vrot.slane %v6283_v16, 2  ;;  %v7876_v59 = vrot.slane %v6710_v53, 2  ;;  %v2605_v49 = vmul.f32 %v6541_v24, %v6498_v26 }
 0x20a   : > { %v3742_v19 = vsel %vm3719_vm7, %v3740_v55, %v3741_v29  ;;  %v2340_v15 = vsel %vm2312_vm4, %v2338_v23, %v2339_v20  ;;  %v6731_v62 = vmul.f32 %v6191_v63, %v1853_v31  ;;  %v2456_v39 = vadd.f32 %v2338_v23, %v6330_v10 }
 0x20b   : > { %v2084_v45 = vsel %vm1042_vm2, %v7911_v34, %v2083_v54  ;;  %4523 = vmatprep.mubr.msk.f32.mxu1 %vm639_vm1, %v3742_v19  ;;  %v3147_v3 = vadd.f32 %v3099_v51, %v3046_v38  ;;  %v6736_v16 = vmul.f32 %v6541_v24, %v6554_v44  ;;  %v2674_v14 = vrot.slane %v2605_v49, 2  ;;  %v6762_v34 = vld [vmem:[%s7857_s2 + $0x7] ss:$0 sm:$0xff] }
 0x20c   : > { %v2179_v7 = vadd.f32 %v2084_v45, %v1918_v58  ;;  %v2823_v51 = vmul.f32 %v6741_v50, %v6498_v26  ;;  %v2824_v10 = vmul.f32 %v6741_v50, %v6554_v44  ;;  %v3100_v33 = vmul.f32 %v6752_v46, %v1853_v31 }
 0x20d   : > { %v3360_v58 = vadd.f32 %v3263_v41, %v3147_v3  ;;  %v2557_v17 = vadd.f32 %v6594_v47, %v2456_v39  ;;  %v2675_v56 = vrot.slane %v6736_v16, 2  ;;  %v3101_v41 = vmul.f32 %v6752_v46, %v6697_v4  ;;  %v1856_v3 = vld [vmem:[#allocation3 + $0x138] sm:$0xff] }
 0x20e   : > { %v2457_v55 = vadd.f32 %v2340_v15, %v2179_v7  ;;  %v2929_v11 = vrot.slane %v2823_v51, 4  ;;  %v2930_v19 = vrot.slane %v2824_v10, 4  ;;  %v3196_v45 = vmul.f32 %v6762_v34, %v6697_v4 }
 0x20f   : > { %v3637_v38 = vadd.f32 %v3519_v1, %v3360_v58  ;;  %v2676_v31 = vsel %vm1042_vm2, %v2674_v14, %v2675_v56  ;;  %v2770_v47 = vadd.f32 %v2674_v14, %v2557_v17  ;;  %v6769_v49 = vmul.f32 %v6762_v34, %v6745_v30  ;;  %v6774_v1 = vld [vmem:[%s7857_s2 + $0x8] ss:$0 sm:$0xff] }
 0x210   : > { %v2558_v23 = vadd.f32 %v2510_v8, %v2457_v55  ;;  %v3414_v8 = vmul.f32 %v6774_v1, %v6697_v4  ;;  %v2931_v39 = vsel %vm2312_vm4, %v2929_v11, %v2930_v19  ;;  %v3265_v16 = vrot.slane %v3196_v45, 2 }
 0x211   : > { %v3743_v7 = vrot.slane %v3637_v38, 6  ;;  %v3047_v51 = vadd.f32 %v2929_v11, %v2770_v47  ;;  %v3266_v14 = vrot.slane %v6769_v49, 2  ;;  %v3415_v58 = vmul.f32 %v6774_v1, %v6745_v30 }
 0x212   : > { %v2771_v15 = vadd.f32 %v2676_v31, %v2558_v23  ;;  %v3520_v55 = vrot.slane %v3414_v8, 4  ;;  %v1919_v28 = vmul.f32 %v6169_v61, %v6343_v18  ;;  %v6786_v21 = vmul.f32 %v6581_v60, %v1856_v3 }
 0x213   : > { %v3744_v10 = vsel %vm3719_vm7, %v3741_v29, %v3743_v7  ;;  %v3148_v38 = vadd.f32 %v3100_v33, %v3047_v51  ;;  %v3267_v11 = vsel %vm1042_vm2, %v3265_v16, %v3266_v14  ;;  %v3521_v23 = vrot.slane %v3415_v58, 4  ;;  %v6818_v51 = vld [vmem:[%s7857_s2] ss:$0 sm:$0xff] }
 0x214   : > { %v3048_v17 = vadd.f32 %v2931_v39, %v2771_v15  ;;  %4524 = vmatmul.mubr.msk.f32.gmra.mxu1 %vm639_vm1, %v3744_v10  ;;  %v7912_v45 = vrot.slane %v6385_v52, 4  ;;  %v6797_v29 = vadd.f32 %v7876_v59, %v1929_v13  ;;  %v2180_v18 = vadd.f32 %v2083_v54, %v1919_v28  ;;  %v6810_v28 = vld [vmem:[#allocation3 + $0x148] sm:$0xff] }
 0x215   : > { %v2511_v47 = vmul.f32 %v6191_v63, %v6554_v44  ;;  %v3361_v8 = vadd.f32 %v3265_v16, %v3148_v38  ;;  %v3522_v33 = vsel %vm2312_vm4, %v3520_v55, %v3521_v23  ;;  %v6804_v15 = vmul.f32 %v6741_v50, %v1856_v3 }
 0x216   : > { %v2342_v31 = vsel %vm2312_vm4, %v2339_v20, %v7912_v45  ;;  %v3149_v61 = vadd.f32 %v3101_v41, %v3048_v17  ;;  %v7913_v20 = vrot.slane %v6598_v6, 4  ;;  %v3416_v41 = vmul.f32 %v6774_v1, %v1856_v3  ;;  %v1857_v17 = vld [vmem:[#allocation3 + $0x140] sm:$0xff] }
 0x217   : > { %v2458_v39 = vadd.f32 %v2342_v31, %v2180_v18  ;;  %v3638_v54 = vadd.f32 %v3520_v55, %v3361_v8  ;;  %v2942_v63 = vrot.slane %v6804_v15, 4  ;;  %v3102_v16 = vmul.f32 %v6752_v46, %v6745_v30 }
 0x218   : > { %v3362_v52 = vadd.f32 %v3267_v11, %v3149_v61  ;;  %v2933_v13 = vsel %vm2312_vm4, %v2930_v19, %v7913_v20  ;;  %v1921_v6 = vmul.f32 %v6818_v51, %v6404_v12  ;;  %v3523_v3 = vrot.slane %v3416_v41, 4 }
 0x219   : > { %v2559_v19 = vadd.f32 %v2511_v47, %v2458_v39  ;;  %v6826_v55 = vmul.f32 %v6616_v5, %v6452_v9  ;;  %v3745_v10 = vrot.slane %v3638_v54, 6  ;;  %v6830_v38 = vmul.f32 %v6616_v5, %v6810_v28 }
 0x21a   : > { %v6822_v58 = vadd.f32 %v3522_v33, %v3362_v52  ;;  %v2234_v11 = vmul.f32 %v6581_v60, %v6404_v12  ;;  %v6836_v45 = vmul.f32 %v6581_v60, %v6452_v9  ;;  %v1932_v18 = vmul.f32 %v6818_v51, %v1857_v17 }
 0x21b   : > { %v2772_v61 = vadd.f32 %v2675_v56, %v2559_v19  ;;  %v2086_v47 = vrot.slane %v6826_v55, 2  ;;  %v3524_v8 = vsel %vm2312_vm4, %v3521_v23, %v3523_v3  ;;  %v7878_v33 = vrot.slane %v6830_v38, 2  ;;  %v6851_v56 = vld [vmem:[%s7857_s2 + $0x3] ss:$0 sm:$0xff] }
 0x21c   : > { %v3746_v31 = vrot.slane %v6822_v58, 6  ;;  %v2343_v52 = vrot.slane %v2234_v11, 4  ;;  %v2344_v39 = vrot.slane %v6836_v45, 4  ;;  %v7914_v41 = vrot.slane %v6418_v42, 2  ;;  %v6869_v45 = vld [vmem:[#allocation3 + $0x150] sm:$0xff] }
 0x21d   : > { %v3049_v20 = vadd.f32 %v2933_v13, %v2772_v61  ;;  %v2513_v23 = vmul.f32 %v6851_v56, %v6604_v0  ;;  %v6859_v13 = vmul.f32 %v6851_v56, %v1857_v17  ;;  %v2607_v55 = vmul.f32 %v6541_v24, %v6604_v0 }
 0x21e   : > { %v3747_v12 = vsel %vm3719_vm7, %v3745_v10, %v3746_v31  ;;  %v2087_v54 = vsel %vm1042_vm2, %v7914_v41, %v2086_v47  ;;  %v2345_v19 = vsel %vm2312_vm4, %v2343_v52, %v2344_v39  ;;  %v2459_v3 = vadd.f32 %v2343_v52, %v6445_v40 }
 0x21f   : > { %4526 = vmatprep.mubr.msk.f32.mxu1 %vm639_vm1, %v3747_v12  ;;  %v2182_v58 = vadd.f32 %v2087_v54, %v1921_v6  ;;  %v3150_v42 = vadd.f32 %v3102_v16, %v3049_v20  ;;  %v6865_v10 = vmul.f32 %v6541_v24, %v6647_v37  ;;  %v2826_v11 = vmul.f32 %v6741_v50, %v6604_v0 }
 0x220   : > { %v2560_v61 = vadd.f32 %v6637_v43, %v2459_v3  ;;  %v2827_v40 = vmul.f32 %v6741_v50, %v6647_v37  ;;  %v3103_v16 = vmul.f32 %v6752_v46, %v1857_v17  ;;  %v2677_v12 = vrot.slane %v2607_v55, 2 }
 0x221   : > { %v2460_v6 = vadd.f32 %v2345_v19, %v2182_v58  ;;  %v3363_v52 = vadd.f32 %v3266_v14, %v3150_v42  ;;  %v2678_v20 = vrot.slane %v6865_v10, 2  ;;  %v2934_v41 = vrot.slane %v2826_v11, 4  ;;  %v1860_v14 = vld [vmem:[#allocation3 + $0x158] sm:$0xff] }
 0x222   : > { %v2935_v7 = vrot.slane %v2827_v40, 4  ;;  %v3104_v59 = vmul.f32 %v6752_v46, %v6810_v28  ;;  %v3198_v43 = vmul.f32 %v6762_v34, %v6810_v28  ;;  %v2773_v3 = vadd.f32 %v2677_v12, %v2560_v61 }
 0x223   : > { %v2561_v54 = vadd.f32 %v2513_v23, %v2460_v6  ;;  %v3640_v58 = vadd.f32 %v3524_v8, %v3363_v52  ;;  %v2679_v19 = vsel %vm1042_vm2, %v2677_v12, %v2678_v20  ;;  %v6885_v49 = vmul.f32 %v6762_v34, %v6869_v45 }
 0x224   : > { %v2936_v42 = vsel %vm2312_vm4, %v2934_v41, %v2935_v7  ;;  %v3268_v23 = vrot.slane %v3198_v43, 2  ;;  %v3417_v55 = vmul.f32 %v6774_v1, %v6810_v28  ;;  %v3050_v11 = vadd.f32 %v2934_v41, %v2773_v3 }
 0x225   : > { %v2774_v17 = vadd.f32 %v2679_v19, %v2561_v54  ;;  %v3748_v10 = vrot.slane %v3640_v58, 6  ;;  %v3269_v6 = vrot.slane %v6885_v49, 2  ;;  %v3418_v8 = vmul.f32 %v6774_v1, %v6869_v45 }
 0x226   : > { %v3525_v40 = vrot.slane %v3417_v55, 4  ;;  %v1922_v52 = vmul.f32 %v6818_v51, %v6452_v9  ;;  %v6896_v12 = vmul.f32 %v6581_v60, %v1860_v14  ;;  %v3151_v43 = vadd.f32 %v3103_v16, %v3050_v11 }
 0x227   : > { %v3051_v61 = vadd.f32 %v2936_v42, %v2774_v17  ;;  %v3749_v54 = vsel %vm3719_vm7, %v3746_v31, %v3748_v10  ;;  %v3270_v19 = vsel %vm1042_vm2, %v3268_v23, %v3269_v6  ;;  %v3526_v58 = vrot.slane %v3418_v8, 4 }
 0x228   : > { %4527 = vmatmul.mubr.msk.f32.gmra.mxu1 %vm639_vm1, %v3749_v54  ;;  %v6903_v41 = vadd.f32 %v7878_v33, %v1932_v18  ;;  %v2183_v49 = vadd.f32 %v2086_v47, %v1922_v52  ;;  %v7915_v17 = vrot.slane %v6480_v2, 4  ;;  %v3364_v42 = vadd.f32 %v3268_v23, %v3151_v43  ;;  %v6918_v2 = vld [vmem:[#allocation3 + $0x168] sm:$0xff] }
 0x229   : > { %v3152_v3 = vadd.f32 %v3104_v59, %v3051_v61  ;;  %v2514_v31 = vmul.f32 %v6851_v56, %v6647_v37  ;;  %v6912_v16 = vmul.f32 %v6741_v50, %v1860_v14  ;;  %v3527_v11 = vsel %vm2312_vm4, %v3525_v40, %v3526_v58  ;;  %v6924_v61 = vld [vmem:[#allocation3 + $0x160] sm:$0xff] }
 0x22a   : > { %v2347_v9 = vsel %vm2312_vm4, %v2344_v39, %v7915_v17  ;;  %v2938_v59 = vsel %vm2312_vm4, %v2935_v7, %v2937_v35  ;;  %v3641_v47 = vadd.f32 %v3525_v40, %v3364_v42  ;;  %v3105_v23 = vmul.f32 %v6752_v46, %v6869_v45 }
 0x22b   : > { %v3365_v10 = vadd.f32 %v3270_v19, %v3152_v3  ;;  %v2461_v18 = vadd.f32 %v2347_v9, %v2183_v49  ;;  %v2947_v39 = vrot.slane %v6912_v16, 4  ;;  %v3419_v8 = vmul.f32 %v6774_v1, %v1860_v14 }
 0x22c   : > { %v1935_v43 = vmul.f32 %v6818_v51, %v6924_v61  ;;  %v6930_v25 = vmul.f32 %v6616_v5, %v6554_v44  ;;  %v3750_v35 = vrot.slane %v3641_v47, 6  ;;  %v6934_v40 = vmul.f32 %v6616_v5, %v6918_v2 }
 0x22d   : > { %v3642_v52 = vadd.f32 %v3527_v11, %v3365_v10  ;;  %v2562_v54 = vadd.f32 %v2514_v31, %v2461_v18  ;;  %v3528_v7 = vrot.slane %v3419_v8, 4  ;;  %v2237_v14 = vmul.f32 %v6581_v60, %v6498_v26 }
 0x22e   : > { %v2089_v49 = vrot.slane %v6930_v25, 2  ;;  %v2238_v17 = vmul.f32 %v6581_v60, %v6554_v44  ;;  %v1924_v42 = vmul.f32 %v6818_v51, %v6498_v26  ;;  %v7877_v31 = vrot.slane %v6934_v40, 2 }
 0x22f   : > { %v3751_v19 = vrot.slane %v3642_v52, 6  ;;  %v2775_v3 = vadd.f32 %v2678_v20, %v2562_v54  ;;  %v3529_v9 = vsel %vm2312_vm4, %v3526_v58, %v3528_v7  ;;  %v2348_v10 = vrot.slane %v2237_v14, 4 }
 0x230   : > { %v7916_v47 = vrot.slane %v6516_v32, 2  ;;  %v2349_v8 = vrot.slane %v2238_v17, 4  ;;  %v6952_v58 = vadd.f32 %v7877_v31, %v1935_v43  ;;  %v2516_v54 = vmul.f32 %v6851_v56, %v6697_v4 }
 0x231   : > { %v3752_v11 = vsel %vm3719_vm7, %v3750_v35, %v3751_v19  ;;  %v3052_v18 = vadd.f32 %v2938_v59, %v2775_v3  ;;  %v2462_v26 = vadd.f32 %v2348_v10, %v6531_v36  ;;  %v2609_v32 = vmul.f32 %v6541_v24, %v6697_v4 }
 0x232   : > { %v2090_v20 = vsel %vm1042_vm2, %v7916_v47, %v2089_v49  ;;  %4529 = vmatprep.mubr.msk.f32.mxu1 %vm639_vm1, %v3752_v11  ;;  %v2350_v59 = vsel %vm2312_vm4, %v2348_v10, %v2349_v8  ;;  %v6962_v35 = vmul.f32 %v6541_v24, %v6745_v30  ;;  %v2829_v43 = vmul.f32 %v6741_v50, %v6697_v4 }
 0x233   : > { %v2185_v52 = vadd.f32 %v2090_v20, %v1924_v42  ;;  %v3153_v25 = vadd.f32 %v3105_v23, %v3052_v18  ;;  %v2563_v14 = vadd.f32 %v6731_v62, %v2462_v26  ;;  %v2830_v36 = vmul.f32 %v6741_v50, %v6745_v30  ;;  %v6969_v23 = vld [vmem:[#allocation3 + $0x170] sm:$0xff] }
 0x234   : > { %v2680_v17 = vrot.slane %v2609_v32, 2  ;;  %v2681_v42 = vrot.slane %v6962_v35, 2  ;;  %v3106_v10 = vmul.f32 %v6752_v46, %v6924_v61  ;;  %v2939_v18 = vrot.slane %v2829_v43, 4  ;;  %v1864_v35 = vld [vmem:[#allocation3 + $0x178] sm:$0xff] }
 0x235   : > { %v2463_v7 = vadd.f32 %v2350_v59, %v2185_v52  ;;  %v3366_v3 = vadd.f32 %v3269_v6, %v3153_v25  ;;  %v2940_v47 = vrot.slane %v2830_v36, 4  ;;  %v3107_v62 = vmul.f32 %v6752_v46, %v6918_v2 }
 0x236   : > { %v2682_v52 = vsel %vm1042_vm2, %v2680_v17, %v2681_v42  ;;  %v2776_v26 = vadd.f32 %v2680_v17, %v2563_v14  ;;  %v3200_v6 = vmul.f32 %v6762_v34, %v6918_v2  ;;  %v6982_v32 = vmul.f32 %v6762_v34, %v6969_v23 }
 0x237   : > { %v2564_v11 = vadd.f32 %v2516_v54, %v2463_v7  ;;  %v3643_v20 = vadd.f32 %v3529_v9, %v3366_v3  ;;  %v2941_v59 = vsel %vm2312_vm4, %v2939_v18, %v2940_v47  ;;  %v3420_v54 = vmul.f32 %v6774_v1, %v6918_v2 }
 0x238   : > { %v3053_v43 = vadd.f32 %v2939_v18, %v2776_v26  ;;  %v3271_v9 = vrot.slane %v3200_v6, 2  ;;  %v3421_v14 = vmul.f32 %v6774_v1, %v6969_v23  ;;  %v3272_v3 = vrot.slane %v6982_v32, 2 }
 0x239   : > { %v2777_v25 = vadd.f32 %v2682_v52, %v2564_v11  ;;  %v3753_v7 = vrot.slane %v3643_v20, 6  ;;  %v3530_v17 = vrot.slane %v3420_v54, 4  ;;  %v1925_v11 = vmul.f32 %v6818_v51, %v6554_v44 }
 0x23a   : > { %v3154_v31 = vadd.f32 %v3106_v10, %v3053_v43  ;;  %v3531_v55 = vrot.slane %v3421_v14, 4  ;;  %v6993_v33 = vmul.f32 %v6581_v60, %v1864_v35  ;;  %v3273_v20 = vsel %vm1042_vm2, %v3271_v9, %v3272_v3  ;;  %v7019_v43 = vld [vmem:[#allocation3 + $0x180] sm:$0xff] }
 0x23b   : > { %v3054_v36 = vadd.f32 %v2941_v59, %v2777_v25  ;;  %v3754_v52 = vsel %vm3719_vm7, %v3751_v19, %v3753_v7  ;;  %v2186_v26 = vadd.f32 %v2089_v49, %v1925_v11  ;;  %v7917_v6 = vrot.slane %v6584_v48, 4  ;;  %v7011_v48 = vld [vmem:[#allocation3 + $0x188] sm:$0xff] }
 0x23c   : > { %4530 = vmatmul.mubr.msk.f32.gmra.mxu1 %vm639_vm1, %v3754_v52  ;;  %v7002_v44 = vmul.f32 %v6851_v56, %v6924_v61  ;;  %v3367_v19 = vadd.f32 %v3271_v9, %v3154_v31  ;;  %v3532_v10 = vsel %vm2312_vm4, %v3530_v17, %v3531_v55  ;;  %v2517_v59 = vmul.f32 %v6851_v56, %v6745_v30 }
 0x23d   : > { %v3155_v18 = vadd.f32 %v3107_v62, %v3054_v36  ;;  %v2352_v25 = vsel %vm2312_vm4, %v2349_v8, %v7917_v6  ;;  %v7009_v49 = vmul.f32 %v6741_v50, %v1864_v35  ;;  %v2943_v61 = vsel %vm2312_vm4, %v2940_v47, %v2942_v63 }
 0x23e   : > { %v2464_v54 = vadd.f32 %v2352_v25, %v2186_v26  ;;  %v3644_v8 = vadd.f32 %v3530_v17, %v3367_v19  ;;  %v3108_v31 = vmul.f32 %v6752_v46, %v6969_v23  ;;  %v3422_v7 = vmul.f32 %v6774_v1, %v1864_v35 }
 0x23f   : > { %v3368_v32 = vadd.f32 %v3273_v20, %v3155_v18  ;;  %v1927_v36 = vmul.f32 %v6818_v51, %v6604_v0  ;;  %v1938_v11 = vmul.f32 %v6818_v51, %v7019_v43  ;;  %v2020_v15 = vmul.f32 %v6616_v5, %v6647_v37 }
 0x240   : > { %v2565_v14 = vadd.f32 %v2517_v59, %v2464_v54  ;;  %v3755_v17 = vrot.slane %v3644_v8, 6  ;;  %v3533_v52 = vrot.slane %v3422_v7, 4  ;;  %v7029_v63 = vmul.f32 %v6616_v5, %v7011_v48 }
 0x241   : > { %v3645_v9 = vadd.f32 %v3532_v10, %v3368_v32  ;;  %v2240_v18 = vmul.f32 %v6581_v60, %v6604_v0  ;;  %v2241_v20 = vmul.f32 %v6581_v60, %v6647_v37  ;;  %v2092_v25 = vrot.slane %v2020_v15, 2 }
 0x242   : > { %v2778_v35 = vadd.f32 %v2681_v42, %v2565_v14  ;;  %v3534_v6 = vsel %vm2312_vm4, %v3531_v55, %v3533_v52  ;;  %v7879_v19 = vrot.slane %v7029_v63, 2  ;;  %v7918_v42 = vrot.slane %v6622_v27, 2 }
 0x243   : > { %v3756_v47 = vrot.slane %v3645_v9, 6  ;;  %v2353_v32 = vrot.slane %v2240_v18, 4  ;;  %v2354_v54 = vrot.slane %v2241_v20, 4  ;;  %v2519_v55 = vmul.f32 %v6851_v56, %v6810_v28  ;;  %v7059_v18 = vld [vmem:[#allocation3 + $0x190] sm:$0xff] }
 0x244   : > { %v3055_v59 = vadd.f32 %v2943_v61, %v2778_v35  ;;  %v2093_v0 = vsel %vm1042_vm2, %v7918_v42, %v2092_v25  ;;  %v7045_v8 = vadd.f32 %v7879_v19, %v1938_v11  ;;  %v2611_v7 = vmul.f32 %v6541_v24, %v6810_v28 }
 0x245   : > { %v3757_v10 = vsel %vm3719_vm7, %v3755_v17, %v3756_v47  ;;  %v2188_v61 = vadd.f32 %v2093_v0, %v1927_v36  ;;  %v2355_v14 = vsel %vm2312_vm4, %v2353_v32, %v2354_v54  ;;  %v2465_v17 = vadd.f32 %v2353_v32, %v6684_v22 }
 0x246   : > { %4532 = vmatprep.mubr.msk.f32.mxu1 %vm639_vm1, %v3757_v10  ;;  %v3156_v9 = vadd.f32 %v3108_v31, %v3055_v59  ;;  %v2612_v27 = vmul.f32 %v6541_v24, %v6869_v45  ;;  %v2683_v52 = vrot.slane %v2611_v7, 2  ;;  %v2832_v11 = vmul.f32 %v6741_v50, %v6810_v28 }
 0x247   : > { %v2833_v15 = vmul.f32 %v6741_v50, %v6869_v45  ;;  %v2466_v20 = vadd.f32 %v2355_v14, %v2188_v61  ;;  %v2566_v31 = vadd.f32 %v6859_v13, %v2465_v17  ;;  %v3109_v36 = vmul.f32 %v6752_v46, %v7019_v43  ;;  %v1868_v17 = vld [vmem:[#allocation3 + $0x198] sm:$0xff] }
 0x248   : > { %v3369_v35 = vadd.f32 %v3272_v3, %v3156_v9  ;;  %v2684_v22 = vrot.slane %v2612_v27, 2  ;;  %v2944_v10 = vrot.slane %v2832_v11, 4  ;;  %v3110_v32 = vmul.f32 %v6752_v46, %v7011_v48 }
 0x249   : > { %v2945_v59 = vrot.slane %v2833_v15, 4  ;;  %v2567_v0 = vadd.f32 %v2519_v55, %v2466_v20  ;;  %v2779_v7 = vadd.f32 %v2683_v52, %v2566_v31  ;;  %v3202_v3 = vmul.f32 %v6762_v34, %v7011_v48 }
 0x24a   : > { %v3646_v42 = vadd.f32 %v3534_v6, %v3369_v35  ;;  %v2685_v9 = vsel %vm1042_vm2, %v2683_v52, %v2684_v22  ;;  %v7072_v13 = vmul.f32 %v6762_v34, %v7059_v18  ;;  %v3423_v14 = vmul.f32 %v6774_v1, %v7011_v48 }
 0x24b   : > { %v2946_v61 = vsel %vm2312_vm4, %v2944_v10, %v2945_v59  ;;  %v2780_v11 = vadd.f32 %v2685_v9, %v2567_v0  ;;  %v3056_v6 = vadd.f32 %v2944_v10, %v2779_v7  ;;  %v3274_v55 = vrot.slane %v3202_v3, 2 }
 0x24c   : > { %v3758_v27 = vrot.slane %v3646_v42, 6  ;;  %v3275_v15 = vrot.slane %v7072_v13, 2  ;;  %v3424_v35 = vmul.f32 %v6774_v1, %v7059_v18  ;;  %v3535_v52 = vrot.slane %v3423_v14, 4 }
 0x24d   : > { %v1928_v20 = vmul.f32 %v6818_v51, %v6647_v37  ;;  %v3057_v19 = vadd.f32 %v2946_v61, %v2780_v11  ;;  %v3157_v62 = vadd.f32 %v3109_v36, %v3056_v6  ;;  %v7083_v26 = vmul.f32 %v6581_v60, %v1868_v17 }
 0x24e   : > { %v3759_v31 = vsel %vm3719_vm7, %v3756_v47, %v3758_v27  ;;  %v3276_v10 = vsel %vm1042_vm2, %v3274_v55, %v3275_v15  ;;  %v3536_v42 = vrot.slane %v3424_v35, 4  ;;  %v7919_v7 = vrot.slane %v6675_v57, 4 }
 0x24f   : > { %4533 = vmatmul.mubr.msk.f32.gmra.mxu1 %vm639_vm1, %v3759_v31  ;;  %v2189_v0 = vadd.f32 %v2092_v25, %v1928_v20  ;;  %v7092_v37 = vmul.f32 %v6851_v56, %v7019_v43  ;;  %v3158_v47 = vadd.f32 %v3110_v32, %v3057_v19  ;;  %v3370_v9 = vadd.f32 %v3274_v55, %v3157_v62  ;;  %v7105_v62 = vld [vmem:[#allocation3 + $0x1a8] sm:$0xff] }
 0x250   : > { %v2357_v3 = vsel %vm2312_vm4, %v2354_v54, %v7919_v7  ;;  %v2520_v36 = vmul.f32 %v6851_v56, %v6869_v45  ;;  %v3537_v61 = vsel %vm2312_vm4, %v3535_v52, %v3536_v42  ;;  %v2376_v13 = vrot.slane %v7083_v26, 4 }
 0x251   : > { %v2467_v14 = vadd.f32 %v2357_v3, %v2189_v0  ;;  %v7099_v25 = vmul.f32 %v6741_v50, %v1868_v17  ;;  %v3371_v57 = vadd.f32 %v3276_v10, %v3158_v47  ;;  %v3647_v27 = vadd.f32 %v3535_v52, %v3370_v9 }
 0x252   : > { %v2948_v43 = vsel %vm2312_vm4, %v2945_v59, %v2947_v39  ;;  %v3425_v19 = vmul.f32 %v6774_v1, %v1868_v17  ;;  %v3111_v11 = vmul.f32 %v6752_v46, %v7059_v18  ;;  %v1930_v6 = vmul.f32 %v6818_v51, %v6697_v4  ;;  %v1869_v59 = vld [vmem:[#allocation3 + $0x1a0] sm:$0xff] }
 0x253   : > { %v2568_v54 = vadd.f32 %v2520_v36, %v2467_v14  ;;  %v2957_v32 = vrot.slane %v7099_v25, 4  ;;  %v3648_v55 = vadd.f32 %v3537_v61, %v3371_v57  ;;  %v3760_v35 = vrot.slane %v3647_v27, 6  ;;  %v7321_v25 = vld [vmem:[%s7857_s2 + $0x1] ss:$0 sm:$0xff] }
 0x254   : > { %v3538_v52 = vrot.slane %v3425_v19, 4  ;;  %v7114_v16 = vmul.f32 %v6616_v5, %v6745_v30  ;;  %v7118_v17 = vmul.f32 %v6616_v5, %v7105_v62  ;;  %v2243_v20 = vmul.f32 %v6581_v60, %v6697_v4 }
 0x255   : > { %v2781_v39 = vadd.f32 %v2684_v22, %v2568_v54  ;;  %v2244_v31 = vmul.f32 %v6581_v60, %v6745_v30  ;;  %v3761_v10 = vrot.slane %v3648_v55, 6  ;;  %v1941_v7 = vmul.f32 %v6818_v51, %v1869_v59 }
 0x256   : > { %v3539_v0 = vsel %vm2312_vm4, %v3536_v42, %v3538_v52  ;;  %v2095_v3 = vrot.slane %v7114_v16, 2  ;;  %v2358_v22 = vrot.slane %v2243_v20, 4  ;;  %v2522_v36 = vmul.f32 %v6851_v56, %v6918_v2 }
 0x257   : > { %v3058_v47 = vadd.f32 %v2948_v43, %v2781_v39  ;;  %v2359_v9 = vrot.slane %v2244_v31, 4  ;;  %v3762_v61 = vsel %vm3719_vm7, %v3760_v35, %v3761_v10  ;;  %v7920_v4 = vrot.slane %v6710_v53, 2  ;;  %v7148_v39 = vld [vmem:[#allocation3 + $0x1b0] sm:$0xff] }
 0x258   : > { %v7880_v57 = vrot.slane %v7118_v17, 2  ;;  %v2613_v42 = vmul.f32 %v6541_v24, %v6918_v2  ;;  %4535 = vmatprep.mubr.msk.f32.mxu1 %vm639_vm1, %v3762_v61  ;;  %v7139_v54 = vmul.f32 %v6851_v56, %v1869_v59  ;;  %v2468_v55 = vadd.f32 %v2358_v22, %v6797_v29 }
 0x259   : > { %v2096_v14 = vsel %vm1042_vm2, %v7920_v4, %v2095_v3  ;;  %v3159_v27 = vadd.f32 %v3111_v11, %v3058_v47  ;;  %v2360_v19 = vsel %vm2312_vm4, %v2358_v22, %v2359_v9  ;;  %v7144_v53 = vmul.f32 %v6541_v24, %v6969_v23 }
 0x25a   : > { %v2191_v43 = vadd.f32 %v2096_v14, %v1930_v6  ;;  %v2686_v35 = vrot.slane %v2613_v42, 2  ;;  %v2835_v52 = vmul.f32 %v6741_v50, %v6918_v2  ;;  %v2836_v6 = vmul.f32 %v6741_v50, %v6969_v23 }
 0x25b   : > { %v3372_v16 = vadd.f32 %v3275_v15, %v3159_v27  ;;  %v3112_v20 = vmul.f32 %v6752_v46, %v1869_v59  ;;  %v2569_v31 = vadd.f32 %v7002_v44, %v2468_v55  ;;  %v2687_v29 = vrot.slane %v7144_v53, 2  ;;  %v1872_v27 = vld [vmem:[#allocation3 + $0x1b8] sm:$0xff] }
 0x25c   : > { %v2469_v11 = vadd.f32 %v2360_v19, %v2191_v43  ;;  %v2949_v47 = vrot.slane %v2835_v52, 4  ;;  %v3113_v24 = vmul.f32 %v6752_v46, %v7105_v62  ;;  %v2950_v4 = vrot.slane %v2836_v6, 4 }
 0x25d   : > { %v3649_v22 = vadd.f32 %v3539_v0, %v3372_v16  ;;  %v3204_v15 = vmul.f32 %v6762_v34, %v7105_v62  ;;  %v2688_v14 = vsel %vm1042_vm2, %v2686_v35, %v2687_v29  ;;  %v2782_v42 = vadd.f32 %v2686_v35, %v2569_v31 }
 0x25e   : > { %v2570_v61 = vadd.f32 %v2522_v36, %v2469_v11  ;;  %v7162_v59 = vmul.f32 %v6762_v34, %v7148_v39  ;;  %v3426_v44 = vmul.f32 %v6774_v1, %v7105_v62  ;;  %v2951_v0 = vsel %vm2312_vm4, %v2949_v47, %v2950_v4 }
 0x25f   : > { %v3763_v43 = vrot.slane %v3649_v22, 6  ;;  %v3277_v36 = vrot.slane %v3204_v15, 2  ;;  %v3059_v55 = vadd.f32 %v2949_v47, %v2782_v42  ;;  %v3427_v52 = vmul.f32 %v6774_v1, %v7148_v39 }
 0x260   : > { %v2783_v19 = vadd.f32 %v2688_v14, %v2570_v61  ;;  %v3278_v53 = vrot.slane %v7162_v59, 2  ;;  %v3540_v35 = vrot.slane %v3426_v44, 4  ;;  %v1931_v6 = vmul.f32 %v6818_v51, %v6745_v30 }
 0x261   : > { %v3764_v16 = vsel %vm3719_vm7, %v3761_v10, %v3763_v43  ;;  %v7174_v31 = vmul.f32 %v6581_v60, %v1872_v27  ;;  %v3160_v22 = vadd.f32 %v3112_v20, %v3059_v55  ;;  %v3541_v61 = vrot.slane %v3427_v52, 4 }
 0x262   : > { %v3060_v11 = vadd.f32 %v2951_v0, %v2783_v19  ;;  %4536 = vmatmul.mubr.msk.f32.gmra.mxu1 %vm639_vm1, %v3764_v16  ;;  %v3279_v47 = vsel %vm1042_vm2, %v3277_v36, %v3278_v53  ;;  %v7921_v15 = vrot.slane %v6786_v21, 4  ;;  %v7185_v10 = vadd.f32 %v7880_v57, %v1941_v7 }
 0x263   : > { %v2192_v42 = vadd.f32 %v2095_v3, %v1931_v6  ;;  %v2523_v60 = vmul.f32 %v6851_v56, %v6969_v23  ;;  %v3373_v44 = vadd.f32 %v3277_v36, %v3160_v22  ;;  %v3542_v20 = vsel %vm2312_vm4, %v3540_v35, %v3541_v61  ;;  %v7198_v3 = vld [vmem:[#allocation3 + $0x1c8] sm:$0xff] }
 0x264   : > { %v2362_v14 = vsel %vm2312_vm4, %v2359_v9, %v7921_v15  ;;  %v3161_v30 = vadd.f32 %v3113_v24, %v3060_v11  ;;  %v7192_v19 = vmul.f32 %v6741_v50, %v1872_v27  ;;  %v7922_v9 = vrot.slane %v7009_v49, 4 }
 0x265   : > { %v2470_v0 = vadd.f32 %v2362_v14, %v2192_v42  ;;  %v3428_v24 = vmul.f32 %v6774_v1, %v1872_v27  ;;  %v3650_v55 = vadd.f32 %v3540_v35, %v3373_v44  ;;  %v3114_v52 = vmul.f32 %v6752_v46, %v7148_v39  ;;  %v1873_v27 = vld [vmem:[#allocation3 + $0x1c0] sm:$0xff] }
 0x266   : > { %v3374_v21 = vadd.f32 %v3279_v47, %v3161_v30  ;;  %v2953_v7 = vsel %vm2312_vm4, %v2950_v4, %v7922_v9  ;;  %v2962_v36 = vrot.slane %v7192_v19, 4  ;;  %v1933_v16 = vmul.f32 %v6818_v51, %v6810_v28  ;;  %v7218_v47 = vld [vmem:[%s7857_s2 + $0x2] ss:$0 sm:$0xff] }
 0x267   : > { %v2571_v6 = vadd.f32 %v2523_v60, %v2470_v0  ;;  %v3543_v22 = vrot.slane %v3428_v24, 4  ;;  %v7209_v49 = vmul.f32 %v6616_v5, %v6869_v45  ;;  %v3765_v4 = vrot.slane %v3650_v55, 6 }
 0x268   : > { %v7205_v11 = vadd.f32 %v3542_v20, %v3374_v21  ;;  %v7213_v35 = vmul.f32 %v6616_v5, %v7198_v3  ;;  %v2246_v15 = vmul.f32 %v7218_v47, %v6810_v28  ;;  %v7224_v14 = vmul.f32 %v7218_v47, %v6869_v45 }
 0x269   : > { %v2784_v42 = vadd.f32 %v2687_v29, %v2571_v6  ;;  %v1944_v60 = vmul.f32 %v6818_v51, %v1873_v27  ;;  %v2098_v5 = vrot.slane %v7209_v49, 2  ;;  %v3544_v44 = vsel %vm2312_vm4, %v3541_v61, %v3543_v22 }
 0x26a   : > { %v3766_v30 = vrot.slane %v7205_v11, 6  ;;  %v2109_v20 = vrot.slane %v7213_v35, 2  ;;  %v2363_v21 = vrot.slane %v2246_v15, 4  ;;  %v2364_v0 = vrot.slane %v7224_v14, 4 }
 0x26b   : > { %v3061_v9 = vadd.f32 %v2953_v7, %v2784_v42  ;;  %v7923_v24 = vrot.slane %v6830_v38, 2  ;;  %v2525_v29 = vmul.f32 %v6851_v56, %v7011_v48  ;;  %v7242_v22 = vmul.f32 %v6851_v56, %v1873_v27  ;;  %v7247_v38 = vld [vmem:[%s7857_s2 + $0x4] ss:$0 sm:$0xff] }
 0x26c   : > { %v3767_v28 = vsel %vm3719_vm7, %v3765_v4, %v3766_v30  ;;  %v2365_v61 = vsel %vm2312_vm4, %v2363_v21, %v2364_v0  ;;  %v2471_v6 = vadd.f32 %v2363_v21, %v6903_v41  ;;  %v2615_v7 = vmul.f32 %v7247_v38, %v7011_v48  ;;  %v7257_v41 = vld [vmem:[#allocation3 + $0x1d0] sm:$0xff] }
 0x26d   : > { %v2099_v55 = vsel %vm1042_vm2, %v7923_v24, %v2098_v5  ;;  %4538 = vmatprep.mubr.msk.f32.mxu1 %vm639_vm1, %v3767_v28  ;;  %v3162_v49 = vadd.f32 %v3114_v52, %v3061_v9  ;;  %v7253_v4 = vmul.f32 %v7247_v38, %v7059_v18  ;;  %v2839_v14 = vmul.f32 %v6741_v50, %v7059_v18 }
 0x26e   : > { %v2194_v11 = vadd.f32 %v2099_v55, %v1933_v16  ;;  %v2838_v16 = vmul.f32 %v6741_v50, %v7011_v48  ;;  %v2572_v52 = vadd.f32 %v7092_v37, %v2471_v6  ;;  %v3115_v42 = vmul.f32 %v6752_v46, %v1873_v27 }
 0x26f   : > { %v3375_v21 = vadd.f32 %v3278_v53, %v3162_v49  ;;  %v2689_v28 = vrot.slane %v2615_v7, 2  ;;  %v2690_v9 = vrot.slane %v7253_v4, 2  ;;  %v2955_v43 = vrot.slane %v2839_v14, 4  ;;  %v1876_v53 = vld [vmem:[#allocation3 + $0x1d8] sm:$0xff] }
 0x270   : > { %v2472_v15 = vadd.f32 %v2365_v61, %v2194_v11  ;;  %v2954_v24 = vrot.slane %v2838_v16, 4  ;;  %v3116_v57 = vmul.f32 %v6752_v46, %v7198_v3  ;;  %v3206_v37 = vmul.f32 %v6762_v34, %v7198_v3 }
 0x271   : > { %v3652_v11 = vadd.f32 %v3544_v44, %v3375_v21  ;;  %v2691_v61 = vsel %vm1042_vm2, %v2689_v28, %v2690_v9  ;;  %v2785_v6 = vadd.f32 %v2689_v28, %v2572_v52  ;;  %v7273_v59 = vmul.f32 %v6762_v34, %v7257_v41 }
 0x272   : > { %v2573_v55 = vadd.f32 %v2525_v29, %v2472_v15  ;;  %v2956_v49 = vsel %vm2312_vm4, %v2954_v24, %v2955_v43  ;;  %v3280_v29 = vrot.slane %v3206_v37, 2  ;;  %v3429_v7 = vmul.f32 %v6774_v1, %v7198_v3 }
 0x273   : > { %v3768_v4 = vrot.slane %v3652_v11, 6  ;;  %v3062_v16 = vadd.f32 %v2954_v24, %v2785_v6  ;;  %v3281_v15 = vrot.slane %v7273_v59, 2  ;;  %v3430_v44 = vmul.f32 %v6774_v1, %v7257_v41 }
 0x274   : > { %v2786_v27 = vadd.f32 %v2691_v61, %v2573_v55  ;;  %v3545_v14 = vrot.slane %v3429_v7, 4  ;;  %v1934_v21 = vmul.f32 %v6818_v51, %v6869_v45  ;;  %v7284_v28 = vmul.f32 %v7218_v47, %v1876_v53 }
 0x275   : > { %v3769_v55 = vsel %vm3719_vm7, %v3766_v30, %v3768_v4  ;;  %v3163_v37 = vadd.f32 %v3115_v42, %v3062_v16  ;;  %v3282_v24 = vsel %vm1042_vm2, %v3280_v29, %v3281_v15  ;;  %v3546_v11 = vrot.slane %v3430_v44, 4 }
 0x276   : > { %v3063_v52 = vadd.f32 %v2956_v49, %v2786_v27  ;;  %4539 = vmatmul.mubr.msk.f32.gmra.mxu1 %vm639_vm1, %v3769_v55  ;;  %v7293_v61 = vadd.f32 %v2109_v20, %v1944_v60  ;;  %v2195_v27 = vadd.f32 %v2098_v5, %v1934_v21  ;;  %v7924_v45 = vrot.slane %v6896_v12, 4  ;;  %v7308_v12 = vld [vmem:[#allocation3 + $0x1e8] sm:$0xff]  ;;  %v7314_v21 = vld [vmem:[#allocation3 + $0x1e0] sm:$0xff] }
 0x277   : > { %v3376_v7 = vadd.f32 %v3280_v29, %v3163_v37  ;;  %v2526_v42 = vmul.f32 %v6851_v56, %v7059_v18  ;;  %v7302_v4 = vmul.f32 %v6741_v50, %v1876_v53  ;;  %v3547_v44 = vsel %vm2312_vm4, %v3545_v14, %v3546_v11 }
 0x278   : > { %v3164_v6 = vadd.f32 %v3116_v57, %v3063_v52  ;;  %v2367_v49 = vsel %vm2312_vm4, %v2364_v0, %v7924_v45  ;;  %v2958_v57 = vsel %vm2312_vm4, %v2955_v43, %v2957_v32  ;;  %v3117_v29 = vmul.f32 %v6752_v46, %v7257_v41 }
 0x279   : > { %v2473_v60 = vadd.f32 %v2367_v49, %v2195_v27  ;;  %v3653_v5 = vadd.f32 %v3545_v14, %v3376_v7  ;;  %v2967_v0 = vrot.slane %v7302_v4, 4  ;;  %v3431_v52 = vmul.f32 %v6774_v1, %v1876_v53 }
 0x27a   : > { %v3377_v16 = vadd.f32 %v3282_v24, %v3164_v6  ;;  %v1947_v24 = vmul.f32 %v6818_v51, %v7314_v21  ;;  %v7325_v32 = vmul.f32 %v7321_v25, %v6969_v23  ;;  %v7329_v53 = vmul.f32 %v7321_v25, %v7308_v12 }
 0x27b   : > { %v2574_v37 = vadd.f32 %v2526_v42, %v2473_v60  ;;  %v3770_v43 = vrot.slane %v3653_v5, 6  ;;  %v3548_v14 = vrot.slane %v3431_v52, 4  ;;  %v2249_v6 = vmul.f32 %v7218_v47, %v6918_v2 }
 0x27c   : > { %v3654_v55 = vadd.f32 %v3547_v44, %v3377_v16  ;;  %v2101_v49 = vrot.slane %v7325_v32, 2  ;;  %v2250_v7 = vmul.f32 %v7218_v47, %v6969_v23  ;;  %v1936_v16 = vmul.f32 %v6818_v51, %v6918_v2 }
 0x27d   : > { %v2787_v45 = vadd.f32 %v2690_v9, %v2574_v37  ;;  %v3549_v42 = vsel %vm2312_vm4, %v3546_v11, %v3548_v14  ;;  %v2112_v44 = vrot.slane %v7329_v53, 2  ;;  %v2368_v60 = vrot.slane %v2249_v6, 4 }
 0x27e   : > { %v3771_v27 = vrot.slane %v3654_v55, 6  ;;  %v7925_v30 = vrot.slane %v6934_v40, 2  ;;  %v2369_v55 = vrot.slane %v2250_v7, 4  ;;  %v2528_v32 = vmul.f32 %v6851_v56, %v7105_v62 }
 0x27f   : > { %v3064_v52 = vadd.f32 %v2958_v57, %v2787_v45  ;;  %v7347_v11 = vadd.f32 %v2112_v44, %v1947_v24  ;;  %v2474_v2 = vadd.f32 %v2368_v60, %v6952_v58  ;;  %v2617_v40 = vmul.f32 %v7247_v38, %v7105_v62  ;;  %v7366_v45 = vld [vmem:[#allocation3 + $0x1f0] sm:$0xff] }
 0x280   : > { %v3772_v5 = vsel %vm3719_vm7, %v3770_v43, %v3771_v27  ;;  %v2102_v9 = vsel %vm1042_vm2, %v7925_v30, %v2101_v49  ;;  %v2370_v57 = vsel %vm2312_vm4, %v2368_v60, %v2369_v55  ;;  %v7357_v30 = vmul.f32 %v7247_v38, %v7148_v39 }
 0x281   : > { %4541 = vmatprep.mubr.msk.f32.mxu1 %vm639_vm1, %v3772_v5  ;;  %v2197_v37 = vadd.f32 %v2102_v9, %v1936_v16  ;;  %v3165_v14 = vadd.f32 %v3117_v29, %v3064_v52  ;;  %v2575_v6 = vadd.f32 %v7139_v54, %v2474_v2  ;;  %v2841_v24 = vmul.f32 %v6741_v50, %v7105_v62 }
 0x282   : > { %v2842_v58 = vmul.f32 %v6741_v50, %v7148_v39  ;;  %v2692_v7 = vrot.slane %v2617_v40, 2  ;;  %v2693_v16 = vrot.slane %v7357_v30, 2  ;;  %v3118_v60 = vmul.f32 %v6752_v46, %v7314_v21  ;;  %v1880_v40 = vld [vmem:[#allocation3 + $0x1f8] sm:$0xff] }
 0x283   : > { %v2475_v43 = vadd.f32 %v2370_v57, %v2197_v37  ;;  %v3378_v29 = vadd.f32 %v3281_v15, %v3165_v14  ;;  %v2959_v52 = vrot.slane %v2841_v24, 4  ;;  %v3119_v9 = vmul.f32 %v6752_v46, %v7308_v12 }
 0x284   : > { %v2960_v54 = vrot.slane %v2842_v58, 4  ;;  %v2694_v50 = vsel %vm1042_vm2, %v2692_v7, %v2693_v16  ;;  %v2788_v2 = vadd.f32 %v2692_v7, %v2575_v6  ;;  %v3208_v59 = vmul.f32 %v6762_v34, %v7308_v12 }
 0x285   : > { %v2576_v5 = vadd.f32 %v2528_v32, %v2475_v43  ;;  %v3655_v37 = vadd.f32 %v3549_v42, %v3378_v29  ;;  %v7379_v57 = vmul.f32 %v6762_v34, %v7366_v45  ;;  %v3432_v32 = vmul.f32 %v6774_v1, %v7308_v12 }
 0x286   : > { %v2961_v14 = vsel %vm2312_vm4, %v2959_v52, %v2960_v54  ;;  %v3065_v46 = vadd.f32 %v2959_v52, %v2788_v2  ;;  %v3283_v42 = vrot.slane %v3208_v59, 2  ;;  %v3433_v43 = vmul.f32 %v6774_v1, %v7366_v45 }
 0x287   : > { %v2789_v15 = vadd.f32 %v2694_v50, %v2576_v5  ;;  %v3773_v30 = vrot.slane %v3655_v37, 6  ;;  %v3284_v24 = vrot.slane %v7379_v57, 2  ;;  %v3550_v58 = vrot.slane %v3432_v32, 4 }
 0x288   : > { %v1937_v29 = vmul.f32 %v6818_v51, %v6969_v23  ;;  %v3166_v7 = vadd.f32 %v3118_v60, %v3065_v46  ;;  %v3551_v5 = vrot.slane %v3433_v43, 4  ;;  %v7390_v50 = vmul.f32 %v7218_v47, %v1880_v40 }
 0x289   : > { %v3066_v6 = vadd.f32 %v2961_v14, %v2789_v15  ;;  %v3774_v34 = vsel %vm3719_vm7, %v3771_v27, %v3773_v30  ;;  %v3285_v1 = vsel %vm1042_vm2, %v3283_v42, %v3284_v24  ;;  %v7926_v2 = vrot.slane %v6993_v33, 4  ;;  %v7410_v33 = vld [vmem:[%s7857_s2 + $0x5] ss:$0 sm:$0xff]  ;;  %v7421_v30 = vld [vmem:[%s7857_s2 + $0x6] ss:$0 sm:$0xff] }
 0x28a   : > { %4542 = vmatmul.mubr.msk.f32.gmra.mxu1 %vm639_vm1, %v3774_v34  ;;  %v2198_v37 = vadd.f32 %v2101_v49, %v1937_v29  ;;  %v7401_v23 = vmul.f32 %v6851_v56, %v7314_v21  ;;  %v3379_v27 = vadd.f32 %v3283_v42, %v3166_v7  ;;  %v3552_v60 = vsel %vm2312_vm4, %v3550_v58, %v3551_v5  ;;  %v7428_v42 = vld [vmem:[%s7857_s2 + $0x8] ss:$0 sm:$0xff] }
 0x28b   : > { %v3167_v52 = vadd.f32 %v3119_v9, %v3066_v6  ;;  %v2372_v59 = vsel %vm2312_vm4, %v2369_v55, %v7926_v2  ;;  %v2529_v15 = vmul.f32 %v6851_v56, %v7148_v39  ;;  %v2391_v14 = vrot.slane %v7390_v50, 4 }
 0x28c   : > { %v2476_v32 = vadd.f32 %v2372_v59, %v2198_v37  ;;  %v7413_v49 = vmul.f32 %v7410_v33, %v1880_v40  ;;  %v3656_v21 = vadd.f32 %v3550_v58, %v3379_v27  ;;  %v2963_v55 = vsel %vm2312_vm4, %v2960_v54, %v2962_v36 }
 0x28d   : > { %v3380_v9 = vadd.f32 %v3285_v1, %v3167_v52  ;;  %v3120_v46 = vmul.f32 %v7421_v30, %v7366_v45  ;;  %v3434_v43 = vmul.f32 %v7428_v42, %v1880_v40  ;;  %v1939_v36 = vmul.f32 %v6818_v51, %v7011_v48 }
 0x28e   : > { %v2577_v19 = vadd.f32 %v2529_v15, %v2476_v32  ;;  %v7437_v54 = vmul.f32 %v7321_v25, %v7059_v18  ;;  %v3775_v58 = vrot.slane %v3656_v21, 6  ;;  %v2252_v34 = vmul.f32 %v7218_v47, %v7011_v48  ;;  %v1881_v15 = vld [vmem:[#allocation3 + $0x200] sm:$0xff]  ;;  %v7456_v21 = vld [vmem:[#allocation3 + $0x208] sm:$0xff] }
 0x28f   : > { %v7431_v6 = vadd.f32 %v3552_v60, %v3380_v9  ;;  %v3553_v29 = vrot.slane %v3434_v43, 4  ;;  %v2253_v7 = vmul.f32 %v7218_v47, %v7059_v18  ;;  %v2972_v1 = vrot.slane %v7413_v49, 4 }
 0x290   : > { %v2790_v52 = vadd.f32 %v2693_v16, %v2577_v19  ;;  %v2104_v37 = vrot.slane %v7437_v54, 2  ;;  %v2373_v2 = vrot.slane %v2252_v34, 4  ;;  %v2531_v27 = vmul.f32 %v6851_v56, %v7198_v3 }
 0x291   : > { %v3776_v40 = vrot.slane %v7431_v6, 6  ;;  %v3554_v51 = vsel %vm2312_vm4, %v3551_v5, %v3553_v29  ;;  %v2374_v59 = vrot.slane %v2253_v7, 4  ;;  %v7927_v9 = vrot.slane %v7029_v63, 2 }
 0x292   : > { %v3067_v48 = vadd.f32 %v2963_v55, %v2790_v52  ;;  %v2619_v16 = vmul.f32 %v7247_v38, %v7198_v3  ;;  %v2477_v56 = vadd.f32 %v2373_v2, %v7045_v8  ;;  %v7462_v55 = vmul.f32 %v7247_v38, %v7257_v41 }
 0x293   : > { %v3777_v60 = vsel %vm3719_vm7, %v3775_v58, %v3776_v40  ;;  %v2105_v32 = vsel %vm1042_vm2, %v7927_v9, %v2104_v37  ;;  %v2375_v43 = vsel %vm2312_vm4, %v2373_v2, %v2374_v59  ;;  %v2844_v19 = vmul.f32 %v7410_v33, %v7198_v3  ;;  %v7468_v58 = vld [vmem:[#allocation3 + $0x210] sm:$0xff] }
 0x294   : > { %4544 = vmatprep.mubr.msk.f32.mxu1 %vm639_vm1, %v3777_v60  ;;  %v2200_v5 = vadd.f32 %v2105_v32, %v1939_v36  ;;  %v3168_v6 = vadd.f32 %v3120_v46, %v3067_v48  ;;  %v2695_v63 = vrot.slane %v2619_v16, 2  ;;  %v2845_v54 = vmul.f32 %v7410_v33, %v7257_v41 }
 0x295   : > { %v2578_v36 = vadd.f32 %v7242_v22, %v2477_v56  ;;  %v2696_v34 = vrot.slane %v7462_v55, 2  ;;  %v3121_v8 = vmul.f32 %v7421_v30, %v1881_v15  ;;  %v2964_v46 = vrot.slane %v2844_v19, 4  ;;  %v7481_v22 = vld [vmem:[%s7857_s2 + $0x7] ss:$0 sm:$0xff] }
 0x296   : > { %v2478_v29 = vadd.f32 %v2375_v43, %v2200_v5  ;;  %v3381_v7 = vadd.f32 %v3284_v24, %v3168_v6  ;;  %v2965_v52 = vrot.slane %v2845_v54, 4  ;;  %v3122_v2 = vmul.f32 %v7421_v30, %v7456_v21  ;;  %v7498_v54 = vld [vmem:[%s7857_s2] ss:$0 sm:$0xff] }
 0x297   : > { %v2697_v48 = vsel %vm1042_vm2, %v2695_v63, %v2696_v34  ;;  %v2791_v9 = vadd.f32 %v2695_v63, %v2578_v36  ;;  %v3210_v32 = vmul.f32 %v7481_v22, %v7456_v21  ;;  %v7488_v24 = vmul.f32 %v7481_v22, %v7468_v58 }
 0x298   : > { %v2579_v60 = vadd.f32 %v2531_v27, %v2478_v29  ;;  %v3658_v16 = vadd.f32 %v3554_v51, %v3381_v7  ;;  %v2966_v57 = vsel %vm2312_vm4, %v2964_v46, %v2965_v52  ;;  %v3435_v27 = vmul.f32 %v7428_v42, %v7456_v21  ;;  %v1884_v51 = vld [vmem:[#allocation3 + $0x218] sm:$0xff] }
 0x299   : > { %v3068_v43 = vadd.f32 %v2964_v46, %v2791_v9  ;;  %v3286_v56 = vrot.slane %v3210_v32, 2  ;;  %v3436_v55 = vmul.f32 %v7428_v42, %v7468_v58  ;;  %v3287_v63 = vrot.slane %v7488_v24, 2 }
 0x29a   : > { %v2792_v5 = vadd.f32 %v2697_v48, %v2579_v60  ;;  %v3778_v6 = vrot.slane %v3658_v16, 6  ;;  %v3555_v19 = vrot.slane %v3435_v27, 4  ;;  %v1940_v29 = vmul.f32 %v7498_v54, %v7059_v18  ;;  %v7512_v16 = vld [vmem:[%s7857_s2 + $0x3] ss:$0 sm:$0xff] }
 0x29b   : > { %v3169_v7 = vadd.f32 %v3121_v8, %v3068_v43  ;;  %v3556_v46 = vrot.slane %v3436_v55, 4  ;;  %v2377_v60 = vsel %vm2312_vm4, %v2374_v59, %v2376_v13  ;;  %v3288_v9 = vsel %vm1042_vm2, %v3286_v56, %v3287_v63 }
 0x29c   : > { %v3069_v36 = vadd.f32 %v2966_v57, %v2792_v5  ;;  %v3779_v48 = vsel %vm3719_vm7, %v3776_v40, %v3778_v6  ;;  %v2201_v32 = vadd.f32 %v2104_v37, %v1940_v29  ;;  %v2532_v18 = vmul.f32 %v7512_v16, %v7257_v41 }
 0x29d   : > { %4545 = vmatmul.mubr.msk.f32.gmra.mxu1 %vm639_vm1, %v3779_v48  ;;  %v7518_v26 = vmul.f32 %v7512_v16, %v1881_v15  ;;  %v3382_v40 = vadd.f32 %v3286_v56, %v3169_v7  ;;  %v7521_v59 = vmul.f32 %v7410_v33, %v1884_v51  ;;  %v3557_v37 = vsel %vm2312_vm4, %v3555_v19, %v3556_v46 }
 0x29e   : > { %v3170_v13 = vadd.f32 %v3122_v2, %v3069_v36  ;;  %v2479_v8 = vadd.f32 %v2377_v60, %v2201_v32  ;;  %v2968_v57 = vsel %vm2312_vm4, %v2965_v52, %v2967_v0  ;;  %v3437_v27 = vmul.f32 %v7428_v42, %v1884_v51 }
 0x29f   : > { %v3659_v43 = vadd.f32 %v3555_v19, %v3382_v40  ;;  %v2977_v55 = vrot.slane %v7521_v59, 4  ;;  %v3123_v15 = vmul.f32 %v7421_v30, %v7468_v58  ;;  %v7533_v6 = vmul.f32 %v7321_v25, %v7148_v39  ;;  %v1885_v40 = vld [vmem:[#allocation3 + $0x220] sm:$0xff] }
 0x2a0   : > { %v3383_v5 = vadd.f32 %v3288_v9, %v3170_v13  ;;  %v2580_v2 = vadd.f32 %v2532_v18, %v2479_v8  ;;  %v3558_v56 = vrot.slane %v3437_v27, 4  ;;  %v2255_v4 = vmul.f32 %v7218_v47, %v7105_v62 }
 0x2a1   : > { %v3780_v0 = vrot.slane %v3659_v43, 6  ;;  %v1942_v52 = vmul.f32 %v7498_v54, %v7105_v62  ;;  %v2256_v19 = vmul.f32 %v7218_v47, %v7148_v39  ;;  %v2107_v36 = vrot.slane %v7533_v6, 2  ;;  %v7547_v62 = vld [vmem:[#allocation3 + $0x228] sm:$0xff] }
 0x2a2   : > { %v3660_v29 = vadd.f32 %v3557_v37, %v3383_v5  ;;  %v2793_v51 = vadd.f32 %v2696_v34, %v2580_v2  ;;  %v2378_v7 = vrot.slane %v2255_v4, 4  ;;  %v2534_v60 = vmul.f32 %v7512_v16, %v7308_v12 }
 0x2a3   : > { %v3559_v9 = vsel %vm2312_vm4, %v3556_v46, %v3558_v56  ;;  %v2379_v32 = vrot.slane %v2256_v19, 4  ;;  %v2621_v18 = vmul.f32 %v7247_v38, %v7308_v12  ;;  %v7928_v37 = vrot.slane %v7118_v17, 2  ;;  %v7560_v56 = vld [vmem:[#allocation3 + $0x230] sm:$0xff] }
 0x2a4   : > { %v3781_v48 = vrot.slane %v3660_v29, 6  ;;  %v3070_v13 = vadd.f32 %v2968_v57, %v2793_v51  ;;  %v2480_v8 = vadd.f32 %v2378_v7, %v7185_v10  ;;  %v7555_v27 = vmul.f32 %v7247_v38, %v7366_v45 }
 0x2a5   : > { %v2108_v34 = vsel %vm1042_vm2, %v7928_v37, %v2107_v36  ;;  %v2380_v43 = vsel %vm2312_vm4, %v2378_v7, %v2379_v32  ;;  %v2698_v2 = vrot.slane %v2621_v18, 2  ;;  %v2847_v10 = vmul.f32 %v7410_v33, %v7308_v12 }
 0x2a6   : > { %v3782_v46 = vsel %vm3719_vm7, %v3780_v0, %v3781_v48  ;;  %v2203_v5 = vadd.f32 %v2108_v34, %v1942_v52  ;;  %v3171_v57 = vadd.f32 %v3123_v15, %v3070_v13  ;;  %v2581_v17 = vadd.f32 %v7401_v23, %v2480_v8 }
 0x2a7   : > { %4547 = vmatprep.mubr.msk.f32.mxu1 %vm639_vm1, %v3782_v46  ;;  %v2699_v6 = vrot.slane %v7555_v27, 2  ;;  %v2848_v29 = vmul.f32 %v7410_v33, %v7366_v45  ;;  %v3124_v0 = vmul.f32 %v7421_v30, %v1885_v40  ;;  %v3125_v52 = vmul.f32 %v7421_v30, %v7547_v62 }
 0x2a8   : > { %v2481_v4 = vadd.f32 %v2380_v43, %v2203_v5  ;;  %v3384_v15 = vadd.f32 %v3287_v63, %v3171_v57  ;;  %v2794_v23 = vadd.f32 %v2698_v2, %v2581_v17  ;;  %v2969_v51 = vrot.slane %v2847_v10, 4  ;;  %v1888_v10 = vld [vmem:[#allocation3 + $0x238] sm:$0xff] }
 0x2a9   : > { %v2700_v19 = vsel %vm1042_vm2, %v2698_v2, %v2699_v6  ;;  %v2970_v18 = vrot.slane %v2848_v29, 4  ;;  %v3212_v13 = vmul.f32 %v7481_v22, %v7547_v62  ;;  %v7578_v37 = vmul.f32 %v7481_v22, %v7560_v56 }
 0x2aa   : > { %v2582_v7 = vadd.f32 %v2534_v60, %v2481_v4  ;;  %v3661_v34 = vadd.f32 %v3559_v9, %v3384_v15  ;;  %v3071_v8 = vadd.f32 %v2969_v51, %v2794_v23  ;;  %v3438_v27 = vmul.f32 %v7428_v42, %v7547_v62 }
 0x2ab   : > { %v3439_v24 = vmul.f32 %v7428_v42, %v7560_v56  ;;  %v2971_v46 = vsel %vm2312_vm4, %v2969_v51, %v2970_v18  ;;  %v3289_v60 = vrot.slane %v3212_v13, 2  ;;  %v3290_v5 = vrot.slane %v7578_v37, 2 }
 0x2ac   : > { %v2795_v63 = vadd.f32 %v2700_v19, %v2582_v7  ;;  %v3783_v43 = vrot.slane %v3661_v34, 6  ;;  %v3172_v2 = vadd.f32 %v3124_v0, %v3071_v8  ;;  %v3560_v57 = vrot.slane %v3438_v27, 4 }
 0x2ad   : > { %v3561_v17 = vrot.slane %v3439_v24, 4  ;;  %v7587_v9 = vmul.f32 %v7512_v16, %v1885_v40  ;;  %v3291_v29 = vsel %vm1042_vm2, %v3289_v60, %v3290_v5  ;;  %v1943_v15 = vmul.f32 %v7498_v54, %v7148_v39 }
 0x2ae   : > { %v3072_v4 = vadd.f32 %v2971_v46, %v2795_v63  ;;  %v3784_v19 = vsel %vm3719_vm7, %v3781_v48, %v3783_v43  ;;  %v3385_v23 = vadd.f32 %v3289_v60, %v3172_v2  ;;  %v7929_v0 = vrot.slane %v7174_v31, 4 }
 0x2af   : > { %v3562_v51 = vsel %vm2312_vm4, %v3560_v57, %v3561_v17  ;;  %4548 = vmatmul.mubr.msk.f32.gmra.mxu1 %vm639_vm1, %v3784_v19  ;;  %v2204_v13 = vadd.f32 %v2107_v36, %v1943_v15  ;;  %v2535_v34 = vmul.f32 %v7512_v16, %v7366_v45  ;;  %v7603_v8 = vmul.f32 %v7410_v33, %v1888_v10  ;;  %v1889_v19 = vld [vmem:[#allocation3 + $0x240] sm:$0xff] }
 0x2b0   : > { %v2382_v7 = vsel %vm2312_vm4, %v2379_v32, %v7929_v0  ;;  %v3173_v40 = vadd.f32 %v3125_v52, %v3072_v4  ;;  %v3662_v39 = vadd.f32 %v3560_v57, %v3385_v23  ;;  %v2973_v48 = vsel %vm2312_vm4, %v2970_v18, %v2972_v1  ;;  %v1890_v0 = vld [vmem:[#allocation3 + $0x248] sm:$0xff] }
 0x2b1   : > { %v3126_v31 = vmul.f32 %v7421_v30, %v7560_v56  ;;  %v3440_v32 = vmul.f32 %v7428_v42, %v1888_v10  ;;  %v2482_v24 = vadd.f32 %v2382_v7, %v2204_v13  ;;  %v1945_v36 = vmul.f32 %v7498_v54, %v7198_v3 }
 0x2b2   : > { %v3386_v27 = vadd.f32 %v3291_v29, %v3173_v40  ;;  %v7615_v52 = vmul.f32 %v7321_v25, %v7257_v41  ;;  %v3785_v63 = vrot.slane %v3662_v39, 6  ;;  %v2258_v49 = vmul.f32 %v7218_v47, %v7198_v3 }
 0x2b3   : > { %v3563_v46 = vrot.slane %v3440_v32, 4  ;;  %v2259_v1 = vmul.f32 %v7218_v47, %v7257_v41  ;;  %v2583_v60 = vadd.f32 %v2535_v34, %v2482_v24  ;;  %v2537_v2 = vmul.f32 %v7512_v16, %v7456_v21  ;;  %v7639_v34 = vpop.f32.mrf.mxu1  ;;  %v1891_v32 = vld [vmem:[#allocation3 + $0x250] sm:$0xff] }
 0x2b4   : > { %v7621_v18 = vadd.f32 %v3562_v51, %v3386_v27  ;;  %v2110_v43 = vrot.slane %v7615_v52, 2  ;;  %v2383_v10 = vrot.slane %v2258_v49, 4  ;;  %v2623_v29 = vmul.f32 %v7247_v38, %v7456_v21 }
 0x2b5   : > { %v3564_v57 = vsel %vm2312_vm4, %v3561_v17, %v3563_v46  ;;  %v2384_v4 = vrot.slane %v2259_v1, 4  ;;  %v2796_v15 = vadd.f32 %v2699_v6, %v2583_v60  ;;  %v7635_v51 = vmul.f32 %v7247_v38, %v7468_v58  ;;  %v7655_v60 = vpop.f32.mrf.mxu1 }
 0x2b6   : > { %v3786_v3 = vrot.slane %v7621_v18, 6  ;;  %v2111_v23 = vsel %vm1042_vm2, %v2109_v20, %v2110_v43  ;;  %v2483_v40 = vadd.f32 %v2383_v10, %v7293_v61  ;;  %v2701_v13 = vrot.slane %v2623_v29, 2 }
 0x2b7   : > { %v2206_v7 = vadd.f32 %v2111_v23, %v1945_v36  ;;  %v2385_v17 = vsel %vm2312_vm4, %v2383_v10, %v2384_v4  ;;  %v3073_v39 = vadd.f32 %v2973_v48, %v2796_v15  ;;  %v2702_v35 = vrot.slane %v7635_v51, 2 }
 0x2b8   : > { %v3787_v6 = vsel %vm3719_vm7, %v3785_v63, %v3786_v3  ;;  %v2850_v20 = vmul.f32 %v7410_v33, %v7456_v21  ;;  %v2584_v24 = vadd.f32 %v7518_v26, %v2483_v40  ;;  %v2851_v61 = vmul.f32 %v7410_v33, %v7468_v58 }
 0x2b9   : > { %4550 = vmatprep.mubr.msk.f32.mxu1 %vm639_vm1, %v3787_v6  ;;  %v2484_v27 = vadd.f32 %v2385_v17, %v2206_v7  ;;  %v3127_v36 = vmul.f32 %v7421_v30, %v1889_v19  ;;  %v3174_v52 = vadd.f32 %v3126_v31, %v3073_v39  ;;  %v2703_v48 = vsel %vm1042_vm2, %v2701_v13, %v2702_v35 }
 0x2ba   : > { %v2974_v63 = vrot.slane %v2850_v20, 4  ;;  %v3128_v46 = vmul.f32 %v7421_v30, %v1890_v0  ;;  %v2797_v49 = vadd.f32 %v2701_v13, %v2584_v24  ;;  %v2975_v1 = vrot.slane %v2851_v61, 4 }
 0x2bb   : > { %v2585_v21 = vadd.f32 %v2537_v2, %v2484_v27  ;;  %v3214_v18 = vmul.f32 %v7481_v22, %v1890_v0  ;;  %v3387_v26 = vadd.f32 %v3290_v5, %v3174_v52  ;;  %v7660_v10 = vmul.f32 %v7481_v22, %v1891_v32  ;;  %v1892_v5 = vld [vmem:[#allocation3 + $0x258] sm:$0xff]  ;;  %v7671_v27 = vpop.f32.mrf.mxu1 }
 0x2bc   : > { %v3441_v31 = vmul.f32 %v7428_v42, %v1890_v0  ;;  %v3442_v29 = vmul.f32 %v7428_v42, %v1891_v32  ;;  %v2976_v19 = vsel %vm2312_vm4, %v2974_v63, %v2975_v1  ;;  %v3074_v2 = vadd.f32 %v2974_v63, %v2797_v49 }
 0x2bd   : > { %v2798_v15 = vadd.f32 %v2703_v48, %v2585_v21  ;;  %v3292_v23 = vrot.slane %v3214_v18, 2  ;;  %v3664_v7 = vadd.f32 %v3564_v57, %v3387_v26  ;;  %v3293_v17 = vrot.slane %v7660_v10, 2  ;;  %v7692_v59 = vpop.f32.mrf.mxu1 }
 0x2be   : > { %v3565_v40 = vrot.slane %v3441_v31, 4  ;;  %v3566_v13 = vrot.slane %v3442_v29, 4  ;;  %v3175_v37 = vadd.f32 %v3127_v36, %v3074_v2  ;;  %v1946_v39 = vmul.f32 %v7498_v54, %v7257_v41 }
 0x2bf   : > { %v3075_v6 = vadd.f32 %v2976_v19, %v2798_v15  ;;  %v7930_v0 = vrot.slane %v7284_v28, 4  ;;  %v3788_v24 = vrot.slane %v3664_v7, 6  ;;  %v3294_v57 = vsel %vm1042_vm2, %v3292_v23, %v3293_v17  ;;  %v1893_v7 = vld [vmem:[#allocation3 + $0x260] sm:$0xff] }
 0x2c0   : > { %v3567_v61 = vsel %vm2312_vm4, %v3565_v40, %v3566_v13  ;;  %v2538_v36 = vmul.f32 %v7512_v16, %v7468_v58  ;;  %v3388_v48 = vadd.f32 %v3292_v23, %v3175_v37  ;;  %v2207_v63 = vadd.f32 %v2110_v43, %v1946_v39  ;;  %v1894_v37 = vld [vmem:[#allocation3 + $0x268] sm:$0xff] }
 0x2c1   : > { %v2387_v20 = vsel %vm2312_vm4, %v2384_v4, %v7930_v0  ;;  %v3176_v52 = vadd.f32 %v3128_v46, %v3075_v6  ;;  %v2978_v41 = vsel %vm2312_vm4, %v2975_v1, %v2977_v55  ;;  %v3789_v28 = vsel %vm3719_vm7, %v3786_v3, %v3788_v24 }
 0x2c2   : > { %v3129_v4 = vmul.f32 %v7421_v30, %v1891_v32  ;;  %v3443_v21 = vmul.f32 %v7428_v42, %v1892_v5  ;;  %v1948_v49 = vmul.f32 %v7498_v54, %v7308_v12  ;;  %4551 = vmatmul.mubr.msk.f32.gmra.mxu1 %vm639_vm1, %v3789_v28  ;;  %v3665_v58 = vadd.f32 %v3565_v40, %v3388_v48 }
 0x2c3   : > { %v3389_v18 = vadd.f32 %v3294_v57, %v3176_v52  ;;  %v2485_v46 = vadd.f32 %v2387_v20, %v2207_v63  ;;  %v7690_v43 = vmul.f32 %v7321_v25, %v7366_v45  ;;  %v2261_v3 = vmul.f32 %v7218_v47, %v7308_v12 }
 0x2c4   : > { %v3568_v55 = vrot.slane %v3443_v21, 4  ;;  %v2262_v32 = vmul.f32 %v7218_v47, %v7366_v45  ;;  %v2540_v1 = vmul.f32 %v7512_v16, %v7547_v62  ;;  %v3790_v31 = vrot.slane %v3665_v58, 6 }
 0x2c5   : > { %v7700_v26 = vadd.f32 %v3567_v61, %v3389_v18  ;;  %v2586_v29 = vadd.f32 %v2538_v36, %v2485_v46  ;;  %v2113_v15 = vrot.slane %v7690_v43, 2  ;;  %v2388_v19 = vrot.slane %v2261_v3, 4 }
 0x2c6   : > { %v3569_v25 = vsel %vm2312_vm4, %v3566_v13, %v3568_v55  ;;  %v2389_v2 = vrot.slane %v2262_v32, 4  ;;  %v2625_v23 = vmul.f32 %v7247_v38, %v7547_v62  ;;  %v7714_v6 = vmul.f32 %v7247_v38, %v7560_v56  ;;  %v7716_v13 = vpop.f32.mrf.mxu1  ;;  %v7725_v38 = vld [vmem:[#allocation3 + $0x270] sm:$0xff] }
 0x2c7   : > { %v3791_v12 = vrot.slane %v7700_v26, 6  ;;  %v2799_v47 = vadd.f32 %v2702_v35, %v2586_v29  ;;  %v2114_v40 = vsel %vm1042_vm2, %v2112_v44, %v2113_v15  ;;  %v2486_v0 = vadd.f32 %v2388_v19, %v7347_v11 }
 0x2c8   : > { %v2209_v5 = vadd.f32 %v2114_v40, %v1948_v49  ;;  %v2390_v39 = vsel %vm2312_vm4, %v2388_v19, %v2389_v2  ;;  %v2704_v20 = vrot.slane %v2625_v23, 2  ;;  %v2705_v53 = vrot.slane %v7714_v6, 2  ;;  %v3951_v63 = vpop.f32.mrf.mxu1 }
 0x2c9   : > { %v3792_v51 = vsel %vm3719_vm7, %v3790_v31, %v3791_v12  ;;  %v3076_v35 = vadd.f32 %v2978_v41, %v2799_v47  ;;  %v2853_v44 = vmul.f32 %v7410_v33, %v7547_v62  ;;  %v2587_v57 = vadd.f32 %v7587_v9, %v2486_v0 }
 0x2ca   : > { %4553 = vmatprep.mubr.msk.f32.mxu1 %vm639_vm1, %v3792_v51  ;;  %v2487_v24 = vadd.f32 %v2390_v39, %v2209_v5  ;;  %v2854_v61 = vmul.f32 %v7410_v33, %v7560_v56  ;;  %v3130_v11 = vmul.f32 %v7421_v30, %v1893_v7  ;;  %v2706_v52 = vsel %vm1042_vm2, %v2704_v20, %v2705_v53  ;;  %v1896_v7 = vld [vmem:[#allocation3 + $0x278] sm:$0xff] }
 0x2cb   : > { %v3177_v36 = vadd.f32 %v3129_v4, %v3076_v35  ;;  %v2979_v48 = vrot.slane %v2853_v44, 4  ;;  %v3131_v62 = vmul.f32 %v7421_v30, %v1894_v37  ;;  %v2800_v28 = vadd.f32 %v2704_v20, %v2587_v57 }
 0x2cc   : > { %v2588_v41 = vadd.f32 %v2540_v1, %v2487_v24  ;;  %v2980_v21 = vrot.slane %v2854_v61, 4  ;;  %v3216_v49 = vmul.f32 %v7481_v22, %v1894_v37  ;;  %v7740_v33 = vmul.f32 %v7481_v22, %v7725_v38  ;;  %v4522_v1 = vpop.f32.mrf.mxu1 }
 0x2cd   : > { %v3390_v9 = vadd.f32 %v3293_v17, %v3177_v36  ;;  %v3444_v4 = vmul.f32 %v7428_v42, %v1894_v37  ;;  %v7745_v18 = vmul.f32 %v7428_v42, %v7725_v38  ;;  %v3077_v43 = vadd.f32 %v2979_v48, %v2800_v28 }
 0x2ce   : > { %v2801_v58 = vadd.f32 %v2706_v52, %v2588_v41  ;;  %v2981_v46 = vsel %vm2312_vm4, %v2979_v48, %v2980_v21  ;;  %v3295_v55 = vrot.slane %v3216_v49, 2  ;;  %v3296_v32 = vrot.slane %v7740_v33, 2  ;;  %v3961_v50 = vpop.f32.mrf.mxu1 }
 0x2cf   : > { %v3667_v3 = vadd.f32 %v3569_v25, %v3390_v9  ;;  %v3570_v10 = vrot.slane %v3444_v4, 4  ;;  %v3571_v17 = vrot.slane %v7745_v18, 4  ;;  %v3178_v26 = vadd.f32 %v3130_v11, %v3077_v43 }
 0x2d0   : > { %v3078_v22 = vadd.f32 %v2981_v46, %v2801_v58  ;;  %v1949_v31 = vmul.f32 %v7498_v54, %v7366_v45  ;;  %v3297_v19 = vsel %vm1042_vm2, %v3295_v55, %v3296_v32  ;;  %v2392_v23 = vsel %vm2312_vm4, %v2389_v2, %v2391_v14 }
 0x2d1   : > { %v3793_v29 = vrot.slane %v3667_v3, 6  ;;  %v3391_v25 = vadd.f32 %v3295_v55, %v3178_v26  ;;  %v2541_v37 = vmul.f32 %v7512_v16, %v7560_v56  ;;  %v2982_v5 = vrot.slane %v7603_v8, 4 }
 0x2d2   : > { %v3179_v47 = vadd.f32 %v3131_v62, %v3078_v22  ;;  %v2210_v40 = vadd.f32 %v2113_v15, %v1949_v31  ;;  %v3572_v45 = vsel %vm2312_vm4, %v3570_v10, %v3571_v17  ;;  %v4091_v54 = vmul.f32 0.999995, %v7639_v34 }
 0x2d3   : > { %v3794_v39 = vsel %vm3719_vm7, %v3791_v12, %v3793_v29  ;;  %v3668_v2 = vadd.f32 %v3570_v10, %v3391_v25  ;;  %v4090_v0 = vmul.f32 0.999995, %v7655_v60  ;;  %v3446_v16 = vmul.f32 %v7428_v42, %v1896_v7 }
 0x2d4   : > { %4554 = vmatmul.mubr.msk.f32.gmra.mxu1 %vm639_vm1, %v3794_v39  ;;  %v3392_v14 = vadd.f32 %v3297_v19, %v3179_v47  ;;  %v2488_v15 = vadd.f32 %v2392_v23, %v2210_v40  ;;  %4353 = vst.msk [vmem:[%s5220_s25 + $0x208] sm:$0xff] %vm639_vm1, %v4091_v54  ;;  %v4093_v56 = vmul.f32 0.999995, %v7671_v27  ;;  %v4092_v8 = vmul.f32 0.999995, %v7692_v59  ;;  %v4525_v35 = vpop.f32.mrf.mxu1 }
 0x2d5   : > { %v3795_v12 = vrot.slane %v3668_v2, 6  ;;  %4352 = vst.msk [vmem:[%s5220_s25 + $0x200] sm:$0xff] %vm639_vm1, %v4090_v0  ;;  %v4095_v51 = vmul.f32 0.999995, %v7716_v13  ;;  %v2983_v60 = vsel %vm2312_vm4, %v2980_v21, %v2982_v5  ;;  %v4094_v42 = vmul.f32 0.999995, %v3951_v63 }
 0x2d6   : > { %v3669_v34 = vadd.f32 %v3572_v45, %v3392_v14  ;;  %v2589_v20 = vadd.f32 %v2541_v37, %v2488_v15  ;;  %4355 = vst.msk [vmem:[%s5220_s25 + $0x218] sm:$0xff] %vm639_vm1, %v4093_v56  ;;  %4354 = vst.msk [vmem:[%s5220_s25 + $0x210] sm:$0xff] %vm639_vm1, %v4092_v8  ;;  %v4097_v27 = vmul.f32 0.999995, %v4522_v1  ;;  %v4096_v59 = vmul.f32 0.999995, %v3961_v50  ;;  %v3971_v11 = vpop.f32.mrf.mxu1 }
 0x2d7   : > { %v3132_v13 = vmul.f32 %v7421_v30, %v7725_v38  ;;  %4357 = vst.msk [vmem:[%s5220_s25 + $0x228] sm:$0xff] %vm639_vm1, %v4095_v51  ;;  %v4099_v57 = vmul.f32 0.999995, %v4525_v35  ;;  %v3573_v61 = vrot.slane %v3446_v16, 4  ;;  %4356 = vst.msk [vmem:[%s5220_s25 + $0x220] sm:$0xff] %vm639_vm1, %v4094_v42 }
 0x2d8   : > { %v3796_v44 = vrot.slane %v3669_v34, 6  ;;  %v2802_v24 = vadd.f32 %v2705_v53, %v2589_v20  ;;  %4359 = vst.msk [vmem:[%s5220_s25 + $0x238] sm:$0xff] %vm639_vm1, %v4097_v27  ;;  %4358 = vst.msk [vmem:[%s5220_s25 + $0x230] sm:$0xff] %vm639_vm1, %v4096_v59  ;;  %v4098_v53 = vmul.f32 0.999995, %v3971_v11 }
 0x2d9   : > { %4361 = vst.msk [vmem:[%s5220_s25 + $0x248] sm:$0xff] %vm639_vm1, %v4099_v57  ;;  %v3574_v38 = vsel %vm2312_vm4, %v3571_v17, %v3573_v61 }
 0x2da   : > { %v3797_v36 = vsel %vm3719_vm7, %v3795_v12, %v3796_v44  ;;  %v3079_v6 = vadd.f32 %v2983_v60, %v2802_v24  ;;  %4360 = vst.msk [vmem:[%s5220_s25 + $0x240] sm:$0xff] %vm639_vm1, %v4098_v53 }
 0x2db   : > { %4556 = vmatprep.mubr.msk.f32.mxu1 %vm639_vm1, %v3797_v36 }
 0x2dc   : > { %v3180_v30 = vadd.f32 %v3132_v13, %v3079_v6 }
 0x2de   : > { %v3393_v52 = vadd.f32 %v3296_v32, %v3180_v30 }
 0x2e0   : > { %v3670_v48 = vadd.f32 %v3574_v38, %v3393_v52 }
 0x2e2   : > { %v3798_v62 = vrot.slane %v3670_v48, 6 }
 0x2e4   : > { %v3799_v63 = vsel %vm3719_vm7, %v3796_v44, %v3798_v62 }
 0x2e5   : > { %4557 = vmatmul.mubr.msk.f32.gmra.mxu1 %vm639_vm1, %v3799_v63 }
 0x2e8   : > { %v4528_v41 = vpop.f32.mrf.mxu1 }
 0x2e9   : > { %v4101_v28 = vmul.f32 0.999995, %v4528_v41 }
 0x2ea   : > { %v3981_v21 = vpop.f32.mrf.mxu1 }
 0x2eb   : > { %4363 = vst.msk [vmem:[%s5220_s25 + $0x258] sm:$0xff] %vm639_vm1, %v4101_v28  ;;  %v4100_v49 = vmul.f32 0.999995, %v3981_v21 }
 0x2ed   : > { %4362 = vst.msk [vmem:[%s5220_s25 + $0x250] sm:$0xff] %vm639_vm1, %v4100_v49 }
 0x2fc   : > { %v4531_v9 = vpop.f32.mrf.mxu1 }
 0x2fd   : > { %v4103_v33 = vmul.f32 0.999995, %v4531_v9 }
 0x2fe   : > { %v3991_v4 = vpop.f32.mrf.mxu1 }
 0x2ff   : > { %4365 = vst.msk [vmem:[%s5220_s25 + $0x268] sm:$0xff] %vm639_vm1, %v4103_v33  ;;  %v4102_v18 = vmul.f32 0.999995, %v3991_v4 }
 0x301   : > { %4364 = vst.msk [vmem:[%s5220_s25 + $0x260] sm:$0xff] %vm639_vm1, %v4102_v18 }
 0x30f   : > { %v4534_v58 = vpop.f32.mrf.mxu1 }
 0x310   : > { %v4105_v46 = vmul.f32 0.999995, %v4534_v58 }
 0x311   : > { %v4001_v43 = vpop.f32.mrf.mxu1 }
 0x312   : > { %4367 = vst.msk [vmem:[%s5220_s25 + $0x278] sm:$0xff] %vm639_vm1, %v4105_v46  ;;  %v4104_v55 = vmul.f32 0.999995, %v4001_v43 }
 0x314   : > { %4366 = vst.msk [vmem:[%s5220_s25 + $0x270] sm:$0xff] %vm639_vm1, %v4104_v55 }
 0x322   : > { %v4537_v3 = vpop.f32.mrf.mxu1 }
 0x323   : > { %v4107_v32 = vmul.f32 0.999995, %v4537_v3 }
 0x324   : > { %v4011_v10 = vpop.f32.mrf.mxu1 }
 0x325   : > { %4369 = vst.msk [vmem:[%s5220_s25 + $0x288] sm:$0xff] %vm639_vm1, %v4107_v32  ;;  %v4106_v17 = vmul.f32 0.999995, %v4011_v10 }
 0x327   : > { %4368 = vst.msk [vmem:[%s5220_s25 + $0x280] sm:$0xff] %vm639_vm1, %v4106_v17 }
 0x336   : > { %v4540_v1 = vpop.f32.mrf.mxu1 }
 0x337   : > { %v4109_v22 = vmul.f32 0.999995, %v4540_v1 }
 0x338   : > { %v4021_v26 = vpop.f32.mrf.mxu1 }
 0x339   : > { %4371 = vst.msk [vmem:[%s5220_s25 + $0x298] sm:$0xff] %vm639_vm1, %v4109_v22  ;;  %v4108_v31 = vmul.f32 0.999995, %v4021_v26 }
 0x33b   : > { %4370 = vst.msk [vmem:[%s5220_s25 + $0x290] sm:$0xff] %vm639_vm1, %v4108_v31 }
 0x34a   : > { %v4543_v29 = vpop.f32.mrf.mxu1 }
 0x34b   : > { %v4111_v19 = vmul.f32 0.999995, %v4543_v29 }
 0x34c   : > { %v4031_v23 = vpop.f32.mrf.mxu1 }
 0x34d   : > { %4373 = vst.msk [vmem:[%s5220_s25 + $0x2a8] sm:$0xff] %vm639_vm1, %v4111_v19  ;;  %v4110_v47 = vmul.f32 0.999995, %v4031_v23 }
 0x34f   : > { %4372 = vst.msk [vmem:[%s5220_s25 + $0x2a0] sm:$0xff] %vm639_vm1, %v4110_v47 }
 0x35d   : > { %v4546_v25 = vpop.f32.mrf.mxu1 }
 0x35e   : > { %v4113_v7 = vmul.f32 0.999995, %v4546_v25 }
 0x35f   : > { %v4041_v40 = vpop.f32.mrf.mxu1 }
 0x360   : > { %4375 = vst.msk [vmem:[%s5220_s25 + $0x2b8] sm:$0xff] %vm639_vm1, %v4113_v7  ;;  %v4112_v37 = vmul.f32 0.999995, %v4041_v40 }
 0x362   : > { %4374 = vst.msk [vmem:[%s5220_s25 + $0x2b0] sm:$0xff] %vm639_vm1, %v4112_v37 }
 0x36f   : > { %v4549_v5 = vpop.f32.mrf.mxu1 }
 0x370   : > { %v4115_v39 = vmul.f32 0.999995, %v4549_v5 }
 0x371   : > { %v4051_v45 = vpop.f32.mrf.mxu1 }
 0x372   : > { %4377 = vst.msk [vmem:[%s5220_s25 + $0x2c8] sm:$0xff] %vm639_vm1, %v4115_v39  ;;  %v4114_v54 = vmul.f32 0.999995, %v4051_v45 }
 0x374   : > { %4376 = vst.msk [vmem:[%s5220_s25 + $0x2c0] sm:$0xff] %vm639_vm1, %v4114_v54 }
 0x382   : > { %v4552_v50 = vpop.f32.mrf.mxu1 }
 0x383   : > { %v4117_v14 = vmul.f32 0.999995, %v4552_v50 }
 0x384   : > { %v4061_v2 = vpop.f32.mrf.mxu1 }
 0x385   : > { %4379 = vst.msk [vmem:[%s5220_s25 + $0x2d8] sm:$0xff] %vm639_vm1, %v4117_v14  ;;  %v4116_v15 = vmul.f32 0.999995, %v4061_v2 }
 0x387   : > { %4378 = vst.msk [vmem:[%s5220_s25 + $0x2d0] sm:$0xff] %vm639_vm1, %v4116_v15 }
 0x394   : > { %v4555_v0 = vpop.f32.mrf.mxu1 }
 0x395   : > { %v4119_v16 = vmul.f32 0.999995, %v4555_v0 }
 0x396   : > { %v4071_v56 = vpop.f32.mrf.mxu1 }
 0x397   : > { %4381 = vst.msk [vmem:[%s5220_s25 + $0x2e8] sm:$0xff] %vm639_vm1, %v4119_v16  ;;  %v4118_v8 = vmul.f32 0.999995, %v4071_v56 }
 0x399   : > { %4380 = vst.msk [vmem:[%s5220_s25 + $0x2e0] sm:$0xff] %vm639_vm1, %v4118_v8 }
 0x3a5   : > { %v4558_v34 = vpop.f32.mrf.mxu1 }
 0x3a6   : > { %v4121_v12 = vmul.f32 0.999995, %v4558_v34 }
 0x3a7   : > { %v4081_v20 = vpop.f32.mrf.mxu1 }
 0x3a8   : > { %4383 = vst.msk [vmem:[%s5220_s25 + $0x2f8] sm:$0xff] %vm639_vm1, %v4121_v12  ;;  %v4120_v51 = vmul.f32 0.999995, %v4081_v20 }
 0x3aa   : > { %4382 = vst.msk [vmem:[%s5220_s25 + $0x2f0] sm:$0xff] %vm639_vm1, %v4120_v51 }
 0x3ab PF: > { %p14_p9 = scmp.ge.s32.totalorder %s4746_s20, 4   ;;  %s7931_s15 = smov %s4684_s16 }
 0x3ac   : > { %s7932_s16 = smov %s4688_s17  ;;  %s7933_s17 = smov %s4756_s23 }
 0x3ad   : > { %s7934_s18 = smov %s4746_s20  ;;  %16 = sbr.rel (!%p14_p9) target bundleno = 3 (0x3), region = 80 }
 0x3b2   :  { %4176 = vsyncpa [#allocation5], 1 }
 0x3b3   :  { %4178 = vsyncpa [#allocation5 + $0x1], 1 }

</bundles_post_ra>
